<compile_context>
chip_gen: v5e
topology: v5e:2x2
jax: 0.10.0
libtpu: 0.0.40
codegen_flags: <defaults>
</compile_context>

<pallas_src>
import functools
import re

import jax
import jax.numpy as jnp
from jax.experimental import pallas as pl
from jax.experimental.pallas import tpu as pltpu


# ---------------------------------------------------------------------------
# Pallas kernel: one grid step == TB batch elements.  The full stacked
# attention (matmuls, tanh, masked softmax over regions, weighted sum) runs
# inside the kernel; the stack loop is unrolled at trace time.
# ---------------------------------------------------------------------------
def _stacked_attention_kernel(img_ref, ques_ref, mask_ref, *refs,
                              num_stacks, block_b, num_regions, h_dtype):
    out_ref = refs[-1]
    p_refs = refs[:-1]                       # 5 refs per stack: WqT, bq, WiT, wh, bh

    TB, L = block_b, num_regions
    A = out_ref.shape[-1]

    img2 = img_ref[...]                      # (TB*L, d_img), compute dtype, flat
    masked = mask_ref[...] > 0.5             # (TB, L) bool, precomputed in wrapper

    u_c = ques_ref[...]                      # (TB, d_q) in compute dtype (MXU feed)
    u_f32 = None

    for s in range(num_stacks):
        WqT_ref, bq_ref, WiT_ref, wh_ref, bh_ref = p_refs[5 * s: 5 * s + 5]

        # Question projection on the MXU, f32 accumulation.
        ques_emb = (jnp.dot(u_c, WqT_ref[...],
                            preferred_element_type=jnp.float32)
                    + bq_ref[...])                                        # (TB, A) f32

        # Image projection (no bias): one big (TB*L, d_img) @ (d_img, A) matmul.
        img_emb = jnp.dot(img2, WiT_ref[...],
                          preferred_element_type=jnp.float32)             # (TB*L, A) f32
        # Only the matmul *result* is viewed 3-D; A % 128 == 0 so this split of
        # the sublane axis is layout-free when L % 8 == 0.
        img_emb3 = img_emb.reshape(TB, L, A)

        # h = tanh(ques broadcast over regions + img_emb); dropout == identity.
        # Elementwise work optionally in bf16 (v6e/v7x); reductions stay f32.
        q_h = ques_emb.astype(h_dtype)
        i_h = img_emb3.astype(h_dtype)
        h = jnp.tanh(q_h[:, None, :] + i_h)                               # (TB, L, A)

        # fc13 (att -> 1) as VPU multiply + lane reduce -> lane-dense logits.
        wh = wh_ref[...].astype(h_dtype)                                  # (1, A)
        prod = h * wh[None, :, :]                                         # (TB, L, A)
        logits = jnp.sum(prod.astype(jnp.float32), axis=-1) + bh_ref[0]   # (TB, L) f32

        # v_mask: -inf where the image row is all-zero (mask hoisted to wrapper).
        logits = jnp.where(masked, -jnp.inf, logits)

        # Softmax over regions (lane axis).  All-masked rows -> NaN, matching torch.
        m = jnp.max(logits, axis=-1, keepdims=True)
        e = jnp.exp(logits - m)
        p = e / jnp.sum(e, axis=-1, keepdims=True)                        # (TB, L)

        # Attention-weighted sum of img_emb over regions (f32).
        weight_sum = jnp.sum(img_emb3 * p[:, :, None], axis=1)            # (TB, A)

        u_f32 = ques_emb + weight_sum                                     # (TB, A) f32
        if s + 1 < num_stacks:
            u_c = u_f32.astype(u_c.dtype)    # single cast per stack transition

    out_ref[...] = u_f32.astype(out_ref.dtype)


# ---------------------------------------------------------------------------
# Hardware query (generation + VMEM capacity), with safe fallbacks.
# ---------------------------------------------------------------------------
def _tpu_generation_and_vmem():
    gen = None
    try:
        kind = jax.devices()[0].device_kind.lower()   # e.g. "tpu v5 lite", "tpu v6e"
        m = re.search(r"(\d+)", kind)
        if m:
            gen = int(m.group(1))
    except Exception:
        pass
    vmem = None
    try:
        vmem = int(pltpu.get_tpu_info().vmem_capacity_bytes)
    except Exception:
        pass
    if vmem is None:
        # 128 MiB on v5e/v6e; 64 MiB per TensorCore on v7x; conservative default.
        vmem = 128 * 1024 * 1024 if (gen is not None and gen <= 6) else 64 * 1024 * 1024
    return gen, vmem


# ---------------------------------------------------------------------------
# Batch-tile selection
# ---------------------------------------------------------------------------
def _pick_block_b(B, L, d_img, d_q, A, num_stacks, compute_itemsize,
                  h_itemsize, vmem_budget_bytes):
    """Pick the batch tile TB.

    TB must divide B and be sublane-aligned (multiple of 8, or the full batch).
    The VMEM estimate covers the double-buffered streaming tiles
    (img/ques/mask/out), the resident (single-buffered) weights and the f32
    intermediates (img_emb, h, temps) live inside one stack.

    Preference order: (1) grid splits evenly across v7x's 2 TCs, (2) grid >= 4,
    (3) TB*L a multiple of 256 (v6e/v7x MXU M fill), (4) largest TB (fewer
    ~0.35us grid steps, bigger MXU M).
    """
    d_ins = [d_q] + [A] * (num_stacks - 1)
    weight_bytes = sum((d_in * A + d_img * A) * compute_itemsize + 2 * A * 4
                       for d_in in d_ins)

    def vmem_est(tb):
        stream = 2 * (tb * L * d_img * compute_itemsize       # image tile
                      + tb * d_q * compute_itemsize           # question tile
                      + tb * L * 4                            # mask tile
                      + tb * A * 4)                           # output tile
        inter = (tb * L * A * (4 + h_itemsize)                 # img_emb (f32) + h
                 + 4 * tb * A * 4 + 4 * tb * L * 4)            # small temps
        return stream + weight_bytes + inter

    feasible = []
    for tb in range(B, 0, -1):
        if B % tb:
            continue
        if tb % 8 != 0 and tb != B:
            continue
        if vmem_est(tb) > vmem_budget_bytes:
            continue
        feasible.append(tb)
    if not feasible:
        aligned = [tb for tb in range(B, 0, -1)
                   if B % tb == 0 and (tb % 8 == 0 or tb == B)]
        return min(aligned)

    def score(tb):
        g = B // tb
        return (g % 2 == 0 and g >= 2,      # even split across the 2 TCs (v7x)
                g >= 4,                     # enough steps to balance / pipeline
                (tb * L) % 256 == 0,        # fill the 2x256^2 MXU along M
                tb)                         # otherwise: biggest tile
    return max(feasible, key=score)


# ---------------------------------------------------------------------------
# Wrapper
# ---------------------------------------------------------------------------
def stacked_attention(img_feat, ques_feat, params, *, num_stacks, att_size,
                      block_b=None, compute_dtype=jnp.float32,
                      elementwise_dtype=None, single_buffer_weights=True):
    B, L, d_img = img_feat.shape
    _, d_q = ques_feat.shape
    A = att_size

    gen, vmem_cap = _tpu_generation_and_vmem()

    # bf16 elementwise only when the MXU path is bf16 AND the chip has a bf16
    # VPU/EUP (v6e / v7x).  v5e (and unknown chips) keep f32 elementwise.
    if elementwise_dtype is None:
        if compute_dtype == jnp.bfloat16 and gen is not None and gen >= 6:
            elementwise_dtype = jnp.bfloat16
        else:
            elementwise_dtype = jnp.float32

    c_item = jnp.dtype(compute_dtype).itemsize
    h_item = jnp.dtype(elementwise_dtype).itemsize

    # Scoped VMEM limit: 3/4 of physical (96 MiB on v5e/v6e, 48 MiB on v7x);
    # tile-picker budget leaves extra headroom for compiler scratch.
    vmem_limit = int(vmem_cap * 0.75)
    vmem_budget = int(vmem_limit * 0.8)

    if block_b is None:
        block_b = _pick_block_b(B, L, d_img, d_q, A, num_stacks,
                                c_item, h_item, vmem_budget)
    assert B % block_b == 0, f"batch {B} must be divisible by block_b {block_b}"

    # MXU operands in compute_dtype (bf16 halves DMA + resident weight bytes);
    # biases, fc13 row vector and all accumulation stay f32.
    img_flat = img_feat.reshape(B * L, d_img).astype(compute_dtype)   # dense 2-D slab
    ques_c = ques_feat.astype(compute_dtype)
    # v_mask hoisted out of the kernel (cheap XLA op): region masked iff its raw
    # feature row is exactly zero (== projected row zero, since fc12 has no bias).
    region_mask = (jnp.sum(jnp.abs(img_feat), axis=-1) == 0.0).astype(jnp.float32)

    cast_params = []
    for s in range(num_stacks):
        WqT, bq, WiT, wh, bh = params[5 * s: 5 * s + 5]
        cast_params += [
            WqT.astype(compute_dtype),
            bq.astype(jnp.float32),
            WiT.astype(compute_dtype),
            wh.astype(jnp.float32),
            bh.astype(jnp.float32),
        ]

    # Scheduler hint.
    d_ins = [d_q] + [A] * (num_stacks - 1)
    matmul_flops = sum(2 * B * L * d_img * A + 2 * B * d_in * A for d_in in d_ins)
    elem_flops = num_stacks * (5 * B * L * A + 6 * B * L + 2 * B * A)
    cost = pl.CostEstimate(
        flops=int(matmul_flops + elem_flops),
        transcendentals=int(num_stacks * (B * L * A + B * L)),
        bytes_accessed=int(img_flat.size * c_item + ques_c.size * c_item
                           + region_mask.size * 4 + B * A * 4
                           + sum(int(p.size) * p.dtype.itemsize for p in cast_params)),
    )

    kernel = functools.partial(_stacked_attention_kernel,
                               num_stacks=num_stacks, block_b=block_b,
                               num_regions=L, h_dtype=elementwise_dtype)

    def _build_call(single_buf):
        in_specs = [
            pl.BlockSpec((block_b * L, d_img), lambda b: (b, 0)),   # flat image tile
            pl.BlockSpec((block_b, d_q), lambda b: (b, 0)),         # question tile
            pl.BlockSpec((block_b, L), lambda b: (b, 0)),           # precomputed v_mask
        ]
        for p in cast_params:
            if p.ndim == 1:
                # (1,) scalar biases -> SMEM (no padded VMEM tile / extra DMA).
                in_specs.append(pl.BlockSpec(memory_space=pltpu.MemorySpace.SMEM))
            else:
                kw = {}
                if single_buf:
                    # Invariant blocks: single-buffer to save weight VMEM (v7x).
                    kw["pipeline_mode"] = pl.Buffered(1)
                in_specs.append(
                    pl.BlockSpec(p.shape, lambda b, nd=p.ndim: (0,) * nd, **kw))
        out_spec = pl.BlockSpec((block_b, A), lambda b: (b, 0))

        return pl.pallas_call(
            kernel,
            out_shape=jax.ShapeDtypeStruct((B, A), jnp.float32),
            grid_spec=pltpu.PrefetchScalarGridSpec(
                num_scalar_prefetch=0,
                grid=(B // block_b,),
                in_specs=in_specs,
                out_specs=out_spec,
            ),
            compiler_params=pltpu.CompilerParams(
                dimension_semantics=("parallel",),
                vmem_limit_bytes=vmem_limit,
            ),
            cost_estimate=cost,
        )

    def _run(single_buf):
        out = _build_call(single_buf)(img_flat, ques_c, region_mask, *cast_params)
        return jax.block_until_ready(out)

    if single_buffer_weights:
        try:
            return _run(True)
        except Exception:
            # TODO(synk): this jax build rejected pl.Buffered(1) single-buffering
            # of invariant weight blocks; falling back to default double buffering.
            return _run(False)
    return _run(False)


# ---------------------------------------------------------------------------
# Deterministic parameter init.
# Layout per stack: [WqT (d_in, A), bq (1, A), WiT (d_img, A), wh (1, A), bh (1,)]
# (weights stored transposed vs torch, i.e. (in, out); wh is the fc13 weight row)
# ---------------------------------------------------------------------------
def init_params(key, num_stacks, img_feat_size, ques_feat_size, att_size):
    keys = jax.random.split(key, 5 * num_stacks)
    params = []
    for s in range(num_stacks):
        d_in = ques_feat_size if s == 0 else att_size
        k = keys[5 * s: 5 * s + 5]
        params += [
            0.1 * jax.random.normal(k[0], (d_in, att_size), jnp.float32),           # fcX1 W^T
            0.1 * jax.random.normal(k[1], (1, att_size), jnp.float32),              # fcX1 b
            0.1 * jax.random.normal(k[2], (img_feat_size, att_size), jnp.float32),  # fcX2 W^T (no bias)
            0.1 * jax.random.normal(k[3], (1, att_size), jnp.float32),              # fcX3 W  (1, A)
            0.1 * jax.random.normal(k[4], (1,), jnp.float32),                       # fcX3 b
        ]
    return params


# ---------------------------------------------------------------------------
# Pure-JAX reference (mirrors the PyTorch forward, dropout = identity)
# ---------------------------------------------------------------------------
def reference(img_feat, ques_feat, params, num_stacks):
    u = ques_feat
    for s in range(num_stacks):
        WqT, bq, WiT, wh, bh = params[5 * s: 5 * s + 5]
        ques_emb = u @ WqT + bq                                   # (B, A)
        img_emb = img_feat @ WiT                                  # (B, L, A)
        h = jnp.tanh(ques_emb[:, None, :] + img_emb)              # (B, L, A)
        h_emb = h @ wh.T + bh                                     # (B, L, 1)
        mask = jnp.sum(jnp.abs(img_emb), axis=2, keepdims=True) == 0
        h_emb = jnp.where(mask, -jnp.inf, h_emb)
        p = jax.nn.softmax(h_emb, axis=1)
        weight_sum = jnp.sum(img_emb * p, axis=1)                 # (B, A)
        u = ques_emb + weight_sum
    return u


if __name__ == "__main__":
    B, L = 16, 16                    # batch, number of image regions
    img_feat_size = 64
    ques_feat_size = 64
    att_size = 128                   # lane-dense output stores
    num_stacks = 2

    key = jax.random.PRNGKey(0)
    k_img, k_q, k_p = jax.random.split(key, 3)
    img_feat = jax.random.normal(k_img, (B, L, img_feat_size), jnp.float32)
    # Zero a few regions so the v_mask path is exercised.
    img_feat = img_feat.at[0, L - 2:].set(0.0)
    img_feat = img_feat.at[3, :1].set(0.0)
    ques_feat = jax.random.normal(k_q, (B, ques_feat_size), jnp.float32)
    params = init_params(k_p, num_stacks, img_feat_size, ques_feat_size, att_size)

    ref = reference(img_feat, ques_feat, params, num_stacks)

    # f32 compute path: tight check against the reference.
    out_f32 = stacked_attention(img_feat, ques_feat, params,
                                num_stacks=num_stacks, att_size=att_size,
                                compute_dtype=jnp.float32)
    jax.block_until_ready(out_f32)
    assert out_f32.shape == (B, att_size)
    assert jnp.allclose(out_f32, ref, atol=1e-3, rtol=1e-3), "f32 mismatch vs reference"

    # bf16 compute path (MXU operands in bf16; bf16 elementwise on v6e/v7x,
    # f32 accumulation/softmax everywhere): loose check.
    out_bf16 = stacked_attention(img_feat, ques_feat, params,
                                 num_stacks=num_stacks, att_size=att_size,
                                 compute_dtype=jnp.bfloat16)
    jax.block_until_ready(out_bf16)
    assert jnp.allclose(out_bf16, ref, atol=1.5e-1, rtol=1.5e-1), "bf16 mismatch vs reference"

    print("KERNEL_OK")
</pallas_src>

<mosaic_0001>
module attributes {stable_mosaic.version = 11 : i64} {
  func.func @_stacked_attention_kernel(%arg0: i32, %arg1: memref<128x64xf32, #tpu.memory_space<vmem>>, %arg2: memref<8x64xf32, #tpu.memory_space<vmem>>, %arg3: memref<8x16xf32, #tpu.memory_space<vmem>>, %arg4: memref<64x128xf32, #tpu.memory_space<vmem>>, %arg5: memref<1x128xf32, #tpu.memory_space<vmem>>, %arg6: memref<64x128xf32, #tpu.memory_space<vmem>>, %arg7: memref<1x128xf32, #tpu.memory_space<vmem>>, %arg8: memref<1xf32, #tpu.memory_space<smem>>, %arg9: memref<128x128xf32, #tpu.memory_space<vmem>>, %arg10: memref<1x128xf32, #tpu.memory_space<vmem>>, %arg11: memref<64x128xf32, #tpu.memory_space<vmem>>, %arg12: memref<1x128xf32, #tpu.memory_space<vmem>>, %arg13: memref<1xf32, #tpu.memory_space<smem>>, %arg14: memref<8x128xf32, #tpu.memory_space<vmem>>) attributes {dimension_semantics = [#tpu.dimension_semantics<parallel>], iteration_bounds = array<i64: 2>, scalar_prefetch = 0 : i64, scratch_operands = 0 : i64, tpu.core_type = #tpu.core_type<tc>, window_params = [{transform_indices = @transform_0, window_bounds = array<i64: 128, 64>}, {transform_indices = @transform_1, window_bounds = array<i64: 8, 64>}, {transform_indices = @transform_2, window_bounds = array<i64: 8, 16>}, {pipeline_mode = #tpu.pipeline_mode<synchronous>, transform_indices = @transform_3, window_bounds = array<i64: 64, 128>}, {pipeline_mode = #tpu.pipeline_mode<synchronous>, transform_indices = @transform_4, window_bounds = array<i64: 1, 128>}, {pipeline_mode = #tpu.pipeline_mode<synchronous>, transform_indices = @transform_5, window_bounds = array<i64: 64, 128>}, {pipeline_mode = #tpu.pipeline_mode<synchronous>, transform_indices = @transform_6, window_bounds = array<i64: 1, 128>}, {transform_indices = @transform_7, window_bounds = array<i64: 1>}, {pipeline_mode = #tpu.pipeline_mode<synchronous>, transform_indices = @transform_8, window_bounds = array<i64: 128, 128>}, {pipeline_mode = #tpu.pipeline_mode<synchronous>, transform_indices = @transform_9, window_bounds = array<i64: 1, 128>}, {pipeline_mode = #tpu.pipeline_mode<synchronous>, transform_indices = @transform_10, window_bounds = array<i64: 64, 128>}, {pipeline_mode = #tpu.pipeline_mode<synchronous>, transform_indices = @transform_11, window_bounds = array<i64: 1, 128>}, {transform_indices = @transform_12, window_bounds = array<i64: 1>}, {transform_indices = @transform_13, window_bounds = array<i64: 8, 128>}]} {
    %c0 = arith.constant 0 : index
    %c0_0 = arith.constant 0 : index
    %0 = vector.load %arg1[%c0, %c0_0] : memref<128x64xf32, #tpu.memory_space<vmem>>, vector<128x64xf32>
    %c0_1 = arith.constant 0 : index
    %c0_2 = arith.constant 0 : index
    %1 = vector.load %arg3[%c0_1, %c0_2] : memref<8x16xf32, #tpu.memory_space<vmem>>, vector<8x16xf32>
    %cst = arith.constant 5.000000e-01 : f32
    %2 = vector.broadcast %cst : f32 to vector<8x16xf32>
    %3 = arith.cmpf ogt, %1, %2 : vector<8x16xf32>
    %c0_3 = arith.constant 0 : index
    %c0_4 = arith.constant 0 : index
    %4 = vector.load %arg2[%c0_3, %c0_4] : memref<8x64xf32, #tpu.memory_space<vmem>>, vector<8x64xf32>
    %c0_5 = arith.constant 0 : index
    %c0_6 = arith.constant 0 : index
    %5 = vector.load %arg4[%c0_5, %c0_6] : memref<64x128xf32, #tpu.memory_space<vmem>>, vector<64x128xf32>
    %cst_7 = arith.constant dense<0.000000e+00> : vector<8x128xf32>
    %6 = tpu.matmul %4, %5, %cst_7 {dimension_numbers = #tpu.dot_dimension_numbers<[1], [0], [0], [1], [0, 0, 1, 1], [], []>} : vector<8x64xf32>, vector<64x128xf32>, vector<8x128xf32> -> vector<8x128xf32>
    %c0_8 = arith.constant 0 : index
    %c0_9 = arith.constant 0 : index
    %7 = vector.load %arg5[%c0_8, %c0_9] : memref<1x128xf32, #tpu.memory_space<vmem>>, vector<1x128xf32>
    %8 = vector.broadcast %7 : vector<1x128xf32> to vector<8x128xf32>
    %9 = arith.addf %6, %8 : vector<8x128xf32>
    %c0_10 = arith.constant 0 : index
    %c0_11 = arith.constant 0 : index
    %10 = vector.load %arg6[%c0_10, %c0_11] : memref<64x128xf32, #tpu.memory_space<vmem>>, vector<64x128xf32>
    %cst_12 = arith.constant dense<0.000000e+00> : vector<128x128xf32>
    %11 = tpu.matmul %0, %10, %cst_12 {dimension_numbers = #tpu.dot_dimension_numbers<[1], [0], [0], [1], [0, 0, 1, 1], [], []>} : vector<128x64xf32>, vector<64x128xf32>, vector<128x128xf32> -> vector<128x128xf32>
    %12 = vector.shape_cast %11 : vector<128x128xf32> to vector<8x16x128xf32>
    %13 = vector.shape_cast %9 : vector<8x128xf32> to vector<8x1x128xf32>
    %14 = vector.broadcast %13 : vector<8x1x128xf32> to vector<8x16x128xf32>
    %15 = arith.addf %14, %12 : vector<8x16x128xf32>
    %16 = math.tanh %15 : vector<8x16x128xf32>
    %c0_13 = arith.constant 0 : index
    %c0_14 = arith.constant 0 : index
    %17 = vector.load %arg7[%c0_13, %c0_14] : memref<1x128xf32, #tpu.memory_space<vmem>>, vector<1x128xf32>
    %18 = vector.shape_cast %17 : vector<1x128xf32> to vector<1x1x128xf32>
    %19 = vector.broadcast %18 : vector<1x1x128xf32> to vector<8x16x128xf32>
    %20 = arith.mulf %16, %19 : vector<8x16x128xf32>
    %cst_15 = arith.constant dense<0.000000e+00> : vector<8x16xf32>
    %21 = vector.multi_reduction <add>, %20, %cst_15 [2] : vector<8x16x128xf32> to vector<8x16xf32>
    %c0_16 = arith.constant 0 : index
    %22 = memref.load %arg8[%c0_16] : memref<1xf32, #tpu.memory_space<smem>>
    %23 = vector.broadcast %22 : f32 to vector<8x16xf32>
    %24 = arith.addf %21, %23 : vector<8x16xf32>
    %cst_17 = arith.constant 0xFF800000 : f32
    %25 = vector.broadcast %cst_17 : f32 to vector<8x16xf32>
    %26 = arith.select %3, %25, %24 : vector<8x16xi1>, vector<8x16xf32>
    %cst_18 = arith.constant dense<0xFF800000> : vector<8xf32>
    %27 = vector.multi_reduction <maximumf>, %26, %cst_18 [1] : vector<8x16xf32> to vector<8xf32>
    %28 = vector.shape_cast %27 : vector<8xf32> to vector<8x1xf32>
    %29 = vector.broadcast %28 : vector<8x1xf32> to vector<8x16xf32>
    %30 = arith.subf %26, %29 : vector<8x16xf32>
    %31 = math.exp %30 : vector<8x16xf32>
    %cst_19 = arith.constant dense<0.000000e+00> : vector<8xf32>
    %32 = vector.multi_reduction <add>, %31, %cst_19 [1] : vector<8x16xf32> to vector<8xf32>
    %33 = vector.shape_cast %32 : vector<8xf32> to vector<8x1xf32>
    %34 = vector.broadcast %33 : vector<8x1xf32> to vector<8x16xf32>
    %35 = arith.divf %31, %34 : vector<8x16xf32>
    %36 = vector.shape_cast %35 : vector<8x16xf32> to vector<8x16x1xf32>
    %37 = vector.broadcast %36 : vector<8x16x1xf32> to vector<8x16x128xf32>
    %38 = arith.mulf %12, %37 : vector<8x16x128xf32>
    %cst_20 = arith.constant dense<0.000000e+00> : vector<8x128xf32>
    %39 = vector.multi_reduction <add>, %38, %cst_20 [1] : vector<8x16x128xf32> to vector<8x128xf32>
    %40 = arith.addf %9, %39 : vector<8x128xf32>
    %c0_21 = arith.constant 0 : index
    %c0_22 = arith.constant 0 : index
    %41 = vector.load %arg9[%c0_21, %c0_22] : memref<128x128xf32, #tpu.memory_space<vmem>>, vector<128x128xf32>
    %cst_23 = arith.constant dense<0.000000e+00> : vector<8x128xf32>
    %42 = tpu.matmul %40, %41, %cst_23 {dimension_numbers = #tpu.dot_dimension_numbers<[1], [0], [0], [1], [0, 0, 1, 1], [], []>} : vector<8x128xf32>, vector<128x128xf32>, vector<8x128xf32> -> vector<8x128xf32>
    %c0_24 = arith.constant 0 : index
    %c0_25 = arith.constant 0 : index
    %43 = vector.load %arg10[%c0_24, %c0_25] : memref<1x128xf32, #tpu.memory_space<vmem>>, vector<1x128xf32>
    %44 = vector.broadcast %43 : vector<1x128xf32> to vector<8x128xf32>
    %45 = arith.addf %42, %44 : vector<8x128xf32>
    %c0_26 = arith.constant 0 : index
    %c0_27 = arith.constant 0 : index
    %46 = vector.load %arg11[%c0_26, %c0_27] : memref<64x128xf32, #tpu.memory_space<vmem>>, vector<64x128xf32>
    %cst_28 = arith.constant dense<0.000000e+00> : vector<128x128xf32>
    %47 = tpu.matmul %0, %46, %cst_28 {dimension_numbers = #tpu.dot_dimension_numbers<[1], [0], [0], [1], [0, 0, 1, 1], [], []>} : vector<128x64xf32>, vector<64x128xf32>, vector<128x128xf32> -> vector<128x128xf32>
    %48 = vector.shape_cast %47 : vector<128x128xf32> to vector<8x16x128xf32>
    %49 = vector.shape_cast %45 : vector<8x128xf32> to vector<8x1x128xf32>
    %50 = vector.broadcast %49 : vector<8x1x128xf32> to vector<8x16x128xf32>
    %51 = arith.addf %50, %48 : vector<8x16x128xf32>
    %52 = math.tanh %51 : vector<8x16x128xf32>
    %c0_29 = arith.constant 0 : index
    %c0_30 = arith.constant 0 : index
    %53 = vector.load %arg12[%c0_29, %c0_30] : memref<1x128xf32, #tpu.memory_space<vmem>>, vector<1x128xf32>
    %54 = vector.shape_cast %53 : vector<1x128xf32> to vector<1x1x128xf32>
    %55 = vector.broadcast %54 : vector<1x1x128xf32> to vector<8x16x128xf32>
    %56 = arith.mulf %52, %55 : vector<8x16x128xf32>
    %cst_31 = arith.constant dense<0.000000e+00> : vector<8x16xf32>
    %57 = vector.multi_reduction <add>, %56, %cst_31 [2] : vector<8x16x128xf32> to vector<8x16xf32>
    %c0_32 = arith.constant 0 : index
    %58 = memref.load %arg13[%c0_32] : memref<1xf32, #tpu.memory_space<smem>>
    %59 = vector.broadcast %58 : f32 to vector<8x16xf32>
    %60 = arith.addf %57, %59 : vector<8x16xf32>
    %cst_33 = arith.constant 0xFF800000 : f32
    %61 = vector.broadcast %cst_33 : f32 to vector<8x16xf32>
    %62 = arith.select %3, %61, %60 : vector<8x16xi1>, vector<8x16xf32>
    %cst_34 = arith.constant dense<0xFF800000> : vector<8xf32>
    %63 = vector.multi_reduction <maximumf>, %62, %cst_34 [1] : vector<8x16xf32> to vector<8xf32>
    %64 = vector.shape_cast %63 : vector<8xf32> to vector<8x1xf32>
    %65 = vector.broadcast %64 : vector<8x1xf32> to vector<8x16xf32>
    %66 = arith.subf %62, %65 : vector<8x16xf32>
    %67 = math.exp %66 : vector<8x16xf32>
    %cst_35 = arith.constant dense<0.000000e+00> : vector<8xf32>
    %68 = vector.multi_reduction <add>, %67, %cst_35 [1] : vector<8x16xf32> to vector<8xf32>
    %69 = vector.shape_cast %68 : vector<8xf32> to vector<8x1xf32>
    %70 = vector.broadcast %69 : vector<8x1xf32> to vector<8x16xf32>
    %71 = arith.divf %67, %70 : vector<8x16xf32>
    %72 = vector.shape_cast %71 : vector<8x16xf32> to vector<8x16x1xf32>
    %73 = vector.broadcast %72 : vector<8x16x1xf32> to vector<8x16x128xf32>
    %74 = arith.mulf %48, %73 : vector<8x16x128xf32>
    %cst_36 = arith.constant dense<0.000000e+00> : vector<8x128xf32>
    %75 = vector.multi_reduction <add>, %74, %cst_36 [1] : vector<8x16x128xf32> to vector<8x128xf32>
    %76 = arith.addf %45, %75 : vector<8x128xf32>
    %c0_37 = arith.constant 0 : index
    %c0_38 = arith.constant 0 : index
    %77 = vector.load %arg14[%c0_37, %c0_38] : memref<8x128xf32, #tpu.memory_space<vmem>>, vector<8x128xf32>
    tpu.vector_store %arg14[%c0_37, %c0_38], %76 {strides = array<i32>} : memref<8x128xf32, #tpu.memory_space<vmem>>, vector<8x128xf32>,
    return
  }
  func.func @transform_0(%arg0: i32) -> (i32, i32) {
    %c0_i32 = arith.constant 0 : i32
    %c0_i32_0 = arith.constant 0 : i32
    return %arg0, %c0_i32 : i32, i32
  }
  func.func @transform_1(%arg0: i32) -> (i32, i32) {
    %c0_i32 = arith.constant 0 : i32
    %c0_i32_0 = arith.constant 0 : i32
    return %arg0, %c0_i32 : i32, i32
  }
  func.func @transform_2(%arg0: i32) -> (i32, i32) {
    %c0_i32 = arith.constant 0 : i32
    %c0_i32_0 = arith.constant 0 : i32
    return %arg0, %c0_i32 : i32, i32
  }
  func.func @transform_3(%arg0: i32) -> (i32, i32) {
    %c0_i32 = arith.constant 0 : i32
    %c0_i32_0 = arith.constant 0 : i32
    %c0_i32_1 = arith.constant 0 : i32
    return %c0_i32, %c0_i32_0 : i32, i32
  }
  func.func @transform_4(%arg0: i32) -> (i32, i32) {
    %c0_i32 = arith.constant 0 : i32
    %c0_i32_0 = arith.constant 0 : i32
    %c0_i32_1 = arith.constant 0 : i32
    return %c0_i32, %c0_i32_0 : i32, i32
  }
  func.func @transform_5(%arg0: i32) -> (i32, i32) {
    %c0_i32 = arith.constant 0 : i32
    %c0_i32_0 = arith.constant 0 : i32
    %c0_i32_1 = arith.constant 0 : i32
    return %c0_i32, %c0_i32_0 : i32, i32
  }
  func.func @transform_6(%arg0: i32) -> (i32, i32) {
    %c0_i32 = arith.constant 0 : i32
    %c0_i32_0 = arith.constant 0 : i32
    %c0_i32_1 = arith.constant 0 : i32
    return %c0_i32, %c0_i32_0 : i32, i32
  }
  func.func @transform_7(%arg0: i32) -> i32 {
    %c0_i32 = arith.constant 0 : i32
    %c0_i32_0 = arith.constant 0 : i32
    return %c0_i32 : i32
  }
  func.func @transform_8(%arg0: i32) -> (i32, i32) {
    %c0_i32 = arith.constant 0 : i32
    %c0_i32_0 = arith.constant 0 : i32
    %c0_i32_1 = arith.constant 0 : i32
    return %c0_i32, %c0_i32_0 : i32, i32
  }
  func.func @transform_9(%arg0: i32) -> (i32, i32) {
    %c0_i32 = arith.constant 0 : i32
    %c0_i32_0 = arith.constant 0 : i32
    %c0_i32_1 = arith.constant 0 : i32
    return %c0_i32, %c0_i32_0 : i32, i32
  }
  func.func @transform_10(%arg0: i32) -> (i32, i32) {
    %c0_i32 = arith.constant 0 : i32
    %c0_i32_0 = arith.constant 0 : i32
    %c0_i32_1 = arith.constant 0 : i32
    return %c0_i32, %c0_i32_0 : i32, i32
  }
  func.func @transform_11(%arg0: i32) -> (i32, i32) {
    %c0_i32 = arith.constant 0 : i32
    %c0_i32_0 = arith.constant 0 : i32
    %c0_i32_1 = arith.constant 0 : i32
    return %c0_i32, %c0_i32_0 : i32, i32
  }
  func.func @transform_12(%arg0: i32) -> i32 {
    %c0_i32 = arith.constant 0 : i32
    %c0_i32_0 = arith.constant 0 : i32
    return %c0_i32 : i32
  }
  func.func @transform_13(%arg0: i32) -> (i32, i32) {
    %c0_i32 = arith.constant 0 : i32
    %c0_i32_0 = arith.constant 0 : i32
    return %arg0, %c0_i32 : i32, i32
  }
}

module attributes {stable_mosaic.version = 11 : i64} {
  func.func @_stacked_attention_kernel(%arg0: i32, %arg1: memref<128x64xf32, #tpu.memory_space<vmem>>, %arg2: memref<8x64xf32, #tpu.memory_space<vmem>>, %arg3: memref<8x16xf32, #tpu.memory_space<vmem>>, %arg4: memref<64x128xf32, #tpu.memory_space<vmem>>, %arg5: memref<1x128xf32, #tpu.memory_space<vmem>>, %arg6: memref<64x128xf32, #tpu.memory_space<vmem>>, %arg7: memref<1x128xf32, #tpu.memory_space<vmem>>, %arg8: memref<1xf32, #tpu.memory_space<smem>>, %arg9: memref<128x128xf32, #tpu.memory_space<vmem>>, %arg10: memref<1x128xf32, #tpu.memory_space<vmem>>, %arg11: memref<64x128xf32, #tpu.memory_space<vmem>>, %arg12: memref<1x128xf32, #tpu.memory_space<vmem>>, %arg13: memref<1xf32, #tpu.memory_space<smem>>, %arg14: memref<8x128xf32, #tpu.memory_space<vmem>>) attributes {dimension_semantics = [#tpu.dimension_semantics<parallel>], iteration_bounds = array<i64: 2>, scalar_prefetch = 0 : i64, scratch_operands = 0 : i64, tpu.core_type = #tpu.core_type<tc>, window_params = [{transform_indices = @transform_0, window_bounds = array<i64: 128, 64>}, {transform_indices = @transform_1, window_bounds = array<i64: 8, 64>}, {transform_indices = @transform_2, window_bounds = array<i64: 8, 16>}, {pipeline_mode = #tpu.pipeline_mode<synchronous>, transform_indices = @transform_3, window_bounds = array<i64: 64, 128>}, {pipeline_mode = #tpu.pipeline_mode<synchronous>, transform_indices = @transform_4, window_bounds = array<i64: 1, 128>}, {pipeline_mode = #tpu.pipeline_mode<synchronous>, transform_indices = @transform_5, window_bounds = array<i64: 64, 128>}, {pipeline_mode = #tpu.pipeline_mode<synchronous>, transform_indices = @transform_6, window_bounds = array<i64: 1, 128>}, {transform_indices = @transform_7, window_bounds = array<i64: 1>}, {pipeline_mode = #tpu.pipeline_mode<synchronous>, transform_indices = @transform_8, window_bounds = array<i64: 128, 128>}, {pipeline_mode = #tpu.pipeline_mode<synchronous>, transform_indices = @transform_9, window_bounds = array<i64: 1, 128>}, {pipeline_mode = #tpu.pipeline_mode<synchronous>, transform_indices = @transform_10, window_bounds = array<i64: 64, 128>}, {pipeline_mode = #tpu.pipeline_mode<synchronous>, transform_indices = @transform_11, window_bounds = array<i64: 1, 128>}, {transform_indices = @transform_12, window_bounds = array<i64: 1>}, {transform_indices = @transform_13, window_bounds = array<i64: 8, 128>}]} {
    %c0 = arith.constant 0 : index
    %c0_0 = arith.constant 0 : index
    %0 = vector.load %arg1[%c0, %c0_0] : memref<128x64xf32, #tpu.memory_space<vmem>>, vector<128x64xf32>
    %c0_1 = arith.constant 0 : index
    %c0_2 = arith.constant 0 : index
    %1 = vector.load %arg3[%c0_1, %c0_2] : memref<8x16xf32, #tpu.memory_space<vmem>>, vector<8x16xf32>
    %cst = arith.constant 5.000000e-01 : f32
    %2 = vector.broadcast %cst : f32 to vector<8x16xf32>
    %3 = arith.cmpf ogt, %1, %2 : vector<8x16xf32>
    %c0_3 = arith.constant 0 : index
    %c0_4 = arith.constant 0 : index
    %4 = vector.load %arg2[%c0_3, %c0_4] : memref<8x64xf32, #tpu.memory_space<vmem>>, vector<8x64xf32>
    %c0_5 = arith.constant 0 : index
    %c0_6 = arith.constant 0 : index
    %5 = vector.load %arg4[%c0_5, %c0_6] : memref<64x128xf32, #tpu.memory_space<vmem>>, vector<64x128xf32>
    %cst_7 = arith.constant dense<0.000000e+00> : vector<8x128xf32>
    %6 = tpu.matmul %4, %5, %cst_7 {dimension_numbers = #tpu.dot_dimension_numbers<[1], [0], [0], [1], [0, 0, 1, 1], [], []>} : vector<8x64xf32>, vector<64x128xf32>, vector<8x128xf32> -> vector<8x128xf32>
    %c0_8 = arith.constant 0 : index
    %c0_9 = arith.constant 0 : index
    %7 = vector.load %arg5[%c0_8, %c0_9] : memref<1x128xf32, #tpu.memory_space<vmem>>, vector<1x128xf32>
    %8 = vector.broadcast %7 : vector<1x128xf32> to vector<8x128xf32>
    %9 = arith.addf %6, %8 : vector<8x128xf32>
    %c0_10 = arith.constant 0 : index
    %c0_11 = arith.constant 0 : index
    %10 = vector.load %arg6[%c0_10, %c0_11] : memref<64x128xf32, #tpu.memory_space<vmem>>, vector<64x128xf32>
    %cst_12 = arith.constant dense<0.000000e+00> : vector<128x128xf32>
    %11 = tpu.matmul %0, %10, %cst_12 {dimension_numbers = #tpu.dot_dimension_numbers<[1], [0], [0], [1], [0, 0, 1, 1], [], []>} : vector<128x64xf32>, vector<64x128xf32>, vector<128x128xf32> -> vector<128x128xf32>
    %12 = vector.shape_cast %11 : vector<128x128xf32> to vector<8x16x128xf32>
    %13 = vector.shape_cast %9 : vector<8x128xf32> to vector<8x1x128xf32>
    %14 = vector.broadcast %13 : vector<8x1x128xf32> to vector<8x16x128xf32>
    %15 = arith.addf %14, %12 : vector<8x16x128xf32>
    %16 = math.tanh %15 : vector<8x16x128xf32>
    %c0_13 = arith.constant 0 : index
    %c0_14 = arith.constant 0 : index
    %17 = vector.load %arg7[%c0_13, %c0_14] : memref<1x128xf32, #tpu.memory_space<vmem>>, vector<1x128xf32>
    %18 = vector.shape_cast %17 : vector<1x128xf32> to vector<1x1x128xf32>
    %19 = vector.broadcast %18 : vector<1x1x128xf32> to vector<8x16x128xf32>
    %20 = arith.mulf %16, %19 : vector<8x16x128xf32>
    %cst_15 = arith.constant dense<0.000000e+00> : vector<8x16xf32>
    %21 = vector.multi_reduction <add>, %20, %cst_15 [2] : vector<8x16x128xf32> to vector<8x16xf32>
    %c0_16 = arith.constant 0 : index
    %22 = memref.load %arg8[%c0_16] : memref<1xf32, #tpu.memory_space<smem>>
    %23 = vector.broadcast %22 : f32 to vector<8x16xf32>
    %24 = arith.addf %21, %23 : vector<8x16xf32>
    %cst_17 = arith.constant 0xFF800000 : f32
    %25 = vector.broadcast %cst_17 : f32 to vector<8x16xf32>
    %26 = arith.select %3, %25, %24 : vector<8x16xi1>, vector<8x16xf32>
    %cst_18 = arith.constant dense<0xFF800000> : vector<8xf32>
    %27 = vector.multi_reduction <maximumf>, %26, %cst_18 [1] : vector<8x16xf32> to vector<8xf32>
    %28 = vector.shape_cast %27 : vector<8xf32> to vector<8x1xf32>
    %29 = vector.broadcast %28 : vector<8x1xf32> to vector<8x16xf32>
    %30 = arith.subf %26, %29 : vector<8x16xf32>
    %31 = math.exp %30 : vector<8x16xf32>
    %cst_19 = arith.constant dense<0.000000e+00> : vector<8xf32>
    %32 = vector.multi_reduction <add>, %31, %cst_19 [1] : vector<8x16xf32> to vector<8xf32>
    %33 = vector.shape_cast %32 : vector<8xf32> to vector<8x1xf32>
    %34 = vector.broadcast %33 : vector<8x1xf32> to vector<8x16xf32>
    %35 = arith.divf %31, %34 : vector<8x16xf32>
    %36 = vector.shape_cast %35 : vector<8x16xf32> to vector<8x16x1xf32>
    %37 = vector.broadcast %36 : vector<8x16x1xf32> to vector<8x16x128xf32>
    %38 = arith.mulf %12, %37 : vector<8x16x128xf32>
    %cst_20 = arith.constant dense<0.000000e+00> : vector<8x128xf32>
    %39 = vector.multi_reduction <add>, %38, %cst_20 [1] : vector<8x16x128xf32> to vector<8x128xf32>
    %40 = arith.addf %9, %39 : vector<8x128xf32>
    %c0_21 = arith.constant 0 : index
    %c0_22 = arith.constant 0 : index
    %41 = vector.load %arg9[%c0_21, %c0_22] : memref<128x128xf32, #tpu.memory_space<vmem>>, vector<128x128xf32>
    %cst_23 = arith.constant dense<0.000000e+00> : vector<8x128xf32>
    %42 = tpu.matmul %40, %41, %cst_23 {dimension_numbers = #tpu.dot_dimension_numbers<[1], [0], [0], [1], [0, 0, 1, 1], [], []>} : vector<8x128xf32>, vector<128x128xf32>, vector<8x128xf32> -> vector<8x128xf32>
    %c0_24 = arith.constant 0 : index
    %c0_25 = arith.constant 0 : index
    %43 = vector.load %arg10[%c0_24, %c0_25] : memref<1x128xf32, #tpu.memory_space<vmem>>, vector<1x128xf32>
    %44 = vector.broadcast %43 : vector<1x128xf32> to vector<8x128xf32>
    %45 = arith.addf %42, %44 : vector<8x128xf32>
    %c0_26 = arith.constant 0 : index
    %c0_27 = arith.constant 0 : index
    %46 = vector.load %arg11[%c0_26, %c0_27] : memref<64x128xf32, #tpu.memory_space<vmem>>, vector<64x128xf32>
    %cst_28 = arith.constant dense<0.000000e+00> : vector<128x128xf32>
    %47 = tpu.matmul %0, %46, %cst_28 {dimension_numbers = #tpu.dot_dimension_numbers<[1], [0], [0], [1], [0, 0, 1, 1], [], []>} : vector<128x64xf32>, vector<64x128xf32>, vector<128x128xf32> -> vector<128x128xf32>
    %48 = vector.shape_cast %47 : vector<128x128xf32> to vector<8x16x128xf32>
    %49 = vector.shape_cast %45 : vector<8x128xf32> to vector<8x1x128xf32>
    %50 = vector.broadcast %49 : vector<8x1x128xf32> to vector<8x16x128xf32>
    %51 = arith.addf %50, %48 : vector<8x16x128xf32>
    %52 = math.tanh %51 : vector<8x16x128xf32>
    %c0_29 = arith.constant 0 : index
    %c0_30 = arith.constant 0 : index
    %53 = vector.load %arg12[%c0_29, %c0_30] : memref<1x128xf32, #tpu.memory_space<vmem>>, vector<1x128xf32>
    %54 = vector.shape_cast %53 : vector<1x128xf32> to vector<1x1x128xf32>
    %55 = vector.broadcast %54 : vector<1x1x128xf32> to vector<8x16x128xf32>
    %56 = arith.mulf %52, %55 : vector<8x16x128xf32>
    %cst_31 = arith.constant dense<0.000000e+00> : vector<8x16xf32>
    %57 = vector.multi_reduction <add>, %56, %cst_31 [2] : vector<8x16x128xf32> to vector<8x16xf32>
    %c0_32 = arith.constant 0 : index
    %58 = memref.load %arg13[%c0_32] : memref<1xf32, #tpu.memory_space<smem>>
    %59 = vector.broadcast %58 : f32 to vector<8x16xf32>
    %60 = arith.addf %57, %59 : vector<8x16xf32>
    %cst_33 = arith.constant 0xFF800000 : f32
    %61 = vector.broadcast %cst_33 : f32 to vector<8x16xf32>
    %62 = arith.select %3, %61, %60 : vector<8x16xi1>, vector<8x16xf32>
    %cst_34 = arith.constant dense<0xFF800000> : vector<8xf32>
    %63 = vector.multi_reduction <maximumf>, %62, %cst_34 [1] : vector<8x16xf32> to vector<8xf32>
    %64 = vector.shape_cast %63 : vector<8xf32> to vector<8x1xf32>
    %65 = vector.broadcast %64 : vector<8x1xf32> to vector<8x16xf32>
    %66 = arith.subf %62, %65 : vector<8x16xf32>
    %67 = math.exp %66 : vector<8x16xf32>
    %cst_35 = arith.constant dense<0.000000e+00> : vector<8xf32>
    %68 = vector.multi_reduction <add>, %67, %cst_35 [1] : vector<8x16xf32> to vector<8xf32>
    %69 = vector.shape_cast %68 : vector<8xf32> to vector<8x1xf32>
    %70 = vector.broadcast %69 : vector<8x1xf32> to vector<8x16xf32>
    %71 = arith.divf %67, %70 : vector<8x16xf32>
    %72 = vector.shape_cast %71 : vector<8x16xf32> to vector<8x16x1xf32>
    %73 = vector.broadcast %72 : vector<8x16x1xf32> to vector<8x16x128xf32>
    %74 = arith.mulf %48, %73 : vector<8x16x128xf32>
    %cst_36 = arith.constant dense<0.000000e+00> : vector<8x128xf32>
    %75 = vector.multi_reduction <add>, %74, %cst_36 [1] : vector<8x16x128xf32> to vector<8x128xf32>
    %76 = arith.addf %45, %75 : vector<8x128xf32>
    %c0_37 = arith.constant 0 : index
    %c0_38 = arith.constant 0 : index
    %77 = vector.load %arg14[%c0_37, %c0_38] : memref<8x128xf32, #tpu.memory_space<vmem>>, vector<8x128xf32>
    tpu.vector_store %arg14[%c0_37, %c0_38], %76 {strides = array<i32>} : memref<8x128xf32, #tpu.memory_space<vmem>>, vector<8x128xf32>,
    return
  }
  func.func @transform_0(%arg0: i32) -> (i32, i32) {
    %c0_i32 = arith.constant 0 : i32
    %c0_i32_0 = arith.constant 0 : i32
    return %arg0, %c0_i32 : i32, i32
  }
  func.func @transform_1(%arg0: i32) -> (i32, i32) {
    %c0_i32 = arith.constant 0 : i32
    %c0_i32_0 = arith.constant 0 : i32
    return %arg0, %c0_i32 : i32, i32
  }
  func.func @transform_2(%arg0: i32) -> (i32, i32) {
    %c0_i32 = arith.constant 0 : i32
    %c0_i32_0 = arith.constant 0 : i32
    return %arg0, %c0_i32 : i32, i32
  }
  func.func @transform_3(%arg0: i32) -> (i32, i32) {
    %c0_i32 = arith.constant 0 : i32
    %c0_i32_0 = arith.constant 0 : i32
    %c0_i32_1 = arith.constant 0 : i32
    return %c0_i32, %c0_i32_0 : i32, i32
  }
  func.func @transform_4(%arg0: i32) -> (i32, i32) {
    %c0_i32 = arith.constant 0 : i32
    %c0_i32_0 = arith.constant 0 : i32
    %c0_i32_1 = arith.constant 0 : i32
    return %c0_i32, %c0_i32_0 : i32, i32
  }
  func.func @transform_5(%arg0: i32) -> (i32, i32) {
    %c0_i32 = arith.constant 0 : i32
    %c0_i32_0 = arith.constant 0 : i32
    %c0_i32_1 = arith.constant 0 : i32
    return %c0_i32, %c0_i32_0 : i32, i32
  }
  func.func @transform_6(%arg0: i32) -> (i32, i32) {
    %c0_i32 = arith.constant 0 : i32
    %c0_i32_0 = arith.constant 0 : i32
    %c0_i32_1 = arith.constant 0 : i32
    return %c0_i32, %c0_i32_0 : i32, i32
  }
  func.func @transform_7(%arg0: i32) -> i32 {
    %c0_i32 = arith.constant 0 : i32
    %c0_i32_0 = arith.constant 0 : i32
    return %c0_i32 : i32
  }
  func.func @transform_8(%arg0: i32) -> (i32, i32) {
    %c0_i32 = arith.constant 0 : i32
    %c0_i32_0 = arith.constant 0 : i32
    %c0_i32_1 = arith.constant 0 : i32
    return %c0_i32, %c0_i32_0 : i32, i32
  }
  func.func @transform_9(%arg0: i32) -> (i32, i32) {
    %c0_i32 = arith.constant 0 : i32
    %c0_i32_0 = arith.constant 0 : i32
    %c0_i32_1 = arith.constant 0 : i32
    return %c0_i32, %c0_i32_0 : i32, i32
  }
  func.func @transform_10(%arg0: i32) -> (i32, i32) {
    %c0_i32 = arith.constant 0 : i32
    %c0_i32_0 = arith.constant 0 : i32
    %c0_i32_1 = arith.constant 0 : i32
    return %c0_i32, %c0_i32_0 : i32, i32
  }
  func.func @transform_11(%arg0: i32) -> (i32, i32) {
    %c0_i32 = arith.constant 0 : i32
    %c0_i32_0 = arith.constant 0 : i32
    %c0_i32_1 = arith.constant 0 : i32
    return %c0_i32, %c0_i32_0 : i32, i32
  }
  func.func @transform_12(%arg0: i32) -> i32 {
    %c0_i32 = arith.constant 0 : i32
    %c0_i32_0 = arith.constant 0 : i32
    return %c0_i32 : i32
  }
  func.func @transform_13(%arg0: i32) -> (i32, i32) {
    %c0_i32 = arith.constant 0 : i32
    %c0_i32_0 = arith.constant 0 : i32
    return %arg0, %c0_i32 : i32, i32
  }
}

</mosaic_0001>

<bundles_post_ra>
// kernel: tpu_custom_call.1
= control target key start
LH: loop header
LB: loop body
LE: loop exit
PB: predicated region body
PF: predicated region fallthrough
CT: control target
= control target key end

     0   :  { %s2682_s0 = inlined_call_operand.vmem [shape: f32[256,64], index: 0, kind: input, shape index: {}]   ;;  %s2683_s1 = inlined_call_operand.vmem [shape: f32[16,64], index: 1, kind: input, shape index: {}]   ;;  %s2684_s2 = inlined_call_operand.vmem [shape: f32[16,16], index: 2, kind: input, shape index: {}]   ;;  %s2685_s3 = inlined_call_operand.vmem [shape: f32[64,128], index: 3, kind: input, shape index: {}]   ;;  %s2686_s4 = inlined_call_operand.vmem [shape: f32[1,128], index: 4, kind: input, shape index: {}]   ;;  %s2687_s5 = inlined_call_operand.vmem [shape: f32[64,128], index: 5, kind: input, shape index: {}]   ;;  %s2688_s6 = inlined_call_operand.vmem [shape: f32[1,128], index: 6, kind: input, shape index: {}]   ;;  %s2689_s7 = inlined_call_operand.<no memory space> [shape: f32[1], index: 7, kind: input, shape index: {}]   ;;  %s2690_s8 = inlined_call_operand.vmem [shape: f32[128,128], index: 8, kind: input, shape index: {}]   ;;  %s2691_s9 = inlined_call_operand.vmem [shape: f32[1,128], index: 9, kind: input, shape index: {}]   ;;  %s2692_s10 = inlined_call_operand.vmem [shape: f32[64,128], index: 10, kind: input, shape index: {}]   ;;  %s2693_s11 = inlined_call_operand.vmem [shape: f32[1,128], index: 11, kind: input, shape index: {}]   ;;  %s2694_s12 = inlined_call_operand.<no memory space> [shape: f32[1], index: 12, kind: input, shape index: {}]   ;;  %s2695_s13 = inlined_call_operand.hbm [shape: f32[16,128], index: 13, kind: output, shape index: {}]  }
   0x1   :  { %18 = sst [smem:[#allocation2]] %s2689_s7 }
   0x2   :  { %19 = sst [smem:[#allocation3]] %s2694_s12 }
   0x3   :  { %20 = vsyncpa [#allocation5], 0 }
   0x4   :  { %22 = vsyncpa [#allocation5 + $0x1], 0  ;;  %s1999_s29 = smov 0   ;;  %s2001_s30 = smov 0  }
   0x5   :  { %s2003_s14 = smov 0   ;;  %s2005_s15 = smov 0  }
   0x6 LB: > { %2700 = sst [smem:[#allocation7_spill]] %s1917_s14  ;;  %s2020_s7 = sadd.s32 4294967295, %s1921_s15   ;;  %s1921_s15 = sphi %s2005_s15, %s2707_s15   ;;  %s1917_s14 = sphi %s2003_s14, %s2709_s14   ;;  %s1913_s30 = sphi %s2001_s30, %s2711_s30   ;;  %s1909_s29 = sphi %s1999_s29, %s2710_s29  }
   0x7   : > { %s1662_s12 = sadd.s32 4294967294, %s1921_s15   ;;  %s2024_s16 = sadd.s32 1, %s1921_s15  }
   0x8   : > { %2701 = sst [smem:[#allocation8_spill]] %s2024_s16  ;;  %s323_s17 = sadd.s32 1, %s1917_s14 }
   0x9   : > { %s320_s18 = ssub.s32 %s1921_s15, %s2024_s16  ;;  %p333_p0 = scmp.ne.s32.totalorder %s1917_s14, %s1913_s30 }
   0xa   : > { %p321_p1 = scmp.eq.s32.totalorder %s320_s18, 0  ;;  %p334_p2 = scmp.eq.s32.totalorder %s2020_s7, 1 }
   0xb   : > { %p339_p3 = scmp.ne.s32.totalorder %s1913_s30, %s1909_s29  ;;  %p340_p4 = scmp.eq.s32.totalorder %s1662_s12, 1 }
   0xc   : > { %s2035_s19 = scalar_select %p321_p1, %s1917_s14, %s323_s17  }
   0xd   : > { %p2037_p5 = por %p334_p2, %p333_p0  ;;  %p2041_p6 = por %p340_p4, %p339_p3 }
   0xe   : > { %2702 = sst [smem:[#allocation9_spill]] %s2035_s19  ;;  %p1665_p7 = scmp.ge.s32.totalorder %s1921_s15, 1 }
   0xf   : > { %s2704_s21 = scalar_select %p2041_p6, 1, 0 }
  0x10   : > { %p411_p8 = scmp.lt.s32.totalorder %s1921_s15, 3 }
  0x11   : > { %2705 = sst [smem:[#allocation10_spill]] %s2704_s21 }
  0x12   : > { %p412_p9 = pnand %p1665_p7, %p411_p8 }
  0x13   : > { %p469_p10 = scmp.lt.s32.totalorder (!%p412_p9), %s2020_s7, 1  ;;  %s1667_s28 = sshll.u32 (!%p412_p9), %s2020_s7, 4 }
  0x14   : > { %415 = sbr.rel (%p412_p9) target bundleno = 1636 (0x664), region = 72  ;;  %p464_p11 = scmp.lt.s32.totalorder (!%p412_p9), %s1667_s28, 31 }
  0x19   : > { %v503_v0 = vld [vmem:[%s2685_s3 + $0x38] sm:$0xff]  ;;  %v502_v2 = vld [vmem:[%s2685_s3 + $0x30] sm:$0xff]  ;;  %v501_v4 = vld [vmem:[%s2685_s3 + $0x28] sm:$0xff]  ;;  %s2068_s25 = scalar_select %p469_p10, %s2020_s7, 1  ;;  %vm508_vm0 = vcmask 523264   ;;  %vm800_vm1 = vcmask 130112  }
  0x1a   : > { %v539_v1 = vld [vmem:[%s2687_s5 + $0x38] sm:$0xff]  ;;  %520 = vmatpush.msra.mxu0 %v503_v0  ;;  %v538_v3 = vld [vmem:[%s2687_s5 + $0x30] sm:$0xff]  ;;  %v537_v5 = vld [vmem:[%s2687_s5 + $0x28] sm:$0xff]  ;;  %s2713_s28 = smov (!%p464_p11, %s1667_s28), 31  ;;  %vm823_vm2 = vcmask 1041409   ;;  %vm825_vm3 = vcmask 1042434  }
  0x1b   : > { %1708 = vmatpush.msra.mxu1 %v539_v1  ;;  %v500_v6 = vld [vmem:[%s2685_s3 + $0x20] sm:$0xff]  ;;  %v499_v8 = vld [vmem:[%s2685_s3 + $0x18] sm:$0xff]  ;;  %s1669_s19 = sshll.u32 %s2068_s25, 3  ;;  %s1668_s26 = sshll.u32 %s2713_s28, 3  ;;  %v498_v10 = vld [vmem:[%s2685_s3 + $0x10] sm:$0xff]  ;;  %vm827_vm4 = vcmask 1043459  }
  0x1c   : > { %521 = vmatpush.msra.mxu0 %v502_v2  ;;  %v536_v7 = vld [vmem:[%s2687_s5 + $0x20] sm:$0xff]  ;;  %v535_v9 = vld [vmem:[%s2687_s5 + $0x18] sm:$0xff]  ;;  %v534_v11 = vld [vmem:[%s2687_s5 + $0x10] sm:$0xff]  ;;  %s472_s14 = scalar_lea.vmem %s2683_s1, %s1669_s19  ;;  %s2103_s12 = scalar_lea.vmem %s2682_s0, %s1668_s26  ;;  %vm829_vm5 = vcmask 1044484   ;;  %vm831_vm6 = vcmask 1045509   ;;  %vm833_vm7 = vcmask 1046534  }
  0x1d   : > { %1709 = vmatpush.msra.mxu1 %v538_v3  ;;  %v497_v12 = vld [vmem:[%s2685_s3 + $0x8] sm:$0xff]  ;;  %v496_v14 = vld [vmem:[%s2685_s3] sm:$0xff]  ;;  %v2112_v17 = vld [vmem:[%s2103_s12 + $0x30] sm:$0xff]  ;;  %s761_s28 = sld [smem:[#allocation2]]  ;;  %vm835_vm8 = vcmask 1047559   ;;  %vm839_vm10 = vcmask 130048  }
  0x1e   : > { %522 = vmatpush.msra.mxu0 %v501_v4  ;;  %v533_v13 = vld [vmem:[%s2687_s5 + $0x8] sm:$0xff]  ;;  %v532_v15 = vld [vmem:[%s2687_s5] sm:$0xff]  ;;  %v2118_v18 = vld [vmem:[%s2103_s12 + $0x38] sm:$0xff] }
  0x1f   : > { %1710 = vmatpush.msra.mxu1 %v537_v5  ;;  %v495_v16 = vld [vmem:[%s472_s14] sm:$0xff]  ;;  %v2133_v21 = vld [vmem:[%s2103_s12 + $0x8] sm:$0xff]  ;;  %v2143_v23 = vld [vmem:[%s2103_s12 + $0x10] sm:$0xff]  ;;  %s460_s14 = sand.u32 1, %s1913_s30  }
  0x20   : > { %523 = vmatpush.msra.mxu0 %v500_v6  ;;  %v2123_v19 = vld [vmem:[%s2103_s12] sm:$0xff]  ;;  %v2136_v22 = vld [vmem:[%s2103_s12 + $0x48] sm:$0xff]  ;;  %v2146_v24 = vld [vmem:[%s2103_s12 + $0x50] sm:$0xff]  ;;  %s1666_s27 = sshll.u32 %s460_s14, 3  ;;  %s1564_s23 = scalar_lea.sflag [#allocation5], %s460_s14 }
  0x21   : > { %1711 = vmatpush.msra.mxu1 %v536_v7  ;;  %v2126_v20 = vld [vmem:[%s2103_s12 + $0x40] sm:$0xff]  ;;  %v2153_v25 = vld [vmem:[%s2103_s12 + $0x18] sm:$0xff]  ;;  %v2173_v29 = vld [vmem:[%s2103_s12 + $0x28] sm:$0xff]  ;;  %s462_s18 = scalar_lea.vmem [#allocation4], %s1666_s27 }
  0x22   : > { %524 = vmatpush.msra.mxu0 %v499_v8  ;;  %v2156_v26 = vld [vmem:[%s2103_s12 + $0x58] sm:$0xff]  ;;  %v2163_v27 = vld [vmem:[%s2103_s12 + $0x20] sm:$0xff]  ;;  %v2176_v30 = vld [vmem:[%s2103_s12 + $0x68] sm:$0xff] }
  0x23   : > { %1712 = vmatpush.msra.mxu1 %v535_v9  ;;  %v2166_v28 = vld [vmem:[%s2103_s12 + $0x60] sm:$0xff]  ;;  %v2183_v31 = vld [vmem:[%s2103_s12 + $0x70] sm:$0xff]  ;;  %v2188_v32 = vld [vmem:[%s2103_s12 + $0x78] sm:$0xff]  ;;  %s476_s12 = scalar_lea.vmem %s2684_s2, %s1669_s19 }
  0x24   : > { %525 = vmatpush.msra.mxu0 %v498_v10  ;;  %v1783_v33 = vld [vmem:[%s2686_s4] ss:$0 sm:$0xff] }
  0x25   : > { %1713 = vmatpush.msra.mxu1 %v534_v11  ;;  %v2208_v43 = vld [vmem:[%s2688_s6] ss:$0 sm:$0xff] }
  0x26   : > { %526 = vmatpush.msra.mxu0 %v497_v12 }
  0x27   : > { %1714 = vmatpush.msra.mxu1 %v533_v13 }
  0x28   : > { %527 = vmatpush.msra.mxu0 %v496_v14 }
  0x29   : > { %1715 = vmatpush.msra.mxu1 %v532_v15  ;;  %1671 = vmatmul.msk.f32.vlgmr.msra.gmra.mxu0 %vm508_vm0, %v495_v16 }
  0x2a   : > { %1678 = vmatmul.msk.f32.vlgmr.msra.gmra.mxu1 %vm508_vm0, %v2112_v17  ;;  %596 = vmatpush.msrb.mxu0 %v539_v1 }
  0x2c   : > { %597 = vmatpush.msrb.mxu0 %v538_v3 }
  0x2e   : > { %598 = vmatpush.msrb.mxu0 %v537_v5 }
  0x30   : > { %599 = vmatpush.msrb.mxu0 %v536_v7 }
  0x32   : > { %1679 = vmatmul.msk.f32.gmra.mxu1 %vm508_vm0, %v2118_v18  ;;  %600 = vmatpush.msrb.mxu0 %v535_v9 }
  0x34   : > { %601 = vmatpush.msrb.mxu0 %v534_v11 }
  0x36   : > { %602 = vmatpush.msrb.mxu0 %v533_v13 }
  0x38   : > { %603 = vmatpush.msrb.mxu0 %v532_v15 }
  0x39   : > { %1672 = vmatmul.msk.f32.vlgmr.msrb.gmra.mxu0 %vm508_vm0, %v2123_v19 }
  0x3a   : > { %1680 = vmatmul.msk.f32.gmra.mxu1 %vm508_vm0, %v2126_v20 }
  0x41   : > { %1673 = vmatmul.msk.f32.gmra.mxu0 %vm508_vm0, %v2133_v21 }
  0x42   : > { %1681 = vmatmul.msk.f32.gmra.mxu1 %vm508_vm0, %v2136_v22 }
  0x49   : > { %1674 = vmatmul.msk.f32.gmra.mxu0 %vm508_vm0, %v2143_v23 }
  0x4a   : > { %1682 = vmatmul.msk.f32.gmra.mxu1 %vm508_vm0, %v2146_v24 }
  0x51   : > { %1675 = vmatmul.msk.f32.gmra.mxu0 %vm508_vm0, %v2153_v25 }
  0x52   : > { %1683 = vmatmul.msk.f32.gmra.mxu1 %vm508_vm0, %v2156_v26 }
  0x59   : > { %1676 = vmatmul.msk.f32.gmra.mxu0 %vm508_vm0, %v2163_v27 }
  0x5a   : > { %1684 = vmatmul.msk.f32.gmra.mxu1 %vm508_vm0, %v2166_v28 }
  0x61   : > { %1677 = vmatmul.msk.f32.gmra.mxu0 %vm508_vm0, %v2173_v29 }
  0x62   : > { %1685 = vmatmul.msk.f32.gmra.mxu1 %vm508_vm0, %v2176_v30 }
  0x6a   : > { %1686 = vmatmul.msk.f32.gmra.mxu1 %vm508_vm0, %v2183_v31 }
  0x72   : > { %1687 = vmatmul.msk.f32.gmra.mxu1 %vm508_vm0, %v2188_v32 }
  0xa6   : > { %v529_v34 = vpop.f32.mrf.mxu0 }
  0xa7   : > { %v2195_v35 = vpop.f32.mrf.mxu1  ;;  %v2197_v36 = vadd.f32 %v1783_v33, %v529_v34 }
  0xa9   : > { %v656_v37 = vrot.slane %v2197_v36, 3  ;;  %v657_v42 = vrot.slane %v2197_v36, 4  ;;  %v661_v45 = vperm.slane %v2197_v36, 0  ;;  %v654_v61 = vrot.slane %v2197_v36, 1 }
  0xaa   : > { %v658_v6 = vrot.slane %v2197_v36, 5  ;;  %v655_v14 = vrot.slane %v2197_v36, 2  ;;  %v659_v15 = vrot.slane %v2197_v36, 6 }
  0xab   : > { %v664_v38 = vperm.slane %v656_v37, 0  ;;  %v665_v46 = vperm.slane %v657_v42, 0  ;;  %v662_v63 = vperm.slane %v654_v61, 0  ;;  %v660_v61 = vrot.slane %v2197_v36, 7 }
  0xac   : > { %v666_v13 = vperm.slane %v658_v6, 0  ;;  %v663_v33 = vperm.slane %v655_v14, 0  ;;  %v667_v34 = vperm.slane %v659_v15, 0 }
  0xad   : > { %v683_v39 = vadd.f32 %v664_v38, %v2195_v35 }
  0xaf   : > { %v2201_v40 = vpop.f32.mrf.mxu1  ;;  %1787 = vtanh.f32 %v683_v39 }
  0xb0   : > { %v684_v41 = vadd.f32 %v664_v38, %v2201_v40 }
  0xb2   : > { %1789 = vtanh.f32 %v684_v41 }
  0xb5   : > { %v1788_v44 = vpop.eup %1787 }
  0xb6   : > { %v2211_v47 = vpop.f32.mrf.mxu0  ;;  %v719_v49 = vmul.f32 %v1788_v44, %v2208_v43 }
  0xb7   : > { %v2213_v48 = vpop.f32.mrf.mxu1  ;;  %v677_v51 = vadd.f32 %v661_v45, %v2211_v47 }
  0xb8   : > { %v1790_v50 = vpop.eup %1789  ;;  %v685_v52 = vadd.f32 %v665_v46, %v2213_v48  ;;  %741 = vadd.xlane.f32.xlu0 %v719_v49 }
  0xb9   : > { %v720_v53 = vmul.f32 %v1790_v50, %v2208_v43  ;;  %1791 = vtanh.f32 %v677_v51 }
  0xba   : > { %1793 = vtanh.f32 %v685_v52 }
  0xbb   : > { %743 = vadd.xlane.f32.xlu1 %v720_v53 }
  0xbe   : > { %v2219_v54 = vpop.f32.mrf.mxu0 }
  0xbf   : > { %v2221_v55 = vpop.f32.mrf.mxu1  ;;  %v1792_v56 = vpop.eup %1791  ;;  %v678_v57 = vadd.f32 %v661_v45, %v2219_v54 }
  0xc0   : > { %v1794_v58 = vpop.eup %1793  ;;  %v713_v59 = vmul.f32 %v1792_v56, %v2208_v43  ;;  %v686_v62 = vadd.f32 %v665_v46, %v2221_v55 }
  0xc1   : > { %1795 = vtanh.f32 %v678_v57  ;;  %v721_v60 = vmul.f32 %v1794_v58, %v2208_v43 }
  0xc2   : > { %729 = vadd.xlane.f32.xlu0 %v713_v59  ;;  %1797 = vtanh.f32 %v686_v62 }
  0xc3   : > { %745 = vadd.xlane.f32.xlu2 %v721_v60 }
  0xc6   : > { %v2228_v0 = vpop.f32.mrf.mxu0 }
  0xc7   : > { %v2230_v1 = vpop.f32.mrf.mxu1  ;;  %v1796_v2 = vpop.eup %1795  ;;  %v679_v3 = vadd.f32 %v662_v63, %v2228_v0 }
  0xc8   : > { %v714_v4 = vmul.f32 %v1796_v2, %v2208_v43  ;;  %v1798_v5 = vpop.eup %1797  ;;  %v687_v16 = vadd.f32 %v666_v13, %v2230_v1 }
  0xc9   : > { %1799 = vtanh.f32 %v679_v3  ;;  %v722_v11 = vmul.f32 %v1798_v5, %v2208_v43  ;;  %v668_v3 = vperm.slane %v660_v61, 0 }
  0xca   : > { %731 = vadd.xlane.f32.xlu0 %v714_v4 }
  0xce   : > { %v2235_v7 = vpop.f32.mrf.mxu0 }
  0xcf   : > { %v2237_v8 = vpop.f32.mrf.mxu1  ;;  %v1800_v9 = vpop.eup %1799  ;;  %v680_v10 = vadd.f32 %v662_v63, %v2235_v7 }
  0xd0   : > { %v715_v12 = vmul.f32 %v1800_v9, %v2208_v43  ;;  %v688_v45 = vadd.f32 %v666_v13, %v2237_v8 }
  0xd1   : > { %1801 = vtanh.f32 %v680_v10 }
  0xd2   : > { %747 = vadd.xlane.f32.xlu0 %v722_v11  ;;  %733 = vadd.xlane.f32.xlu1 %v715_v12  ;;  %1803 = vtanh.f32 %v687_v16 }
  0xd6   : > { %v2245_v37 = vpop.f32.mrf.mxu0 }
  0xd7   : > { %v2247_v38 = vpop.f32.mrf.mxu1  ;;  %v1802_v39 = vpop.eup %1801  ;;  %v681_v41 = vadd.f32 %v663_v33, %v2245_v37 }
  0xd8   : > { %v689_v42 = vadd.f32 %v667_v34, %v2247_v38  ;;  %v716_v44 = vmul.f32 %v1802_v39, %v2208_v43  ;;  %v1804_v46 = vpop.eup %1803 }
  0xd9   : > { %1805 = vtanh.f32 %v681_v41  ;;  %v723_v56 = vmul.f32 %v1804_v46, %v2208_v43  ;;  %v795_v46 = vlaneseq }
  0xda   : > { %1807 = vtanh.f32 %v689_v42  ;;  %735 = vadd.xlane.f32.xlu1 %v716_v44 }
  0xdb   : > { %1809 = vtanh.f32 %v688_v45 }
  0xde   : > { %v2256_v53 = vpop.f32.mrf.mxu0 }
  0xdf   : > { %v2253_v49 = vpop.f32.mrf.mxu1  ;;  %v1806_v50 = vpop.eup %1805  ;;  %v682_v59 = vadd.f32 %v663_v33, %v2256_v53 }
  0xe0   : > { %v690_v51 = vadd.f32 %v667_v34, %v2253_v49  ;;  %v1808_v52 = vpop.eup %1807  ;;  %v717_v57 = vmul.f32 %v1806_v50, %v2208_v43 }
  0xe1   : > { %v725_v58 = vmul.f32 %v1808_v52, %v2208_v43  ;;  %v1810_v60 = vpop.eup %1809 }
  0xe2   : > { %1811 = vtanh.f32 %v690_v51  ;;  %749 = vadd.xlane.f32.xlu1 %v723_v56  ;;  %737 = vadd.xlane.f32.xlu2 %v717_v57  ;;  %v724_v2 = vmul.f32 %v1810_v60, %v2208_v43  ;;  %v2275_v51 = vand.u32 127, %v795_v46  ;;  %v762_v57 = vstv %s761_s28  ;;  %s1278_s28 = sld [smem:[#allocation3]] }
  0xe3   : > { %753 = vadd.xlane.f32.xlu0 %v725_v58  ;;  %1813 = vtanh.f32 %v682_v59 }
  0xe4   : > { %v2278_v58 = vadd.s32 4294967288, %v2275_v51 }
  0xe7   : > { %v2263_v62 = vpop.f32.mrf.mxu1 }
  0xe8   : > { %v1812_v63 = vpop.eup %1811  ;;  %v691_v5 = vadd.f32 %v668_v3, %v2263_v62 }
  0xe9   : > { %v726_v4 = vmul.f32 %v1812_v63, %v2208_v43  ;;  %v1814_v6 = vpop.eup %1813 }
  0xea   : > { %751 = vadd.xlane.f32.xlu2 %v724_v2  ;;  %1815 = vtanh.f32 %v691_v5  ;;  %v718_v11 = vmul.f32 %v1814_v6, %v2208_v43 }
  0xeb   : > { %755 = vadd.xlane.f32.xlu1 %v726_v4 }
  0xef   : > { %v2268_v9 = vpop.f32.mrf.mxu1 }
  0xf0   : > { %v692_v10 = vadd.f32 %v668_v3, %v2268_v9  ;;  %v1816_v12 = vpop.eup %1815 }
  0xf1   : > { %v727_v14 = vmul.f32 %v1816_v12, %v2208_v43 }
  0xf2   : > { %1817 = vtanh.f32 %v692_v10  ;;  %739 = vadd.xlane.f32.xlu2 %v718_v11 }
  0xf8   : > { %v1818_v13 = vpop.eup %1817 }
  0xf9   : > { %v728_v15 = vmul.f32 %v1818_v13, %v2208_v43 }
  0xfa   : > { %757 = vadd.xlane.f32.xlu2 %v727_v14 }
  0xfb   : > { %759 = vadd.xlane.f32.xlu0 %v728_v15 }
 0x12b   : > { %v742_v16 = vpop.xlane.xlu0 %741 }
 0x12c   : > { %v769_v61 = vadd.f32 %v762_v57, %v742_v16 }
 0x12e   : > { %v744_v33 = vpop.xlane.xlu1 %743  ;;  %v808_v14 = vperm.slane %v769_v61, %v2275_v51 }
 0x12f   : > { %v770_v63 = vadd.f32 %v762_v57, %v744_v33 }
 0x131   : > { %v809_v33 = vperm.slane %v770_v63, %v2278_v58 }
 0x135   : > { %v730_v39 = vpop.xlane.xlu0 %729 }
 0x136   : > { %v746_v41 = vpop.xlane.xlu2 %745  ;;  %v763_v2 = vadd.f32 %v762_v57, %v730_v39 }
 0x137   : > { %v771_v6 = vadd.f32 %v762_v57, %v746_v41 }
 0x138   : > { %v797_v39 = vperm.slane %v763_v2, %v2275_v51  ;;  %v810_v2 = vsel %vm800_vm1, %v809_v33, %v808_v14 }
 0x13d   : > { %v732_v44 = vpop.xlane.xlu0 %731 }
 0x13e   : > { %v764_v59 = vadd.f32 %v762_v57, %v732_v44 }
 0x140   : > { %v799_v10 = vperm.slane %v764_v59, %v2278_v58 }
 0x145   : > { %v734_v34 = vpop.xlane.xlu1 %733  ;;  %v748_v52 = vpop.xlane.xlu0 %747 }
 0x146   : > { %v765_v60 = vadd.f32 %v762_v57, %v734_v34  ;;  %v772_v4 = vadd.f32 %v762_v57, %v748_v52 }
 0x148   : > { %v802_v11 = vperm.slane %v765_v60, %v2275_v51  ;;  %v812_v41 = vperm.slane %v772_v4, %v2278_v58 }
 0x14d   : > { %v736_v42 = vpop.xlane.xlu1 %735 }
 0x14e   : > { %v766_v43 = vadd.f32 %v762_v57, %v736_v42 }
 0x150   : > { %v803_v3 = vperm.slane %v766_v43, %v2278_v58  ;;  %v811_v43 = vperm.slane %v771_v6, %v2275_v51 }
 0x152   : > { %v804_v42 = vsel %vm800_vm1, %v803_v3, %v802_v11  ;;  %v813_v4 = vsel %vm800_vm1, %v812_v41, %v811_v43 }
 0x155   : > { %v738_v45 = vpop.xlane.xlu2 %737  ;;  %v750_v50 = vpop.xlane.xlu1 %749 }
 0x156   : > { %v767_v5 = vadd.f32 %v762_v57, %v738_v45  ;;  %v754_v12 = vpop.xlane.xlu0 %753  ;;  %v773_v44 = vadd.f32 %v762_v57, %v750_v50 }
 0x157   : > { %v775_v50 = vadd.f32 %v762_v57, %v754_v12 }
 0x158   : > { %v805_v45 = vperm.slane %v767_v5, %v2275_v51  ;;  %v814_v5 = vperm.slane %v773_v44, %v2275_v51 }
 0x159   : > { %v817_v33 = vperm.slane %v775_v50, %v2275_v51  ;;  %v2324_v50 = vshrl.u32 %v795_v46, 7 }
 0x15b   : > { %1765 = vset.pattern.permute.xlu2 %v2324_v50  ;;  %1763 = vset.pattern.permute.xlu0 %v2324_v50 }
 0x15d   : > { %v752_v56 = vpop.xlane.xlu2 %751 }
 0x15e   : > { %v774_v15 = vadd.f32 %v762_v57, %v752_v56  ;;  %v756_v34 = vpop.xlane.xlu1 %755  ;;  %v801_v56 = vsel %vm800_vm1, %v799_v10, %v797_v39 }
 0x15f   : > { %v776_v59 = vadd.f32 %v762_v57, %v756_v34  ;;  %v824_v60 = vsel %vm823_vm2, %v804_v42, %v801_v56 }
 0x160   : > { %v815_v61 = vperm.slane %v774_v15, %v2278_v58 }
 0x161   : > { %v818_v10 = vperm.slane %v776_v59, %v2278_v58 }
 0x162   : > { %v816_v14 = vsel %vm800_vm1, %v815_v61, %v814_v5 }
 0x163   : > { %v819_v44 = vsel %vm800_vm1, %v818_v10, %v817_v33 }
 0x165   : > { %v740_v13 = vpop.xlane.xlu2 %739 }
 0x166   : > { %v768_v16 = vadd.f32 %v762_v57, %v740_v13 }
 0x168   : > { %v806_v52 = vperm.slane %v768_v16, %v2278_v58  ;;  %v2308_v16 = vld [vmem:[%s476_s12] sm:$0xff]  ;;  %s1705_s12 = sshll.u32 %s2020_s7, 3  ;;  %s1576_s7 = sshll.u32 %s462_s18, 4  ;;  %s1577_s7 = int_to_ptr.vmem [resolvable:$true] %s1576_s7 }
 0x169   : > { %vm494_vm9 = vcmp.gt.f32.partialorder %v2308_v16, 0.5  ;;  %s1574_s17 = scalar_lea.hbm %s2695_s13, %s1705_s12 }
 0x16a   : > { %v807_v63 = vsel %vm800_vm1, %v806_v52, %v805_v45  ;;  %s1578_s22 = sshll.u32 %s1574_s17, 4  ;;  %s1579_s22 = int_to_ptr.hbm [resolvable:$true] %s1578_s22 }
 0x16b   : > { %v826_v3 = vsel %vm825_vm3, %v807_v63, %v824_v60  ;;  %s1873_s16 = sshra.s32 %s1579_s22, 4  ;;  %s1874_s16 = int_to_ptr.hbm [resolvable:$true] %s1873_s16 }
 0x16c   : > { %v828_v6 = vsel %vm827_vm4, %v810_v2, %v826_v3  ;;  %v2329_v3 = vadd.s32 8, %v2324_v50  ;;  %s1875_s21 = scalar_lea.hbm %s1874_s16, 8  ;;  %p1880_p1 = scmp.lt.s32.totalorder %s1874_s16, %s2695_s13 }
 0x16d   : > { %v758_v11 = vpop.xlane.xlu2 %757  ;;  %v830_v12 = vsel %vm829_vm5, %v813_v4, %v828_v6  ;;  %p1876_p12 = scmp.ne.s32.totalorder %s1874_s16, %s1875_s21 }
 0x16e   : > { %v760_v13 = vpop.xlane.xlu0 %759  ;;  %v777_v15 = vadd.f32 %v762_v57, %v758_v11  ;;  %v832_v39 = vsel %vm831_vm6, %v816_v14, %v830_v12  ;;  %1764 = vset.pattern.permute.xlu1 %v2329_v3 }
 0x16f   : > { %v778_v34 = vadd.f32 %v762_v57, %v760_v13  ;;  %v834_v57 = vsel %vm833_vm7, %v819_v44, %v832_v39  ;;  %p1877_p13 = pnand %p1876_p12, %p2037_p5 }
 0x170   : > { %v820_v42 = vperm.slane %v777_v15, %v2275_v51 }
 0x171   : > { %v821_v41 = vperm.slane %v778_v34, %v2278_v58  ;;  %p1878_p0 = pneg %p1877_p13 }
 0x173   : > { %v822_v45 = vsel %vm800_vm1, %v821_v41, %v820_v42 }
 0x174   : > { %v836_v52 = vsel %vm835_vm8, %v822_v45, %v834_v57 }
 0x175   : > { %v838_v43 = vsel %vm494_vm9, -inf, %v836_v52 }
 0x176   : > { %v840_v56 = vsel %vm839_vm10, %v838_v43, -inf }
 0x177   : > { %841 = vmax.xlane.f32.xlu1 %v840_v56  ;;  %v2343_v56 = vld [vmem:[%s2692_s10 + $0x38] sm:$0xff] }
 0x178   : > { %1716 = vmatpush.msra.mxu3 %v2343_v56 }
 0x1ea   : > { %v842_v59 = vpop.xlane.xlu1 %841 }
 0x1eb   : > { %v843_v60 = vsub.f32 %v838_v43, %v842_v59  ;;  %v2349_v59 = vld [vmem:[%s2692_s10 + $0x30] sm:$0xff] }
 0x1ec   : > { %1717 = vmatpush.msra.mxu3 %v2349_v59 }
 0x1ed   : > { %v844_v61 = vmul.f32 1.442695, %v843_v60  ;;  %v2355_v60 = vld [vmem:[%s2692_s10 + $0x28] sm:$0xff] }
 0x1ee   : > { %1718 = vmatpush.msra.mxu3 %v2355_v60 }
 0x1ef   : > { %1819 = vpow2.f32 %v844_v61  ;;  %v2361_v61 = vld [vmem:[%s2692_s10 + $0x20] sm:$0xff] }
 0x1f0   : > { %1719 = vmatpush.msra.mxu3 %v2361_v61 }
 0x1f5   : > { %v1820_v63 = vpop.eup %1819 }
 0x1f6   : > { %v846_v2 = vsel %vm839_vm10, %v1820_v63, 0.0 }
 0x1f7   : > { %847 = vadd.xlane.f32.xlu2 %v846_v2  ;;  %v2373_v2 = vld [vmem:[%s2692_s10 + $0x10] sm:$0xff] }
 0x26a   : > { %v848_v4 = vpop.xlane.xlu2 %847 }
 0x26b   : > { %1821 = vrcp.f32 %v848_v4  ;;  %v860_v11 = vand.u32 2147483648, %v848_v4  ;;  %v858_v12 = vand.u32 2147483647, %v848_v4  ;;  %vm854_vm12 = vweird.f32 %v848_v4 }
 0x26d   : > { %v861_v14 = vor.u32 1.1754944e-38, %v860_v11  ;;  %vm859_vm14 = vcmp.eq.f32.partialorder %v858_v12, 8.507059e+37 }
 0x271   : > { %v1822_v5 = vpop.eup %1821 }
 0x272   : > { %v850_v6 = vmul.f32 %v1822_v5, %v848_v4  ;;  %vm855_vm11 = vweird.f32 %v1822_v5  ;;  %v2379_v4 = vld [vmem:[%s2692_s10 + $0x8] sm:$0xff] }
 0x273   : > { %vm856_vm13 = vmor %vm854_vm12, %vm855_vm11 }
 0x274   : > { %v851_v10 = vsub.f32 1.0, %v850_v6 }
 0x276   : > { %v852_v13 = vmul.f32 %v1822_v5, %v851_v10 }
 0x278   : > { %v853_v46 = vadd.f32 %v1822_v5, %v852_v13  ;;  %v1072_v13 = vld [vmem:[%s2690_s8 + $0x78] sm:$0xff] }
 0x279   : > { %1077 = vmatpush.msra.mxu2 %v1072_v13 }
 0x27a   : > { %v857_v15 = vsel %vm856_vm13, %v1822_v5, %v853_v46  ;;  %v2385_v5 = vld [vmem:[%s2692_s10] sm:$0xff]  ;;  %v1068_v46 = vld [vmem:[%s2690_s8 + $0x58] sm:$0xff] }
 0x27b   : > { %v862_v34 = vsel %vm859_vm14, %v861_v14, %v857_v15  ;;  %v1067_v14 = vld [vmem:[%s2690_s8 + $0x50] sm:$0xff]  ;;  %v1065_v15 = vld [vmem:[%s2690_s8 + $0x40] sm:$0xff] }
 0x27c   : > { %v863_v33 = vmul.f32 %v1820_v63, %v862_v34  ;;  %v2367_v63 = vld [vmem:[%s2692_s10 + $0x18] sm:$0xff] }
 0x27d   : > { %1720 = vmatpush.msra.mxu3 %v2367_v63 }
 0x27e   : > { %v877_v39 = vperm.slane %v863_v33, 1  ;;  %v864_v42 = vperm.slane %v863_v33, 0  ;;  %v890_v41 = vperm.slane %v863_v33, 2  ;;  %v903_v44 = vperm.slane %v863_v33, 3 }
 0x27f   : > { %v942_v45 = vperm.slane %v863_v33, 6  ;;  %v916_v57 = vperm.slane %v863_v33, 4  ;;  %v929_v52 = vperm.slane %v863_v33, 5  ;;  %v955_v43 = vperm.slane %v863_v33, 7  ;;  %1721 = vmatpush.msra.mxu3 %v2373_v2  ;;  %v1064_v33 = vld [vmem:[%s2690_s8 + $0x38] sm:$0xff] }
 0x280   : > { %882 = vperm.xlu2 %1765, %v877_v39   ;;  %875 = vperm.xlu1 %1764, %v864_v42  }
 0x281   : > { %869 = vperm.xlu0 %1763, %v864_v42   ;;  %1722 = vmatpush.msra.mxu3 %v2379_v4 }
 0x283   : > { %1723 = vmatpush.msra.mxu3 %v2385_v5 }
 0x284   : > { %1694 = vmatmul.msk.f32.vlgmr.msra.gmra.mxu3 %vm508_vm0, %v2112_v17  ;;  %v1071_v17 = vld [vmem:[%s2690_s8 + $0x70] sm:$0xff] }
 0x285   : > { %1078 = vmatpush.msra.mxu2 %v1071_v17 }
 0x288   : > { %1766 = vset.pattern.permute.xlu2 %v2329_v3  ;;  %1767 = vset.pattern.permute.xlu1 %v2324_v50 }
 0x289   : > { %1768 = vset.pattern.permute.xlu0 %v2329_v3 }
 0x28c   : > { %1695 = vmatmul.msk.f32.gmra.mxu3 %vm508_vm0, %v2118_v18  ;;  %v1070_v18 = vld [vmem:[%s2690_s8 + $0x68] sm:$0xff] }
 0x28d   : > { %1079 = vmatpush.msra.mxu2 %v1070_v18 }
 0x290   : > { %888 = vperm.xlu2 %1766, %v877_v39   ;;  %895 = vperm.xlu1 %1767, %v890_v41   ;;  %v1063_v39 = vld [vmem:[%s2690_s8 + $0x30] sm:$0xff] }
 0x291   : > { %914 = vperm.xlu0 %1768, %v903_v44  }
 0x294   : > { %1696 = vmatmul.msk.f32.gmra.mxu3 %vm508_vm0, %v2126_v20  ;;  %v1069_v20 = vld [vmem:[%s2690_s8 + $0x60] sm:$0xff] }
 0x295   : > { %1080 = vmatpush.msra.mxu2 %v1069_v20  ;;  %v1058_v20 = vld [vmem:[%s2690_s8 + $0x8] sm:$0xff] }
 0x297   : > { %1081 = vmatpush.msra.mxu2 %v1068_v46 }
 0x298   : > { %901 = vperm.xlu2 %1766, %v890_v41   ;;  %908 = vperm.xlu1 %1767, %v903_v44   ;;  %v1061_v44 = vld [vmem:[%s2690_s8 + $0x20] sm:$0xff] }
 0x299   : > { %1771 = vset.pattern.permute.xlu0 %v2324_v50  ;;  %1082 = vmatpush.msra.mxu2 %v1067_v14 }
 0x29c   : > { %1697 = vmatmul.msk.f32.gmra.mxu3 %vm508_vm0, %v2136_v22 }
 0x2a0   : > { %1769 = vset.pattern.permute.xlu2 %v2324_v50  ;;  %1770 = vset.pattern.permute.xlu1 %v2329_v3 }
 0x2a1   : > { %947 = vperm.xlu0 %1771, %v942_v45  }
 0x2a4   : > { %1698 = vmatmul.msk.f32.gmra.mxu3 %vm508_vm0, %v2146_v24  ;;  %v1066_v24 = vld [vmem:[%s2690_s8 + $0x48] sm:$0xff] }
 0x2a5   : > { %1083 = vmatpush.msra.mxu2 %v1066_v24 }
 0x2a7   : > { %1084 = vmatpush.msra.mxu2 %v1065_v15 }
 0x2a8   : > { %921 = vperm.xlu2 %1769, %v916_v57   ;;  %927 = vperm.xlu1 %1770, %v916_v57  }
 0x2a9   : > { %1085 = vmatpush.msra.mxu2 %v1064_v33 }
 0x2ab   : > { %1086 = vmatpush.msra.mxu2 %v1063_v39 }
 0x2ac   : > { %1699 = vmatmul.msk.f32.gmra.mxu3 %vm508_vm0, %v2156_v26  ;;  %v1062_v26 = vld [vmem:[%s2690_s8 + $0x28] sm:$0xff] }
 0x2ad   : > { %1087 = vmatpush.msra.mxu2 %v1062_v26 }
 0x2af   : > { %1088 = vmatpush.msra.mxu2 %v1061_v44 }
 0x2b0   : > { %934 = vperm.xlu2 %1769, %v929_v52   ;;  %940 = vperm.xlu1 %1770, %v929_v52  }
 0x2b4   : > { %1700 = vmatmul.msk.f32.gmra.mxu3 %vm508_vm0, %v2166_v28 }
 0x2b8   : > { %1772 = vset.pattern.permute.xlu2 %v2329_v3  ;;  %1773 = vset.pattern.permute.xlu1 %v2324_v50 }
 0x2bc   : > { %1701 = vmatmul.msk.f32.gmra.mxu3 %vm508_vm0, %v2176_v30 }
 0x2c0   : > { %953 = vperm.xlu2 %1772, %v942_v45   ;;  %960 = vperm.xlu1 %1773, %v955_v43   ;;  %v1060_v45 = vld [vmem:[%s2690_s8 + $0x18] sm:$0xff] }
 0x2c1   : > { %1089 = vmatpush.msra.mxu2 %v1060_v45 }
 0x2c4   : > { %1702 = vmatmul.msk.f32.gmra.mxu3 %vm508_vm0, %v2183_v31 }
 0x2c8   : > { %966 = vperm.xlu2 %1772, %v955_v43   ;;  %v1059_v43 = vld [vmem:[%s2690_s8 + $0x10] sm:$0xff] }
 0x2c9   : > { %1090 = vmatpush.msra.mxu2 %v1059_v43 }
 0x2cb   : > { %1091 = vmatpush.msra.mxu2 %v1058_v20 }
 0x2cc   : > { %1703 = vmatmul.msk.f32.gmra.mxu3 %vm508_vm0, %v2188_v32 }
 0x2da   : > { %v883_v6 = vpop.permute.xlu2 %882 }
 0x2ea   : > { %v889_v10 = vpop.permute.xlu2 %888 }
 0x2eb   : > { %v971_v46 = vmul.f32 %v889_v10, %v2235_v7 }
 0x2f2   : > { %v876_v11 = vpop.permute.xlu1 %875  ;;  %v902_v22 = vpop.permute.xlu2 %901 }
 0x2f3   : > { %v870_v41 = vpop.permute.xlu0 %869  ;;  %v969_v13 = vmul.f32 %v876_v11, %v2219_v54  ;;  %v973_v54 = vmul.f32 %v902_v22, %v2256_v53  ;;  %v970_v11 = vmul.f32 %v883_v6, %v2228_v0 }
 0x2f4   : > { %v968_v28 = vmul.f32 %v870_v41, %v2211_v47 }
 0x2f5   : > { %v991_v30 = vadd.f32 %v971_v46, %v970_v11 }
 0x302   : > { %v896_v12 = vpop.permute.xlu1 %895  ;;  %v922_v34 = vpop.permute.xlu2 %921 }
 0x303   : > { %v915_v17 = vpop.permute.xlu0 %914  ;;  %v972_v18 = vmul.f32 %v896_v12, %v2245_v37  ;;  %v1057_v37 = vld [vmem:[%s2690_s8] sm:$0xff]  ;;  %v984_v12 = vadd.f32 %v969_v13, %v968_v28 }
 0x304   : > { %v975_v24 = vmul.f32 %v915_v17, %v2201_v40  ;;  %1092 = vmatpush.msra.mxu2 %v1057_v37 }
 0x305   : > { %v998_v7 = vadd.f32 %v973_v54, %v972_v18  ;;  %v985_v15 = vrot.slane %v984_v12, 4 }
 0x306   : > { %1113 = vmatpush.msrb.mxu2 %v2343_v56 }
 0x307   : > { %v999_v40 = vrot.slane %v998_v7, 4 }
 0x308   : > { %1114 = vmatpush.msrb.mxu2 %v2349_v59 }
 0x309   : > { %v1000_v26 = vadd.f32 %v999_v40, %v998_v7 }
 0x30a   : > { %v909_v42 = vpop.permute.xlu1 %908  ;;  %v935_v57 = vpop.permute.xlu2 %934  ;;  %1115 = vmatpush.msrb.mxu2 %v2355_v60 }
 0x30b   : > { %v974_v14 = vmul.f32 %v909_v42, %v2195_v35  ;;  %v976_v35 = vmul.f32 %v922_v34, %v2213_v48  ;;  %v978_v33 = vmul.f32 %v935_v57, %v2230_v1  ;;  %v992_v48 = vrot.slane %v991_v30, 4 }
 0x30c   : > { %1116 = vmatpush.msrb.mxu2 %v2361_v61  ;;  %v986_v1 = vadd.f32 %v985_v15, %v984_v12 }
 0x30d   : > { %v1005_v10 = vadd.f32 %v975_v24, %v974_v14 }
 0x30e   : > { %1117 = vmatpush.msrb.mxu2 %v2367_v63  ;;  %v987_v45 = vrot.slane %v986_v1, 2 }
 0x30f   : > { %v1006_v56 = vrot.slane %v1005_v10, 4 }
 0x310   : > { %1118 = vmatpush.msrb.mxu2 %v2373_v2  ;;  %v988_v63 = vadd.f32 %v987_v45, %v986_v1 }
 0x311   : > { %v1007_v44 = vadd.f32 %v1006_v56, %v1005_v10 }
 0x312   : > { %1119 = vmatpush.msrb.mxu2 %v2379_v4  ;;  %v989_v54 = vrot.slane %v988_v63, 1 }
 0x313   : > { %v948_v0 = vpop.permute.xlu0 %947  ;;  %v1008_v43 = vrot.slane %v1007_v44, 2 }
 0x314   : > { %v980_v42 = vmul.f32 %v948_v0, %v2247_v38  ;;  %1120 = vmatpush.msrb.mxu2 %v2385_v5  ;;  %v990_v7 = vadd.f32 %v989_v54, %v988_v63 }
 0x315   : > { %v1009_v20 = vadd.f32 %v1008_v43, %v1007_v44 }
 0x317   : > { %v1010_v24 = vrot.slane %v1009_v20, 1 }
 0x319   : > { %v1011_v15 = vadd.f32 %v1010_v24, %v1009_v20 }
 0x31a   : > { %v928_v52 = vpop.permute.xlu1 %927  ;;  %v954_v53 = vpop.permute.xlu2 %953 }
 0x31b   : > { %v977_v47 = vmul.f32 %v928_v52, %v2221_v55  ;;  %v981_v39 = vmul.f32 %v954_v53, %v2253_v49  ;;  %v993_v49 = vadd.f32 %v992_v48, %v991_v30  ;;  %v1001_v52 = vrot.slane %v1000_v26, 2 }
 0x31d   : > { %v1012_v22 = vadd.f32 %v977_v47, %v976_v35  ;;  %v994_v38 = vrot.slane %v993_v49, 2  ;;  %v1002_v28 = vadd.f32 %v1001_v52, %v1000_v26 }
 0x31f   : > { %v1013_v59 = vrot.slane %v1012_v22, 4  ;;  %v995_v2 = vadd.f32 %v994_v38, %v993_v49  ;;  %v1003_v11 = vrot.slane %v1002_v28, 1 }
 0x321   : > { %v1014_v60 = vadd.f32 %v1013_v59, %v1012_v22  ;;  %v996_v12 = vrot.slane %v995_v2, 1  ;;  %v1004_v53 = vadd.f32 %v1003_v11, %v1002_v28 }
 0x322   : > { %v941_v55 = vpop.permute.xlu1 %940  ;;  %v967_v18 = vpop.permute.xlu2 %966 }
 0x323   : > { %v979_v6 = vmul.f32 %v941_v55, %v2237_v8  ;;  %v1026_v8 = vadd.f32 %v981_v39, %v980_v42  ;;  %v1015_v61 = vrot.slane %v1014_v60, 2  ;;  %v983_v4 = vmul.f32 %v967_v18, %v2268_v9 }
 0x324   : > { %v997_v55 = vadd.f32 %v996_v12, %v995_v2  ;;  %v2531_v2 = vld [vmem:[%s2693_s11] ss:$0 sm:$0xff] }
 0x325   : > { %v1019_v34 = vadd.f32 %v979_v6, %v978_v33  ;;  %v1027_v31 = vrot.slane %v1026_v8, 4  ;;  %v1016_v46 = vadd.f32 %v1015_v61, %v1014_v60 }
 0x326   : > { %v1048_v9 = vsel %vm823_vm2, %v997_v55, %v990_v7 }
 0x327   : > { %v1020_v41 = vrot.slane %v1019_v34, 4  ;;  %v1028_v17 = vadd.f32 %v1027_v31, %v1026_v8  ;;  %v1017_v35 = vrot.slane %v1016_v46, 1 }
 0x329   : > { %v1021_v57 = vadd.f32 %v1020_v41, %v1019_v34  ;;  %v1029_v32 = vrot.slane %v1028_v17, 2  ;;  %v1018_v0 = vadd.f32 %v1017_v35, %v1016_v46 }
 0x32b   : > { %v1022_v13 = vrot.slane %v1021_v57, 2  ;;  %v1030_v22 = vadd.f32 %v1029_v32, %v1028_v17 }
 0x32d   : > { %v1023_v47 = vadd.f32 %v1022_v13, %v1021_v57  ;;  %v1031_v39 = vrot.slane %v1030_v22, 1 }
 0x32f   : > { %v1024_v30 = vrot.slane %v1023_v47, 1  ;;  %v1032_v1 = vadd.f32 %v1031_v39, %v1030_v22 }
 0x331   : > { %v1025_v6 = vadd.f32 %v1024_v30, %v1023_v47 }
 0x332   : > { %v961_v14 = vpop.permute.xlu1 %960 }
 0x333   : > { %v982_v37 = vmul.f32 %v961_v14, %v2263_v62  ;;  %v1049_v62 = vsel %vm825_vm3, %v1004_v53, %v1048_v9 }
 0x334   : > { %v1050_v56 = vsel %vm827_vm4, %v1011_v15, %v1049_v62 }
 0x335   : > { %v1033_v5 = vadd.f32 %v983_v4, %v982_v37  ;;  %v1051_v34 = vsel %vm829_vm5, %v1018_v0, %v1050_v56 }
 0x336   : > { %v1052_v59 = vsel %vm831_vm6, %v1025_v6, %v1051_v34 }
 0x337   : > { %v1034_v10 = vrot.slane %v1033_v5, 4  ;;  %v1053_v26 = vsel %vm833_vm7, %v1032_v1, %v1052_v59 }
 0x339   : > { %v1035_v33 = vadd.f32 %v1034_v10, %v1033_v5 }
 0x33b   : > { %v1036_v40 = vrot.slane %v1035_v33, 2 }
 0x33d   : > { %v1037_v48 = vadd.f32 %v1036_v40, %v1035_v33 }
 0x33f   : > { %v1038_v42 = vrot.slane %v1037_v48, 1 }
 0x341   : > { %v1039_v41 = vadd.f32 %v1038_v42, %v1037_v48 }
 0x343   : > { %v1054_v8 = vsel %vm835_vm8, %v1039_v41, %v1053_v26 }
 0x344   : > { %v1056_v49 = vadd.f32 %v1054_v8, %v2197_v36  ;;  %v2500_v36 = vpop.f32.mrf.mxu3 }
 0x346   : > { %1093 = vmatmul.f32.vlgmr.msra.gmra.mxu2 %v1056_v49 }
 0x34c   : > { %v2502_v44 = vpop.f32.mrf.mxu3 }
 0x34e   : > { %1688 = vmatmul.msk.f32.vlgmr.msrb.gmra.mxu2 %vm508_vm0, %v2123_v19 }
 0x354   : > { %v2504_v19 = vpop.f32.mrf.mxu3 }
 0x356   : > { %1689 = vmatmul.msk.f32.gmra.mxu2 %vm508_vm0, %v2133_v21 }
 0x35c   : > { %v2506_v60 = vpop.f32.mrf.mxu3 }
 0x35e   : > { %1690 = vmatmul.msk.f32.gmra.mxu2 %vm508_vm0, %v2143_v23  ;;  %v1785_v23 = vld [vmem:[%s2691_s9] ss:$0 sm:$0xff] }
 0x364   : > { %v2508_v21 = vpop.f32.mrf.mxu3 }
 0x366   : > { %1691 = vmatmul.msk.f32.gmra.mxu2 %vm508_vm0, %v2153_v25 }
 0x36c   : > { %v2517_v57 = vpop.f32.mrf.mxu3 }
 0x36e   : > { %1692 = vmatmul.msk.f32.gmra.mxu2 %vm508_vm0, %v2163_v27 }
 0x374   : > { %v2526_v18 = vpop.f32.mrf.mxu3 }
 0x376   : > { %1693 = vmatmul.msk.f32.gmra.mxu2 %vm508_vm0, %v2173_v29 }
 0x37c   : > { %v2547_v15 = vpop.f32.mrf.mxu3 }
 0x384   : > { %v2557_v59 = vpop.f32.mrf.mxu3 }
 0x3c9   : > { %v1094_v25 = vpop.f32.mrf.mxu2 }
 0x3ca   : > { %v2513_v45 = vadd.f32 %v1785_v23, %v1094_v25 }
 0x3cc   : > { %v1174_v27 = vrot.slane %v2513_v45, 4  ;;  %v1173_v29 = vrot.slane %v2513_v45, 3  ;;  %v1175_v38 = vrot.slane %v2513_v45, 5  ;;  %v1176_v54 = vrot.slane %v2513_v45, 6 }
 0x3cd   : > { %v1171_v11 = vrot.slane %v2513_v45, 1  ;;  %v1178_v12 = vperm.slane %v2513_v45, 0  ;;  %v1172_v41 = vrot.slane %v2513_v45, 2  ;;  %v1177_v49 = vrot.slane %v2513_v45, 7 }
 0x3ce   : > { %v1182_v52 = vperm.slane %v1174_v27, 0  ;;  %v1181_v31 = vperm.slane %v1173_v29, 0  ;;  %v1183_v28 = vperm.slane %v1175_v38, 0  ;;  %v1184_v5 = vperm.slane %v1176_v54, 0 }
 0x3cf   : > { %v1179_v30 = vperm.slane %v1171_v11, 0  ;;  %v1180_v8 = vperm.slane %v1172_v41, 0 }
 0x3d0   : > { %v1202_v61 = vadd.f32 %v1182_v52, %v2504_v19  ;;  %v1201_v63 = vadd.f32 %v1181_v31, %v2502_v44  ;;  %v1200_v13 = vadd.f32 %v1181_v31, %v2500_v36  ;;  %v1205_v17 = vadd.f32 %v1183_v28, %v2517_v57  ;;  %v2567_v31 = vpop.f32.mrf.mxu3 }
 0x3d1   : > { %v2520_v43 = vpop.f32.mrf.mxu2  ;;  %v1204_v20 = vadd.f32 %v1183_v28, %v2508_v21  ;;  %v1203_v14 = vadd.f32 %v1182_v52, %v2506_v60  ;;  %v1206_v22 = vadd.f32 %v1184_v5, %v2526_v18  ;;  %v1185_v52 = vperm.slane %v1177_v49, 0 }
 0x3d2   : > { %1823 = vtanh.f32 %v1202_v61  ;;  %v1194_v39 = vadd.f32 %v1178_v12, %v2520_v43  ;;  %v1207_v61 = vadd.f32 %v1184_v5, %v2547_v15 }
 0x3d3   : > { %1825 = vtanh.f32 %v1201_v63  ;;  %v1209_v63 = vadd.f32 %v1185_v52, %v2567_v31  ;;  %v1208_v54 = vadd.f32 %v1185_v52, %v2557_v59 }
 0x3d4   : > { %1827 = vtanh.f32 %v1200_v13 }
 0x3d5   : > { %1829 = vtanh.f32 %v1205_v17 }
 0x3d6   : > { %1831 = vtanh.f32 %v1204_v20 }
 0x3d7   : > { %1833 = vtanh.f32 %v1203_v14 }
 0x3d8   : > { %v1824_v4 = vpop.eup %1823 }
 0x3d9   : > { %v2534_v46 = vpop.f32.mrf.mxu2  ;;  %v1826_v47 = vpop.eup %1825  ;;  %v1238_v37 = vmul.f32 %v1824_v4, %v2531_v2 }
 0x3da   : > { %v1828_v32 = vpop.eup %1827  ;;  %v1237_v24 = vmul.f32 %v1826_v47, %v2531_v2  ;;  %v1195_v7 = vadd.f32 %v1178_v12, %v2534_v46 }
 0x3db   : > { %1262 = vadd.xlane.f32.xlu0 %v1238_v37  ;;  %v1236_v35 = vmul.f32 %v1828_v32, %v2531_v2  ;;  %v1830_v10 = vpop.eup %1829 }
 0x3dc   : > { %1260 = vadd.xlane.f32.xlu2 %v1237_v24  ;;  %v1832_v55 = vpop.eup %1831  ;;  %1835 = vtanh.f32 %v1195_v7  ;;  %v1241_v9 = vmul.f32 %v1830_v10, %v2531_v2 }
 0x3dd   : > { %1258 = vadd.xlane.f32.xlu1 %v1236_v35  ;;  %v1834_v0 = vpop.eup %1833  ;;  %v1240_v6 = vmul.f32 %v1832_v55, %v2531_v2 }
 0x3de   : > { %v1239_v40 = vmul.f32 %v1834_v0, %v2531_v2 }
 0x3e1   : > { %v2544_v53 = vpop.f32.mrf.mxu2 }
 0x3e2   : > { %v1196_v33 = vadd.f32 %v1179_v30, %v2544_v53  ;;  %v1836_v62 = vpop.eup %1835 }
 0x3e3   : > { %1268 = vadd.xlane.f32.xlu0 %v1241_v9  ;;  %v1231_v1 = vmul.f32 %v1836_v62, %v2531_v2 }
 0x3e4   : > { %1837 = vtanh.f32 %v1196_v33  ;;  %1266 = vadd.xlane.f32.xlu2 %v1240_v6 }
 0x3e5   : > { %1839 = vtanh.f32 %v1206_v22  ;;  %1264 = vadd.xlane.f32.xlu1 %v1239_v40 }
 0x3e6   : > { %1841 = vtanh.f32 %v1194_v39  ;;  %v1279_v39 = vstv %s1278_s28  ;;  %s1879_s28 = scalar_lea.hbm %s2695_s13, 16 }
 0x3e7   : > { %p1881_p2 = scmp.lt.s32.totalorder %s1879_s28, %s1875_s21 }
 0x3e9   : > { %v2554_v48 = vpop.f32.mrf.mxu2  ;;  %p1882_p3 = por %p1881_p2, %p1880_p1 }
 0x3ea   : > { %v1838_v56 = vpop.eup %1837  ;;  %v1197_v23 = vadd.f32 %v1179_v30, %v2554_v48 }
 0x3eb   : > { %v1840_v34 = vpop.eup %1839  ;;  %v1232_v42 = vmul.f32 %v1838_v56, %v2531_v2  ;;  %1248 = vadd.xlane.f32.xlu0 %v1231_v1  ;;  %p1883_p4 = pnand %p1882_p3, %p1878_p0 }
 0x3ec   : > { %v1242_v26 = vmul.f32 %v1840_v34, %v2531_v2  ;;  %v1842_v29 = vpop.eup %1841 }
 0x3ed   : > { %1250 = vadd.xlane.f32.xlu2 %v1232_v42  ;;  %v1230_v38 = vmul.f32 %v1842_v29, %v2531_v2 }
 0x3ee   : > { %1270 = vadd.xlane.f32.xlu1 %v1242_v26 }
 0x3f1   : > { %v2564_v25 = vpop.f32.mrf.mxu2 }
 0x3f2   : > { %v1198_v27 = vadd.f32 %v1180_v8, %v2564_v25 }
 0x3f4   : > { %1843 = vtanh.f32 %v1198_v27 }
 0x3f5   : > { %1845 = vtanh.f32 %v1197_v23 }
 0x3f6   : > { %1246 = vadd.xlane.f32.xlu1 %v1230_v38  ;;  %1847 = vtanh.f32 %v1207_v61 }
 0x3f9   : > { %v2572_v13 = vpop.f32.mrf.mxu2 }
 0x3fa   : > { %v1844_v28 = vpop.eup %1843  ;;  %v1199_v17 = vadd.f32 %v1180_v8, %v2572_v13 }
 0x3fb   : > { %v1846_v20 = vpop.eup %1845  ;;  %v1234_v14 = vmul.f32 %v1844_v28, %v2531_v2 }
 0x3fc   : > { %1849 = vtanh.f32 %v1199_v17  ;;  %v1233_v4 = vmul.f32 %v1846_v20, %v2531_v2  ;;  %v1848_v47 = vpop.eup %1847 }
 0x3fd   : > { %1851 = vtanh.f32 %v1209_v63  ;;  %1254 = vadd.xlane.f32.xlu2 %v1234_v14  ;;  %v1243_v12 = vmul.f32 %v1848_v47, %v2531_v2 }
 0x3fe   : > { %1252 = vadd.xlane.f32.xlu1 %v1233_v4  ;;  %1853 = vtanh.f32 %v1208_v54 }
 0x402   : > { %v1850_v37 = vpop.eup %1849 }
 0x403   : > { %v1852_v11 = vpop.eup %1851  ;;  %v1235_v32 = vmul.f32 %v1850_v37, %v2531_v2 }
 0x404   : > { %v1245_v24 = vmul.f32 %v1852_v11, %v2531_v2  ;;  %v1854_v5 = vpop.eup %1853 }
 0x405   : > { %1256 = vadd.xlane.f32.xlu0 %v1235_v32  ;;  %1272 = vadd.xlane.f32.xlu2 %v1243_v12  ;;  %v1244_v35 = vmul.f32 %v1854_v5, %v2531_v2 }
 0x406   : > { %1276 = vadd.xlane.f32.xlu1 %v1245_v24 }
 0x40d   : > { %1274 = vadd.xlane.f32.xlu0 %v1244_v35 }
 0x44e   : > { %v1263_v22 = vpop.xlane.xlu0 %1262 }
 0x44f   : > { %v1261_v30 = vpop.xlane.xlu2 %1260  ;;  %v1288_v27 = vadd.f32 %v1279_v39, %v1263_v22 }
 0x450   : > { %v1259_v7 = vpop.xlane.xlu1 %1258  ;;  %v1287_v41 = vadd.f32 %v1279_v39, %v1261_v30 }
 0x451   : > { %v1286_v2 = vadd.f32 %v1279_v39, %v1259_v7  ;;  %v1324_v32 = vperm.slane %v1288_v27, %v2275_v51 }
 0x452   : > { %v1322_v20 = vperm.slane %v1287_v41, %v2278_v58 }
 0x453   : > { %v1321_v14 = vperm.slane %v1286_v2, %v2275_v51 }
 0x455   : > { %v1323_v22 = vsel %vm800_vm1, %v1322_v20, %v1321_v14 }
 0x456   : > { %v1269_v0 = vpop.xlane.xlu0 %1268 }
 0x457   : > { %v1267_v55 = vpop.xlane.xlu2 %1266  ;;  %v1291_v61 = vadd.f32 %v1279_v39, %v1269_v0 }
 0x458   : > { %v1265_v10 = vpop.xlane.xlu1 %1264  ;;  %v1290_v63 = vadd.f32 %v1279_v39, %v1267_v55 }
 0x459   : > { %v1289_v49 = vadd.f32 %v1279_v39, %v1265_v10  ;;  %v1328_v35 = vperm.slane %v1291_v61, %v2278_v58 }
 0x45a   : > { %v1327_v7 = vperm.slane %v1290_v63, %v2275_v51 }
 0x45b   : > { %v1325_v47 = vperm.slane %v1289_v49, %v2278_v58 }
 0x45e   : > { %v1249_v40 = vpop.xlane.xlu0 %1248 }
 0x45f   : > { %v1281_v26 = vadd.f32 %v1279_v39, %v1249_v40 }
 0x460   : > { %v1251_v9 = vpop.xlane.xlu2 %1250 }
 0x461   : > { %v1271_v33 = vpop.xlane.xlu1 %1270  ;;  %v1282_v34 = vadd.f32 %v1279_v39, %v1251_v9  ;;  %v1313_v54 = vperm.slane %v1281_v26, %v2278_v58  ;;  %v1326_v9 = vsel %vm800_vm1, %v1325_v47, %v1324_v32 }
 0x462   : > { %v1292_v55 = vadd.f32 %v1279_v39, %v1271_v33 }
 0x463   : > { %v1315_v29 = vperm.slane %v1282_v34, %v2275_v51 }
 0x464   : > { %v1330_v41 = vperm.slane %v1292_v55, %v2275_v51 }
 0x469   : > { %v1247_v6 = vpop.xlane.xlu1 %1246 }
 0x46a   : > { %v1280_v42 = vadd.f32 %v1279_v39, %v1247_v6 }
 0x46c   : > { %v1312_v52 = vperm.slane %v1280_v42, %v2275_v51  ;;  %v1329_v42 = vsel %vm800_vm1, %v1328_v35, %v1327_v7 }
 0x46e   : > { %v1314_v12 = vsel %vm800_vm1, %v1313_v54, %v1312_v52 }
 0x470   : > { %v1255_v62 = vpop.xlane.xlu2 %1254 }
 0x471   : > { %v1253_v56 = vpop.xlane.xlu1 %1252  ;;  %v1284_v23 = vadd.f32 %v1279_v39, %v1255_v62 }
 0x472   : > { %v1283_v1 = vadd.f32 %v1279_v39, %v1253_v56 }
 0x473   : > { %v1318_v37 = vperm.slane %v1284_v23, %v2275_v51 }
 0x474   : > { %v1316_v8 = vperm.slane %v1283_v1, %v2278_v58 }
 0x476   : > { %v1317_v4 = vsel %vm800_vm1, %v1316_v8, %v1315_v29 }
 0x477   : > { %v1336_v30 = vsel %vm823_vm2, %v1317_v4, %v1314_v12 }
 0x478   : > { %v1257_v38 = vpop.xlane.xlu0 %1256  ;;  %v1273_v17 = vpop.xlane.xlu2 %1272 }
 0x479   : > { %v1285_v28 = vadd.f32 %v1279_v39, %v1257_v38  ;;  %v1277_v24 = vpop.xlane.xlu1 %1276  ;;  %v1293_v5 = vadd.f32 %v1279_v39, %v1273_v17 }
 0x47a   : > { %v1295_v6 = vadd.f32 %v1279_v39, %v1277_v24 }
 0x47b   : > { %v1319_v11 = vperm.slane %v1285_v28, %v2278_v58  ;;  %v1331_v62 = vperm.slane %v1293_v5, %v2278_v58 }
 0x47c   : > { %v1334_v33 = vperm.slane %v1295_v6, %v2278_v58 }
 0x47d   : > { %v1320_v10 = vsel %vm800_vm1, %v1319_v11, %v1318_v37  ;;  %v1332_v8 = vsel %vm800_vm1, %v1331_v62, %v1330_v41 }
 0x47e   : > { %v1337_v0 = vsel %vm825_vm3, %v1320_v10, %v1336_v30 }
 0x47f   : > { %v1338_v40 = vsel %vm827_vm4, %v1323_v22, %v1337_v0 }
 0x480   : > { %v1275_v56 = vpop.xlane.xlu0 %1274  ;;  %v1339_v34 = vsel %vm829_vm5, %v1326_v9, %v1338_v40 }
 0x481   : > { %v1294_v1 = vadd.f32 %v1279_v39, %v1275_v56  ;;  %v1340_v2 = vsel %vm831_vm6, %v1329_v42, %v1339_v34 }
 0x482   : > { %v1341_v23 = vsel %vm833_vm7, %v1332_v8, %v1340_v2 }
 0x483   : > { %v1333_v26 = vperm.slane %v1294_v1, %v2275_v51 }
 0x485   : > { %v1335_v49 = vsel %vm800_vm1, %v1334_v33, %v1333_v26 }
 0x486   : > { %v1342_v27 = vsel %vm835_vm8, %v1335_v49, %v1341_v23 }
 0x487   : > { %v1344_v29 = vsel %vm494_vm9, -inf, %v1342_v27 }
 0x488   : > { %v1345_v39 = vsel %vm839_vm10, %v1344_v29, -inf }
 0x489   : > { %1346 = vmax.xlane.f32.xlu2 %v1345_v39 }
 0x4fc   : > { %v1347_v52 = vpop.xlane.xlu2 %1346 }
 0x4fd   : > { %v1348_v38 = vsub.f32 %v1344_v29, %v1347_v52 }
 0x4ff   : > { %v1349_v61 = vmul.f32 1.442695, %v1348_v38 }
 0x501   : > { %1855 = vpow2.f32 %v1349_v61 }
 0x507   : > { %v1856_v58 = vpop.eup %1855 }
 0x508   : > { %v1351_v51 = vsel %vm839_vm10, %v1856_v58, 0.0 }
 0x509   : > { %1352 = vadd.xlane.f32.xlu0 %v1351_v51 }
 0x57c   : > { %v1353_v63 = vpop.xlane.xlu0 %1352 }
 0x57d   : > { %1857 = vrcp.f32 %v1353_v63  ;;  %v1365_v14 = vand.u32 2147483648, %v1353_v63  ;;  %v1363_v16 = vand.u32 2147483647, %v1353_v63  ;;  %vm1359_vm0 = vweird.f32 %v1353_v63 }
 0x57f   : > { %v1366_v47 = vor.u32 1.1754944e-38, %v1365_v14  ;;  %vm1364_vm9 = vcmp.eq.f32.partialorder %v1363_v16, 8.507059e+37 }
 0x583   : > { %v1858_v28 = vpop.eup %1857 }
 0x584   : > { %v1355_v17 = vmul.f32 %v1858_v28, %v1353_v63  ;;  %vm1360_vm15 = vweird.f32 %v1858_v28 }
 0x585   : > { %vm1361_vm1 = vmor %vm1359_vm0, %vm1360_vm15 }
 0x586   : > { %v1356_v20 = vsub.f32 1.0, %v1355_v17 }
 0x588   : > { %v1357_v54 = vmul.f32 %v1858_v28, %v1356_v20 }
 0x58a   : > { %v1358_v4 = vadd.f32 %v1858_v28, %v1357_v54 }
 0x58c   : > { %v1362_v37 = vsel %vm1361_vm1, %v1858_v28, %v1358_v4 }
 0x58d   : > { %v1367_v11 = vsel %vm1364_vm9, %v1366_v47, %v1362_v37 }
 0x58e   : > { %v1368_v32 = vmul.f32 %v1856_v58, %v1367_v11 }
 0x590   : > { %v1382_v12 = vperm.slane %v1368_v32, 1  ;;  %v1369_v24 = vperm.slane %v1368_v32, 0  ;;  %v1395_v5 = vperm.slane %v1368_v32, 2  ;;  %v1408_v35 = vperm.slane %v1368_v32, 3 }
 0x591   : > { %v1421_v7 = vperm.slane %v1368_v32, 4  ;;  %v1434_v30 = vperm.slane %v1368_v32, 5  ;;  %v1447_v10 = vperm.slane %v1368_v32, 6  ;;  %v1460_v22 = vperm.slane %v1368_v32, 7 }
 0x592   : > { %1387 = vperm.xlu0 %1771, %v1382_v12   ;;  %1380 = vperm.xlu2 %1772, %v1369_v24  }
 0x593   : > { %1374 = vperm.xlu1 %1773, %v1369_v24  }
 0x59a   : > { %1400 = vperm.xlu0 %1771, %v1395_v5   ;;  %1406 = vperm.xlu2 %1772, %v1395_v5  }
 0x59b   : > { %1774 = vset.pattern.permute.xlu1 %v2329_v3 }
 0x5a2   : > { %1776 = vset.pattern.permute.xlu0 %v2329_v3  ;;  %1777 = vset.pattern.permute.xlu2 %v2324_v50 }
 0x5a3   : > { %1393 = vperm.xlu1 %1774, %v1382_v12  }
 0x5aa   : > { %1419 = vperm.xlu0 %1776, %v1408_v35   ;;  %1426 = vperm.xlu2 %1777, %v1421_v7  }
 0x5ab   : > { %1775 = vset.pattern.permute.xlu1 %v2324_v50 }
 0x5b2   : > { %1779 = vset.pattern.permute.xlu0 %v2324_v50  ;;  %1439 = vperm.xlu2 %1777, %v1434_v30  }
 0x5b3   : > { %1413 = vperm.xlu1 %1775, %v1408_v35  }
 0x5ba   : > { %1452 = vperm.xlu0 %1779, %v1447_v10   ;;  %1780 = vset.pattern.permute.xlu2 %v2329_v3 }
 0x5bb   : > { %1778 = vset.pattern.permute.xlu1 %v2329_v3 }
 0x5c2   : > { %1458 = vperm.xlu2 %1780, %v1447_v10   ;;  %1782 = vset.pattern.permute.xlu0 %v2329_v3 }
 0x5c3   : > { %1432 = vperm.xlu1 %1778, %v1421_v7  }
 0x5ca   : > { %1471 = vperm.xlu2 %1780, %v1460_v22  }
 0x5cb   : > { %1445 = vperm.xlu1 %1778, %v1434_v30  }
 0x5d3   : > { %1781 = vset.pattern.permute.xlu1 %v2324_v50 }
 0x5db   : > { %1465 = vperm.xlu1 %1781, %v1460_v22  }
 0x5ec   : > { %v1381_v55 = vpop.permute.xlu2 %1380 }
 0x5ed   : > { %v1474_v50 = vmul.f32 %v1381_v55, %v2534_v46 }
 0x5f4   : > { %v1407_v6 = vpop.permute.xlu2 %1406 }
 0x604   : > { %v1388_v9 = vpop.permute.xlu0 %1387  ;;  %v1427_v62 = vpop.permute.xlu2 %1426 }
 0x605   : > { %v1375_v0 = vpop.permute.xlu1 %1374  ;;  %v1475_v3 = vmul.f32 %v1388_v9, %v2544_v53  ;;  %v1481_v39 = vmul.f32 %v1427_v62, %v2504_v19 }
 0x606   : > { %v1473_v2 = vmul.f32 %v1375_v0, %v2520_v43 }
 0x608   : > { %v1489_v27 = vadd.f32 %v1474_v50, %v1473_v2 }
 0x60a   : > { %v1490_v58 = vrot.slane %v1489_v27, 4 }
 0x60c   : > { %v1401_v56 = vpop.permute.xlu0 %1400  ;;  %v1440_v33 = vpop.permute.xlu2 %1439  ;;  %v1491_v20 = vadd.f32 %v1490_v58, %v1489_v27 }
 0x60d   : > { %v1477_v49 = vmul.f32 %v1401_v56, %v2564_v25 }
 0x615   : > { %v1394_v40 = vpop.permute.xlu1 %1393 }
 0x616   : > { %v1476_v42 = vmul.f32 %v1394_v40, %v2554_v48  ;;  %v1478_v48 = vmul.f32 %v1407_v6, %v2572_v13 }
 0x618   : > { %v1496_v26 = vadd.f32 %v1476_v42, %v1475_v3  ;;  %v1503_v38 = vadd.f32 %v1478_v48, %v1477_v49 }
 0x61a   : > { %v1497_v53 = vrot.slane %v1496_v26, 4  ;;  %v1504_v13 = vrot.slane %v1503_v38, 4 }
 0x61c   : > { %v1420_v1 = vpop.permute.xlu0 %1419  ;;  %v1459_v51 = vpop.permute.xlu2 %1458  ;;  %v1498_v63 = vadd.f32 %v1497_v53, %v1496_v26  ;;  %v1505_v47 = vadd.f32 %v1504_v13, %v1503_v38 }
 0x61d   : > { %v1480_v29 = vmul.f32 %v1420_v1, %v2502_v44  ;;  %v1486_v19 = vmul.f32 %v1459_v51, %v2547_v15 }
 0x61e   : > { %v1499_v16 = vrot.slane %v1498_v63, 2 }
 0x624   : > { %v1472_v7 = vpop.permute.xlu2 %1471 }
 0x625   : > { %v1414_v34 = vpop.permute.xlu1 %1413  ;;  %v1488_v6 = vmul.f32 %v1472_v7, %v2567_v31 }
 0x626   : > { %v1479_v8 = vmul.f32 %v1414_v34, %v2500_v36  ;;  %v1483_v36 = vmul.f32 %v1440_v33, %v2508_v21  ;;  %v1492_v21 = vrot.slane %v1491_v20, 2 }
 0x628   : > { %v1510_v52 = vadd.f32 %v1480_v29, %v1479_v8  ;;  %v1493_v5 = vadd.f32 %v1492_v21, %v1491_v20 }
 0x62a   : > { %v1511_v44 = vrot.slane %v1510_v52, 4  ;;  %v1494_v9 = vrot.slane %v1493_v5, 1 }
 0x62c   : > { %v1453_v43 = vpop.permute.xlu0 %1452  ;;  %v1512_v4 = vadd.f32 %v1511_v44, %v1510_v52  ;;  %v1495_v2 = vadd.f32 %v1494_v9, %v1493_v5 }
 0x62e   : > { %v1513_v12 = vrot.slane %v1512_v4, 2 }
 0x630   : > { %v1514_v10 = vadd.f32 %v1513_v12, %v1512_v4 }
 0x632   : > { %v1515_v42 = vrot.slane %v1514_v10, 1 }
 0x634   : > { %v1516_v49 = vadd.f32 %v1515_v42, %v1514_v10 }
 0x635   : > { %v1433_v41 = vpop.permute.xlu1 %1432 }
 0x636   : > { %v1482_v23 = vmul.f32 %v1433_v41, %v2506_v60  ;;  %v1485_v60 = vmul.f32 %v1453_v43, %v2526_v18  ;;  %v1506_v18 = vrot.slane %v1505_v47, 2 }
 0x638   : > { %v1517_v61 = vadd.f32 %v1482_v23, %v1481_v39  ;;  %v1531_v54 = vadd.f32 %v1486_v19, %v1485_v60  ;;  %v1507_v22 = vadd.f32 %v1506_v18, %v1505_v47 }
 0x63a   : > { %v1518_v17 = vrot.slane %v1517_v61, 4  ;;  %v1532_v32 = vrot.slane %v1531_v54, 4  ;;  %v1508_v41 = vrot.slane %v1507_v22, 1 }
 0x63c   : > { %v1519_v37 = vadd.f32 %v1518_v17, %v1517_v61  ;;  %v1533_v30 = vadd.f32 %v1532_v32, %v1531_v54  ;;  %v1509_v31 = vadd.f32 %v1508_v41, %v1507_v22 }
 0x63d   : > { %v1446_v46 = vpop.permute.xlu1 %1445 }
 0x63e   : > { %v1484_v25 = vmul.f32 %v1446_v46, %v2517_v57  ;;  %v1500_v57 = vadd.f32 %v1499_v16, %v1498_v63  ;;  %v1520_v24 = vrot.slane %v1519_v37, 2  ;;  %v1534_v56 = vrot.slane %v1533_v30, 2 }
 0x640   : > { %v1524_v28 = vadd.f32 %v1484_v25, %v1483_v36  ;;  %v1501_v15 = vrot.slane %v1500_v57, 1  ;;  %v1521_v55 = vadd.f32 %v1520_v24, %v1519_v37  ;;  %v1535_v26 = vadd.f32 %v1534_v56, %v1533_v30 }
 0x642   : > { %v1525_v14 = vrot.slane %v1524_v28, 4  ;;  %v1502_v34 = vadd.f32 %v1501_v15, %v1500_v57  ;;  %v1522_v3 = vrot.slane %v1521_v55, 1  ;;  %v1536_v39 = vrot.slane %v1535_v26, 1 }
 0x644   : > { %v1526_v11 = vadd.f32 %v1525_v14, %v1524_v28  ;;  %v1553_v8 = vsel %vm823_vm2, %v1502_v34, %v1495_v2  ;;  %v1523_v27 = vadd.f32 %v1522_v3, %v1521_v55  ;;  %v1537_v46 = vadd.f32 %v1536_v39, %v1535_v26 }
 0x645   : > { %v1554_v48 = vsel %vm825_vm3, %v1509_v31, %v1553_v8 }
 0x646   : > { %v1527_v35 = vrot.slane %v1526_v11, 2  ;;  %v1555_v53 = vsel %vm827_vm4, %v1516_v49, %v1554_v48 }
 0x647   : > { %v1556_v43 = vsel %vm829_vm5, %v1523_v27, %v1555_v53 }
 0x648   : > { %v1528_v40 = vadd.f32 %v1527_v35, %v1526_v11 }
 0x64a   : > { %v1529_v33 = vrot.slane %v1528_v40, 1 }
 0x64c   : > { %v1530_v29 = vadd.f32 %v1529_v33, %v1528_v40 }
 0x64d   : > { %v1466_v0 = vpop.permute.xlu1 %1465 }
 0x64e   : > { %v1487_v62 = vmul.f32 %v1466_v0, %v2557_v59  ;;  %v1557_v61 = vsel %vm831_vm6, %v1530_v29, %v1556_v43 }
 0x64f   : > { %v1558_v36 = vsel %vm833_vm7, %v1537_v46, %v1557_v61 }
 0x650   : > { %v1538_v1 = vadd.f32 %v1488_v6, %v1487_v62 }
 0x652   : > { %v1539_v50 = vrot.slane %v1538_v1, 4 }
 0x654   : > { %v1540_v23 = vadd.f32 %v1539_v50, %v1538_v1 }
 0x656   : > { %v1541_v59 = vrot.slane %v1540_v23, 2 }
 0x658   : > { %v1542_v52 = vadd.f32 %v1541_v59, %v1540_v23 }
 0x65a   : > { %v1543_v38 = vrot.slane %v1542_v52, 1 }
 0x65c   : > { %v1544_v58 = vadd.f32 %v1543_v38, %v1542_v52 }
 0x65e   : > { %v1559_v51 = vsel %vm835_vm8, %v1544_v58, %v1558_v36 }
 0x65f   : > { %v1561_v25 = vadd.f32 %v1559_v51, %v2513_v45 }
 0x661   : > { %1562 = vst [vmem:[%s462_s18] sm:$0xff] %v1561_v25 }
 0x662   : > { %1886 = shalt.err (!%p1883_p4)
}
 0x663   : > { %1724 = dma.vmem_to_hbm [thread:$0]  (%p2037_p5), %s1577_s7, 128, %s1579_s22, %s1564_s23  }
 0x664 PF: > { %p1730_p7 = scmp.ge.s32.totalorder %s1921_s15, 2  ;;  %s1590_s19 = sand.u32 1, %s1909_s29  }
 0x665   : > { %s1591_s25 = scalar_lea.sflag [#allocation5], %s1590_s19 }
 0x666   : > { %p1727_p8 = pnand %p1730_p7, %p2041_p6 }
 0x668   : > { %p1728_p9 = pneg %p1727_p8 }
 0x66a   : > { %1904 = dma.done.wait (%p1728_p9), %s1591_s25, 128  }
 0x66b   : > { %1906 = vsyncadd (%p1728_p9), %s1591_s25, 4294967168  ;;  %s2707_s15 = sld [smem:[#allocation8_spill]]  ;;  %s2710_s29 = smov %s1913_s30 }
 0x66c   : > { %s2708_s17 = sld [smem:[#allocation7_spill]] }
 0x66d   : > { %s2709_s14 = sld [smem:[#allocation9_spill]] }
 0x671   : > { %p25_p10 = scmp.ge.s32.totalorder %s2707_s15, 4  }
 0x672   : > { %s2711_s30 = smov %s2708_s17 }
 0x673   :  { %27 = sbr.rel (!%p25_p10) target bundleno = 6 (0x6), region = 113 }
 0x678   :  { %1597 = vsyncpa [#allocation5], 1 }
 0x679   :  { %1599 = vsyncpa [#allocation5 + $0x1], 1 }

// kernel: tpu_custom_call.1
= control target key start
LH: loop header
LB: loop body
LE: loop exit
PB: predicated region body
PF: predicated region fallthrough
CT: control target
= control target key end

     0   :  { %s2682_s0 = inlined_call_operand.vmem [shape: f32[256,64], index: 0, kind: input, shape index: {}]   ;;  %s2683_s1 = inlined_call_operand.vmem [shape: f32[16,64], index: 1, kind: input, shape index: {}]   ;;  %s2684_s2 = inlined_call_operand.vmem [shape: f32[16,16], index: 2, kind: input, shape index: {}]   ;;  %s2685_s3 = inlined_call_operand.vmem [shape: f32[64,128], index: 3, kind: input, shape index: {}]   ;;  %s2686_s4 = inlined_call_operand.vmem [shape: f32[1,128], index: 4, kind: input, shape index: {}]   ;;  %s2687_s5 = inlined_call_operand.vmem [shape: f32[64,128], index: 5, kind: input, shape index: {}]   ;;  %s2688_s6 = inlined_call_operand.vmem [shape: f32[1,128], index: 6, kind: input, shape index: {}]   ;;  %s2689_s7 = inlined_call_operand.<no memory space> [shape: f32[1], index: 7, kind: input, shape index: {}]   ;;  %s2690_s8 = inlined_call_operand.vmem [shape: f32[128,128], index: 8, kind: input, shape index: {}]   ;;  %s2691_s9 = inlined_call_operand.vmem [shape: f32[1,128], index: 9, kind: input, shape index: {}]   ;;  %s2692_s10 = inlined_call_operand.vmem [shape: f32[64,128], index: 10, kind: input, shape index: {}]   ;;  %s2693_s11 = inlined_call_operand.vmem [shape: f32[1,128], index: 11, kind: input, shape index: {}]   ;;  %s2694_s12 = inlined_call_operand.<no memory space> [shape: f32[1], index: 12, kind: input, shape index: {}]   ;;  %s2695_s13 = inlined_call_operand.hbm [shape: f32[16,128], index: 13, kind: output, shape index: {}]  }
   0x1   :  { %18 = sst [smem:[#allocation2]] %s2689_s7 }
   0x2   :  { %19 = sst [smem:[#allocation3]] %s2694_s12 }
   0x3   :  { %20 = vsyncpa [#allocation5], 0 }
   0x4   :  { %22 = vsyncpa [#allocation5 + $0x1], 0  ;;  %s1999_s29 = smov 0   ;;  %s2001_s30 = smov 0  }
   0x5   :  { %s2003_s14 = smov 0   ;;  %s2005_s15 = smov 0  }
   0x6 LB: > { %2700 = sst [smem:[#allocation7_spill]] %s1917_s14  ;;  %s2020_s7 = sadd.s32 4294967295, %s1921_s15   ;;  %s1921_s15 = sphi %s2005_s15, %s2707_s15   ;;  %s1917_s14 = sphi %s2003_s14, %s2709_s14   ;;  %s1913_s30 = sphi %s2001_s30, %s2711_s30   ;;  %s1909_s29 = sphi %s1999_s29, %s2710_s29  }
   0x7   : > { %s1662_s12 = sadd.s32 4294967294, %s1921_s15   ;;  %s2024_s16 = sadd.s32 1, %s1921_s15  }
   0x8   : > { %2701 = sst [smem:[#allocation8_spill]] %s2024_s16  ;;  %s323_s17 = sadd.s32 1, %s1917_s14 }
   0x9   : > { %s320_s18 = ssub.s32 %s1921_s15, %s2024_s16  ;;  %p333_p0 = scmp.ne.s32.totalorder %s1917_s14, %s1913_s30 }
   0xa   : > { %p321_p1 = scmp.eq.s32.totalorder %s320_s18, 0  ;;  %p334_p2 = scmp.eq.s32.totalorder %s2020_s7, 1 }
   0xb   : > { %p339_p3 = scmp.ne.s32.totalorder %s1913_s30, %s1909_s29  ;;  %p340_p4 = scmp.eq.s32.totalorder %s1662_s12, 1 }
   0xc   : > { %s2035_s19 = scalar_select %p321_p1, %s1917_s14, %s323_s17  }
   0xd   : > { %p2037_p5 = por %p334_p2, %p333_p0  ;;  %p2041_p6 = por %p340_p4, %p339_p3 }
   0xe   : > { %2702 = sst [smem:[#allocation9_spill]] %s2035_s19  ;;  %p1665_p7 = scmp.ge.s32.totalorder %s1921_s15, 1 }
   0xf   : > { %s2704_s21 = scalar_select %p2041_p6, 1, 0 }
  0x10   : > { %p411_p8 = scmp.lt.s32.totalorder %s1921_s15, 3 }
  0x11   : > { %2705 = sst [smem:[#allocation10_spill]] %s2704_s21 }
  0x12   : > { %p412_p9 = pnand %p1665_p7, %p411_p8 }
  0x13   : > { %p469_p10 = scmp.lt.s32.totalorder (!%p412_p9), %s2020_s7, 1  ;;  %s1667_s28 = sshll.u32 (!%p412_p9), %s2020_s7, 4 }
  0x14   : > { %415 = sbr.rel (%p412_p9) target bundleno = 1636 (0x664), region = 72  ;;  %p464_p11 = scmp.lt.s32.totalorder (!%p412_p9), %s1667_s28, 31 }
  0x19   : > { %v503_v0 = vld [vmem:[%s2685_s3 + $0x38] sm:$0xff]  ;;  %v502_v2 = vld [vmem:[%s2685_s3 + $0x30] sm:$0xff]  ;;  %v501_v4 = vld [vmem:[%s2685_s3 + $0x28] sm:$0xff]  ;;  %s2068_s25 = scalar_select %p469_p10, %s2020_s7, 1  ;;  %vm508_vm0 = vcmask 523264   ;;  %vm800_vm1 = vcmask 130112  }
  0x1a   : > { %v539_v1 = vld [vmem:[%s2687_s5 + $0x38] sm:$0xff]  ;;  %520 = vmatpush.msra.mxu0 %v503_v0  ;;  %v538_v3 = vld [vmem:[%s2687_s5 + $0x30] sm:$0xff]  ;;  %v537_v5 = vld [vmem:[%s2687_s5 + $0x28] sm:$0xff]  ;;  %s2713_s28 = smov (!%p464_p11, %s1667_s28), 31  ;;  %vm823_vm2 = vcmask 1041409   ;;  %vm825_vm3 = vcmask 1042434  }
  0x1b   : > { %1708 = vmatpush.msra.mxu1 %v539_v1  ;;  %v500_v6 = vld [vmem:[%s2685_s3 + $0x20] sm:$0xff]  ;;  %v499_v8 = vld [vmem:[%s2685_s3 + $0x18] sm:$0xff]  ;;  %s1669_s19 = sshll.u32 %s2068_s25, 3  ;;  %s1668_s26 = sshll.u32 %s2713_s28, 3  ;;  %v498_v10 = vld [vmem:[%s2685_s3 + $0x10] sm:$0xff]  ;;  %vm827_vm4 = vcmask 1043459  }
  0x1c   : > { %521 = vmatpush.msra.mxu0 %v502_v2  ;;  %v536_v7 = vld [vmem:[%s2687_s5 + $0x20] sm:$0xff]  ;;  %v535_v9 = vld [vmem:[%s2687_s5 + $0x18] sm:$0xff]  ;;  %v534_v11 = vld [vmem:[%s2687_s5 + $0x10] sm:$0xff]  ;;  %s472_s14 = scalar_lea.vmem %s2683_s1, %s1669_s19  ;;  %s2103_s12 = scalar_lea.vmem %s2682_s0, %s1668_s26  ;;  %vm829_vm5 = vcmask 1044484   ;;  %vm831_vm6 = vcmask 1045509   ;;  %vm833_vm7 = vcmask 1046534  }
  0x1d   : > { %1709 = vmatpush.msra.mxu1 %v538_v3  ;;  %v497_v12 = vld [vmem:[%s2685_s3 + $0x8] sm:$0xff]  ;;  %v496_v14 = vld [vmem:[%s2685_s3] sm:$0xff]  ;;  %v2112_v17 = vld [vmem:[%s2103_s12 + $0x30] sm:$0xff]  ;;  %s761_s28 = sld [smem:[#allocation2]]  ;;  %vm835_vm8 = vcmask 1047559   ;;  %vm839_vm10 = vcmask 130048  }
  0x1e   : > { %522 = vmatpush.msra.mxu0 %v501_v4  ;;  %v533_v13 = vld [vmem:[%s2687_s5 + $0x8] sm:$0xff]  ;;  %v532_v15 = vld [vmem:[%s2687_s5] sm:$0xff]  ;;  %v2118_v18 = vld [vmem:[%s2103_s12 + $0x38] sm:$0xff] }
  0x1f   : > { %1710 = vmatpush.msra.mxu1 %v537_v5  ;;  %v495_v16 = vld [vmem:[%s472_s14] sm:$0xff]  ;;  %v2133_v21 = vld [vmem:[%s2103_s12 + $0x8] sm:$0xff]  ;;  %v2143_v23 = vld [vmem:[%s2103_s12 + $0x10] sm:$0xff]  ;;  %s460_s14 = sand.u32 1, %s1913_s30  }
  0x20   : > { %523 = vmatpush.msra.mxu0 %v500_v6  ;;  %v2123_v19 = vld [vmem:[%s2103_s12] sm:$0xff]  ;;  %v2136_v22 = vld [vmem:[%s2103_s12 + $0x48] sm:$0xff]  ;;  %v2146_v24 = vld [vmem:[%s2103_s12 + $0x50] sm:$0xff]  ;;  %s1666_s27 = sshll.u32 %s460_s14, 3  ;;  %s1564_s23 = scalar_lea.sflag [#allocation5], %s460_s14 }
  0x21   : > { %1711 = vmatpush.msra.mxu1 %v536_v7  ;;  %v2126_v20 = vld [vmem:[%s2103_s12 + $0x40] sm:$0xff]  ;;  %v2153_v25 = vld [vmem:[%s2103_s12 + $0x18] sm:$0xff]  ;;  %v2173_v29 = vld [vmem:[%s2103_s12 + $0x28] sm:$0xff]  ;;  %s462_s18 = scalar_lea.vmem [#allocation4], %s1666_s27 }
  0x22   : > { %524 = vmatpush.msra.mxu0 %v499_v8  ;;  %v2156_v26 = vld [vmem:[%s2103_s12 + $0x58] sm:$0xff]  ;;  %v2163_v27 = vld [vmem:[%s2103_s12 + $0x20] sm:$0xff]  ;;  %v2176_v30 = vld [vmem:[%s2103_s12 + $0x68] sm:$0xff] }
  0x23   : > { %1712 = vmatpush.msra.mxu1 %v535_v9  ;;  %v2166_v28 = vld [vmem:[%s2103_s12 + $0x60] sm:$0xff]  ;;  %v2183_v31 = vld [vmem:[%s2103_s12 + $0x70] sm:$0xff]  ;;  %v2188_v32 = vld [vmem:[%s2103_s12 + $0x78] sm:$0xff]  ;;  %s476_s12 = scalar_lea.vmem %s2684_s2, %s1669_s19 }
  0x24   : > { %525 = vmatpush.msra.mxu0 %v498_v10  ;;  %v1783_v33 = vld [vmem:[%s2686_s4] ss:$0 sm:$0xff] }
  0x25   : > { %1713 = vmatpush.msra.mxu1 %v534_v11  ;;  %v2208_v43 = vld [vmem:[%s2688_s6] ss:$0 sm:$0xff] }
  0x26   : > { %526 = vmatpush.msra.mxu0 %v497_v12 }
  0x27   : > { %1714 = vmatpush.msra.mxu1 %v533_v13 }
  0x28   : > { %527 = vmatpush.msra.mxu0 %v496_v14 }
  0x29   : > { %1715 = vmatpush.msra.mxu1 %v532_v15  ;;  %1671 = vmatmul.msk.f32.vlgmr.msra.gmra.mxu0 %vm508_vm0, %v495_v16 }
  0x2a   : > { %1678 = vmatmul.msk.f32.vlgmr.msra.gmra.mxu1 %vm508_vm0, %v2112_v17  ;;  %596 = vmatpush.msrb.mxu0 %v539_v1 }
  0x2c   : > { %597 = vmatpush.msrb.mxu0 %v538_v3 }
  0x2e   : > { %598 = vmatpush.msrb.mxu0 %v537_v5 }
  0x30   : > { %599 = vmatpush.msrb.mxu0 %v536_v7 }
  0x32   : > { %1679 = vmatmul.msk.f32.gmra.mxu1 %vm508_vm0, %v2118_v18  ;;  %600 = vmatpush.msrb.mxu0 %v535_v9 }
  0x34   : > { %601 = vmatpush.msrb.mxu0 %v534_v11 }
  0x36   : > { %602 = vmatpush.msrb.mxu0 %v533_v13 }
  0x38   : > { %603 = vmatpush.msrb.mxu0 %v532_v15 }
  0x39   : > { %1672 = vmatmul.msk.f32.vlgmr.msrb.gmra.mxu0 %vm508_vm0, %v2123_v19 }
  0x3a   : > { %1680 = vmatmul.msk.f32.gmra.mxu1 %vm508_vm0, %v2126_v20 }
  0x41   : > { %1673 = vmatmul.msk.f32.gmra.mxu0 %vm508_vm0, %v2133_v21 }
  0x42   : > { %1681 = vmatmul.msk.f32.gmra.mxu1 %vm508_vm0, %v2136_v22 }
  0x49   : > { %1674 = vmatmul.msk.f32.gmra.mxu0 %vm508_vm0, %v2143_v23 }
  0x4a   : > { %1682 = vmatmul.msk.f32.gmra.mxu1 %vm508_vm0, %v2146_v24 }
  0x51   : > { %1675 = vmatmul.msk.f32.gmra.mxu0 %vm508_vm0, %v2153_v25 }
  0x52   : > { %1683 = vmatmul.msk.f32.gmra.mxu1 %vm508_vm0, %v2156_v26 }
  0x59   : > { %1676 = vmatmul.msk.f32.gmra.mxu0 %vm508_vm0, %v2163_v27 }
  0x5a   : > { %1684 = vmatmul.msk.f32.gmra.mxu1 %vm508_vm0, %v2166_v28 }
  0x61   : > { %1677 = vmatmul.msk.f32.gmra.mxu0 %vm508_vm0, %v2173_v29 }
  0x62   : > { %1685 = vmatmul.msk.f32.gmra.mxu1 %vm508_vm0, %v2176_v30 }
  0x6a   : > { %1686 = vmatmul.msk.f32.gmra.mxu1 %vm508_vm0, %v2183_v31 }
  0x72   : > { %1687 = vmatmul.msk.f32.gmra.mxu1 %vm508_vm0, %v2188_v32 }
  0xa6   : > { %v529_v34 = vpop.f32.mrf.mxu0 }
  0xa7   : > { %v2195_v35 = vpop.f32.mrf.mxu1  ;;  %v2197_v36 = vadd.f32 %v1783_v33, %v529_v34 }
  0xa9   : > { %v656_v37 = vrot.slane %v2197_v36, 3  ;;  %v657_v42 = vrot.slane %v2197_v36, 4  ;;  %v661_v45 = vperm.slane %v2197_v36, 0  ;;  %v654_v61 = vrot.slane %v2197_v36, 1 }
  0xaa   : > { %v658_v6 = vrot.slane %v2197_v36, 5  ;;  %v655_v14 = vrot.slane %v2197_v36, 2  ;;  %v659_v15 = vrot.slane %v2197_v36, 6 }
  0xab   : > { %v664_v38 = vperm.slane %v656_v37, 0  ;;  %v665_v46 = vperm.slane %v657_v42, 0  ;;  %v662_v63 = vperm.slane %v654_v61, 0  ;;  %v660_v61 = vrot.slane %v2197_v36, 7 }
  0xac   : > { %v666_v13 = vperm.slane %v658_v6, 0  ;;  %v663_v33 = vperm.slane %v655_v14, 0  ;;  %v667_v34 = vperm.slane %v659_v15, 0 }
  0xad   : > { %v683_v39 = vadd.f32 %v664_v38, %v2195_v35 }
  0xaf   : > { %v2201_v40 = vpop.f32.mrf.mxu1  ;;  %1787 = vtanh.f32 %v683_v39 }
  0xb0   : > { %v684_v41 = vadd.f32 %v664_v38, %v2201_v40 }
  0xb2   : > { %1789 = vtanh.f32 %v684_v41 }
  0xb5   : > { %v1788_v44 = vpop.eup %1787 }
  0xb6   : > { %v2211_v47 = vpop.f32.mrf.mxu0  ;;  %v719_v49 = vmul.f32 %v1788_v44, %v2208_v43 }
  0xb7   : > { %v2213_v48 = vpop.f32.mrf.mxu1  ;;  %v677_v51 = vadd.f32 %v661_v45, %v2211_v47 }
  0xb8   : > { %v1790_v50 = vpop.eup %1789  ;;  %v685_v52 = vadd.f32 %v665_v46, %v2213_v48  ;;  %741 = vadd.xlane.f32.xlu0 %v719_v49 }
  0xb9   : > { %v720_v53 = vmul.f32 %v1790_v50, %v2208_v43  ;;  %1791 = vtanh.f32 %v677_v51 }
  0xba   : > { %1793 = vtanh.f32 %v685_v52 }
  0xbb   : > { %743 = vadd.xlane.f32.xlu1 %v720_v53 }
  0xbe   : > { %v2219_v54 = vpop.f32.mrf.mxu0 }
  0xbf   : > { %v2221_v55 = vpop.f32.mrf.mxu1  ;;  %v1792_v56 = vpop.eup %1791  ;;  %v678_v57 = vadd.f32 %v661_v45, %v2219_v54 }
  0xc0   : > { %v1794_v58 = vpop.eup %1793  ;;  %v713_v59 = vmul.f32 %v1792_v56, %v2208_v43  ;;  %v686_v62 = vadd.f32 %v665_v46, %v2221_v55 }
  0xc1   : > { %1795 = vtanh.f32 %v678_v57  ;;  %v721_v60 = vmul.f32 %v1794_v58, %v2208_v43 }
  0xc2   : > { %729 = vadd.xlane.f32.xlu0 %v713_v59  ;;  %1797 = vtanh.f32 %v686_v62 }
  0xc3   : > { %745 = vadd.xlane.f32.xlu2 %v721_v60 }
  0xc6   : > { %v2228_v0 = vpop.f32.mrf.mxu0 }
  0xc7   : > { %v2230_v1 = vpop.f32.mrf.mxu1  ;;  %v1796_v2 = vpop.eup %1795  ;;  %v679_v3 = vadd.f32 %v662_v63, %v2228_v0 }
  0xc8   : > { %v714_v4 = vmul.f32 %v1796_v2, %v2208_v43  ;;  %v1798_v5 = vpop.eup %1797  ;;  %v687_v16 = vadd.f32 %v666_v13, %v2230_v1 }
  0xc9   : > { %1799 = vtanh.f32 %v679_v3  ;;  %v722_v11 = vmul.f32 %v1798_v5, %v2208_v43  ;;  %v668_v3 = vperm.slane %v660_v61, 0 }
  0xca   : > { %731 = vadd.xlane.f32.xlu0 %v714_v4 }
  0xce   : > { %v2235_v7 = vpop.f32.mrf.mxu0 }
  0xcf   : > { %v2237_v8 = vpop.f32.mrf.mxu1  ;;  %v1800_v9 = vpop.eup %1799  ;;  %v680_v10 = vadd.f32 %v662_v63, %v2235_v7 }
  0xd0   : > { %v715_v12 = vmul.f32 %v1800_v9, %v2208_v43  ;;  %v688_v45 = vadd.f32 %v666_v13, %v2237_v8 }
  0xd1   : > { %1801 = vtanh.f32 %v680_v10 }
  0xd2   : > { %747 = vadd.xlane.f32.xlu0 %v722_v11  ;;  %733 = vadd.xlane.f32.xlu1 %v715_v12  ;;  %1803 = vtanh.f32 %v687_v16 }
  0xd6   : > { %v2245_v37 = vpop.f32.mrf.mxu0 }
  0xd7   : > { %v2247_v38 = vpop.f32.mrf.mxu1  ;;  %v1802_v39 = vpop.eup %1801  ;;  %v681_v41 = vadd.f32 %v663_v33, %v2245_v37 }
  0xd8   : > { %v689_v42 = vadd.f32 %v667_v34, %v2247_v38  ;;  %v716_v44 = vmul.f32 %v1802_v39, %v2208_v43  ;;  %v1804_v46 = vpop.eup %1803 }
  0xd9   : > { %1805 = vtanh.f32 %v681_v41  ;;  %v723_v56 = vmul.f32 %v1804_v46, %v2208_v43  ;;  %v795_v46 = vlaneseq }
  0xda   : > { %1807 = vtanh.f32 %v689_v42  ;;  %735 = vadd.xlane.f32.xlu1 %v716_v44 }
  0xdb   : > { %1809 = vtanh.f32 %v688_v45 }
  0xde   : > { %v2256_v53 = vpop.f32.mrf.mxu0 }
  0xdf   : > { %v2253_v49 = vpop.f32.mrf.mxu1  ;;  %v1806_v50 = vpop.eup %1805  ;;  %v682_v59 = vadd.f32 %v663_v33, %v2256_v53 }
  0xe0   : > { %v690_v51 = vadd.f32 %v667_v34, %v2253_v49  ;;  %v1808_v52 = vpop.eup %1807  ;;  %v717_v57 = vmul.f32 %v1806_v50, %v2208_v43 }
  0xe1   : > { %v725_v58 = vmul.f32 %v1808_v52, %v2208_v43  ;;  %v1810_v60 = vpop.eup %1809 }
  0xe2   : > { %1811 = vtanh.f32 %v690_v51  ;;  %749 = vadd.xlane.f32.xlu1 %v723_v56  ;;  %737 = vadd.xlane.f32.xlu2 %v717_v57  ;;  %v724_v2 = vmul.f32 %v1810_v60, %v2208_v43  ;;  %v2275_v51 = vand.u32 127, %v795_v46  ;;  %v762_v57 = vstv %s761_s28  ;;  %s1278_s28 = sld [smem:[#allocation3]] }
  0xe3   : > { %753 = vadd.xlane.f32.xlu0 %v725_v58  ;;  %1813 = vtanh.f32 %v682_v59 }
  0xe4   : > { %v2278_v58 = vadd.s32 4294967288, %v2275_v51 }
  0xe7   : > { %v2263_v62 = vpop.f32.mrf.mxu1 }
  0xe8   : > { %v1812_v63 = vpop.eup %1811  ;;  %v691_v5 = vadd.f32 %v668_v3, %v2263_v62 }
  0xe9   : > { %v726_v4 = vmul.f32 %v1812_v63, %v2208_v43  ;;  %v1814_v6 = vpop.eup %1813 }
  0xea   : > { %751 = vadd.xlane.f32.xlu2 %v724_v2  ;;  %1815 = vtanh.f32 %v691_v5  ;;  %v718_v11 = vmul.f32 %v1814_v6, %v2208_v43 }
  0xeb   : > { %755 = vadd.xlane.f32.xlu1 %v726_v4 }
  0xef   : > { %v2268_v9 = vpop.f32.mrf.mxu1 }
  0xf0   : > { %v692_v10 = vadd.f32 %v668_v3, %v2268_v9  ;;  %v1816_v12 = vpop.eup %1815 }
  0xf1   : > { %v727_v14 = vmul.f32 %v1816_v12, %v2208_v43 }
  0xf2   : > { %1817 = vtanh.f32 %v692_v10  ;;  %739 = vadd.xlane.f32.xlu2 %v718_v11 }
  0xf8   : > { %v1818_v13 = vpop.eup %1817 }
  0xf9   : > { %v728_v15 = vmul.f32 %v1818_v13, %v2208_v43 }
  0xfa   : > { %757 = vadd.xlane.f32.xlu2 %v727_v14 }
  0xfb   : > { %759 = vadd.xlane.f32.xlu0 %v728_v15 }
 0x12b   : > { %v742_v16 = vpop.xlane.xlu0 %741 }
 0x12c   : > { %v769_v61 = vadd.f32 %v762_v57, %v742_v16 }
 0x12e   : > { %v744_v33 = vpop.xlane.xlu1 %743  ;;  %v808_v14 = vperm.slane %v769_v61, %v2275_v51 }
 0x12f   : > { %v770_v63 = vadd.f32 %v762_v57, %v744_v33 }
 0x131   : > { %v809_v33 = vperm.slane %v770_v63, %v2278_v58 }
 0x135   : > { %v730_v39 = vpop.xlane.xlu0 %729 }
 0x136   : > { %v746_v41 = vpop.xlane.xlu2 %745  ;;  %v763_v2 = vadd.f32 %v762_v57, %v730_v39 }
 0x137   : > { %v771_v6 = vadd.f32 %v762_v57, %v746_v41 }
 0x138   : > { %v797_v39 = vperm.slane %v763_v2, %v2275_v51  ;;  %v810_v2 = vsel %vm800_vm1, %v809_v33, %v808_v14 }
 0x13d   : > { %v732_v44 = vpop.xlane.xlu0 %731 }
 0x13e   : > { %v764_v59 = vadd.f32 %v762_v57, %v732_v44 }
 0x140   : > { %v799_v10 = vperm.slane %v764_v59, %v2278_v58 }
 0x145   : > { %v734_v34 = vpop.xlane.xlu1 %733  ;;  %v748_v52 = vpop.xlane.xlu0 %747 }
 0x146   : > { %v765_v60 = vadd.f32 %v762_v57, %v734_v34  ;;  %v772_v4 = vadd.f32 %v762_v57, %v748_v52 }
 0x148   : > { %v802_v11 = vperm.slane %v765_v60, %v2275_v51  ;;  %v812_v41 = vperm.slane %v772_v4, %v2278_v58 }
 0x14d   : > { %v736_v42 = vpop.xlane.xlu1 %735 }
 0x14e   : > { %v766_v43 = vadd.f32 %v762_v57, %v736_v42 }
 0x150   : > { %v803_v3 = vperm.slane %v766_v43, %v2278_v58  ;;  %v811_v43 = vperm.slane %v771_v6, %v2275_v51 }
 0x152   : > { %v804_v42 = vsel %vm800_vm1, %v803_v3, %v802_v11  ;;  %v813_v4 = vsel %vm800_vm1, %v812_v41, %v811_v43 }
 0x155   : > { %v738_v45 = vpop.xlane.xlu2 %737  ;;  %v750_v50 = vpop.xlane.xlu1 %749 }
 0x156   : > { %v767_v5 = vadd.f32 %v762_v57, %v738_v45  ;;  %v754_v12 = vpop.xlane.xlu0 %753  ;;  %v773_v44 = vadd.f32 %v762_v57, %v750_v50 }
 0x157   : > { %v775_v50 = vadd.f32 %v762_v57, %v754_v12 }
 0x158   : > { %v805_v45 = vperm.slane %v767_v5, %v2275_v51  ;;  %v814_v5 = vperm.slane %v773_v44, %v2275_v51 }
 0x159   : > { %v817_v33 = vperm.slane %v775_v50, %v2275_v51  ;;  %v2324_v50 = vshrl.u32 %v795_v46, 7 }
 0x15b   : > { %1765 = vset.pattern.permute.xlu2 %v2324_v50  ;;  %1763 = vset.pattern.permute.xlu0 %v2324_v50 }
 0x15d   : > { %v752_v56 = vpop.xlane.xlu2 %751 }
 0x15e   : > { %v774_v15 = vadd.f32 %v762_v57, %v752_v56  ;;  %v756_v34 = vpop.xlane.xlu1 %755  ;;  %v801_v56 = vsel %vm800_vm1, %v799_v10, %v797_v39 }
 0x15f   : > { %v776_v59 = vadd.f32 %v762_v57, %v756_v34  ;;  %v824_v60 = vsel %vm823_vm2, %v804_v42, %v801_v56 }
 0x160   : > { %v815_v61 = vperm.slane %v774_v15, %v2278_v58 }
 0x161   : > { %v818_v10 = vperm.slane %v776_v59, %v2278_v58 }
 0x162   : > { %v816_v14 = vsel %vm800_vm1, %v815_v61, %v814_v5 }
 0x163   : > { %v819_v44 = vsel %vm800_vm1, %v818_v10, %v817_v33 }
 0x165   : > { %v740_v13 = vpop.xlane.xlu2 %739 }
 0x166   : > { %v768_v16 = vadd.f32 %v762_v57, %v740_v13 }
 0x168   : > { %v806_v52 = vperm.slane %v768_v16, %v2278_v58  ;;  %v2308_v16 = vld [vmem:[%s476_s12] sm:$0xff]  ;;  %s1705_s12 = sshll.u32 %s2020_s7, 3  ;;  %s1576_s7 = sshll.u32 %s462_s18, 4  ;;  %s1577_s7 = int_to_ptr.vmem [resolvable:$true] %s1576_s7 }
 0x169   : > { %vm494_vm9 = vcmp.gt.f32.partialorder %v2308_v16, 0.5  ;;  %s1574_s17 = scalar_lea.hbm %s2695_s13, %s1705_s12 }
 0x16a   : > { %v807_v63 = vsel %vm800_vm1, %v806_v52, %v805_v45  ;;  %s1578_s22 = sshll.u32 %s1574_s17, 4  ;;  %s1579_s22 = int_to_ptr.hbm [resolvable:$true] %s1578_s22 }
 0x16b   : > { %v826_v3 = vsel %vm825_vm3, %v807_v63, %v824_v60  ;;  %s1873_s16 = sshra.s32 %s1579_s22, 4  ;;  %s1874_s16 = int_to_ptr.hbm [resolvable:$true] %s1873_s16 }
 0x16c   : > { %v828_v6 = vsel %vm827_vm4, %v810_v2, %v826_v3  ;;  %v2329_v3 = vadd.s32 8, %v2324_v50  ;;  %s1875_s21 = scalar_lea.hbm %s1874_s16, 8  ;;  %p1880_p1 = scmp.lt.s32.totalorder %s1874_s16, %s2695_s13 }
 0x16d   : > { %v758_v11 = vpop.xlane.xlu2 %757  ;;  %v830_v12 = vsel %vm829_vm5, %v813_v4, %v828_v6  ;;  %p1876_p12 = scmp.ne.s32.totalorder %s1874_s16, %s1875_s21 }
 0x16e   : > { %v760_v13 = vpop.xlane.xlu0 %759  ;;  %v777_v15 = vadd.f32 %v762_v57, %v758_v11  ;;  %v832_v39 = vsel %vm831_vm6, %v816_v14, %v830_v12  ;;  %1764 = vset.pattern.permute.xlu1 %v2329_v3 }
 0x16f   : > { %v778_v34 = vadd.f32 %v762_v57, %v760_v13  ;;  %v834_v57 = vsel %vm833_vm7, %v819_v44, %v832_v39  ;;  %p1877_p13 = pnand %p1876_p12, %p2037_p5 }
 0x170   : > { %v820_v42 = vperm.slane %v777_v15, %v2275_v51 }
 0x171   : > { %v821_v41 = vperm.slane %v778_v34, %v2278_v58  ;;  %p1878_p0 = pneg %p1877_p13 }
 0x173   : > { %v822_v45 = vsel %vm800_vm1, %v821_v41, %v820_v42 }
 0x174   : > { %v836_v52 = vsel %vm835_vm8, %v822_v45, %v834_v57 }
 0x175   : > { %v838_v43 = vsel %vm494_vm9, -inf, %v836_v52 }
 0x176   : > { %v840_v56 = vsel %vm839_vm10, %v838_v43, -inf }
 0x177   : > { %841 = vmax.xlane.f32.xlu1 %v840_v56  ;;  %v2343_v56 = vld [vmem:[%s2692_s10 + $0x38] sm:$0xff] }
 0x178   : > { %1716 = vmatpush.msra.mxu3 %v2343_v56 }
 0x1ea   : > { %v842_v59 = vpop.xlane.xlu1 %841 }
 0x1eb   : > { %v843_v60 = vsub.f32 %v838_v43, %v842_v59  ;;  %v2349_v59 = vld [vmem:[%s2692_s10 + $0x30] sm:$0xff] }
 0x1ec   : > { %1717 = vmatpush.msra.mxu3 %v2349_v59 }
 0x1ed   : > { %v844_v61 = vmul.f32 1.442695, %v843_v60  ;;  %v2355_v60 = vld [vmem:[%s2692_s10 + $0x28] sm:$0xff] }
 0x1ee   : > { %1718 = vmatpush.msra.mxu3 %v2355_v60 }
 0x1ef   : > { %1819 = vpow2.f32 %v844_v61  ;;  %v2361_v61 = vld [vmem:[%s2692_s10 + $0x20] sm:$0xff] }
 0x1f0   : > { %1719 = vmatpush.msra.mxu3 %v2361_v61 }
 0x1f5   : > { %v1820_v63 = vpop.eup %1819 }
 0x1f6   : > { %v846_v2 = vsel %vm839_vm10, %v1820_v63, 0.0 }
 0x1f7   : > { %847 = vadd.xlane.f32.xlu2 %v846_v2  ;;  %v2373_v2 = vld [vmem:[%s2692_s10 + $0x10] sm:$0xff] }
 0x26a   : > { %v848_v4 = vpop.xlane.xlu2 %847 }
 0x26b   : > { %1821 = vrcp.f32 %v848_v4  ;;  %v860_v11 = vand.u32 2147483648, %v848_v4  ;;  %v858_v12 = vand.u32 2147483647, %v848_v4  ;;  %vm854_vm12 = vweird.f32 %v848_v4 }
 0x26d   : > { %v861_v14 = vor.u32 1.1754944e-38, %v860_v11  ;;  %vm859_vm14 = vcmp.eq.f32.partialorder %v858_v12, 8.507059e+37 }
 0x271   : > { %v1822_v5 = vpop.eup %1821 }
 0x272   : > { %v850_v6 = vmul.f32 %v1822_v5, %v848_v4  ;;  %vm855_vm11 = vweird.f32 %v1822_v5  ;;  %v2379_v4 = vld [vmem:[%s2692_s10 + $0x8] sm:$0xff] }
 0x273   : > { %vm856_vm13 = vmor %vm854_vm12, %vm855_vm11 }
 0x274   : > { %v851_v10 = vsub.f32 1.0, %v850_v6 }
 0x276   : > { %v852_v13 = vmul.f32 %v1822_v5, %v851_v10 }
 0x278   : > { %v853_v46 = vadd.f32 %v1822_v5, %v852_v13  ;;  %v1072_v13 = vld [vmem:[%s2690_s8 + $0x78] sm:$0xff] }
 0x279   : > { %1077 = vmatpush.msra.mxu2 %v1072_v13 }
 0x27a   : > { %v857_v15 = vsel %vm856_vm13, %v1822_v5, %v853_v46  ;;  %v2385_v5 = vld [vmem:[%s2692_s10] sm:$0xff]  ;;  %v1068_v46 = vld [vmem:[%s2690_s8 + $0x58] sm:$0xff] }
 0x27b   : > { %v862_v34 = vsel %vm859_vm14, %v861_v14, %v857_v15  ;;  %v1067_v14 = vld [vmem:[%s2690_s8 + $0x50] sm:$0xff]  ;;  %v1065_v15 = vld [vmem:[%s2690_s8 + $0x40] sm:$0xff] }
 0x27c   : > { %v863_v33 = vmul.f32 %v1820_v63, %v862_v34  ;;  %v2367_v63 = vld [vmem:[%s2692_s10 + $0x18] sm:$0xff] }
 0x27d   : > { %1720 = vmatpush.msra.mxu3 %v2367_v63 }
 0x27e   : > { %v877_v39 = vperm.slane %v863_v33, 1  ;;  %v864_v42 = vperm.slane %v863_v33, 0  ;;  %v890_v41 = vperm.slane %v863_v33, 2  ;;  %v903_v44 = vperm.slane %v863_v33, 3 }
 0x27f   : > { %v942_v45 = vperm.slane %v863_v33, 6  ;;  %v916_v57 = vperm.slane %v863_v33, 4  ;;  %v929_v52 = vperm.slane %v863_v33, 5  ;;  %v955_v43 = vperm.slane %v863_v33, 7  ;;  %1721 = vmatpush.msra.mxu3 %v2373_v2  ;;  %v1064_v33 = vld [vmem:[%s2690_s8 + $0x38] sm:$0xff] }
 0x280   : > { %882 = vperm.xlu2 %1765, %v877_v39   ;;  %875 = vperm.xlu1 %1764, %v864_v42  }
 0x281   : > { %869 = vperm.xlu0 %1763, %v864_v42   ;;  %1722 = vmatpush.msra.mxu3 %v2379_v4 }
 0x283   : > { %1723 = vmatpush.msra.mxu3 %v2385_v5 }
 0x284   : > { %1694 = vmatmul.msk.f32.vlgmr.msra.gmra.mxu3 %vm508_vm0, %v2112_v17  ;;  %v1071_v17 = vld [vmem:[%s2690_s8 + $0x70] sm:$0xff] }
 0x285   : > { %1078 = vmatpush.msra.mxu2 %v1071_v17 }
 0x288   : > { %1766 = vset.pattern.permute.xlu2 %v2329_v3  ;;  %1767 = vset.pattern.permute.xlu1 %v2324_v50 }
 0x289   : > { %1768 = vset.pattern.permute.xlu0 %v2329_v3 }
 0x28c   : > { %1695 = vmatmul.msk.f32.gmra.mxu3 %vm508_vm0, %v2118_v18  ;;  %v1070_v18 = vld [vmem:[%s2690_s8 + $0x68] sm:$0xff] }
 0x28d   : > { %1079 = vmatpush.msra.mxu2 %v1070_v18 }
 0x290   : > { %888 = vperm.xlu2 %1766, %v877_v39   ;;  %895 = vperm.xlu1 %1767, %v890_v41   ;;  %v1063_v39 = vld [vmem:[%s2690_s8 + $0x30] sm:$0xff] }
 0x291   : > { %914 = vperm.xlu0 %1768, %v903_v44  }
 0x294   : > { %1696 = vmatmul.msk.f32.gmra.mxu3 %vm508_vm0, %v2126_v20  ;;  %v1069_v20 = vld [vmem:[%s2690_s8 + $0x60] sm:$0xff] }
 0x295   : > { %1080 = vmatpush.msra.mxu2 %v1069_v20  ;;  %v1058_v20 = vld [vmem:[%s2690_s8 + $0x8] sm:$0xff] }
 0x297   : > { %1081 = vmatpush.msra.mxu2 %v1068_v46 }
 0x298   : > { %901 = vperm.xlu2 %1766, %v890_v41   ;;  %908 = vperm.xlu1 %1767, %v903_v44   ;;  %v1061_v44 = vld [vmem:[%s2690_s8 + $0x20] sm:$0xff] }
 0x299   : > { %1771 = vset.pattern.permute.xlu0 %v2324_v50  ;;  %1082 = vmatpush.msra.mxu2 %v1067_v14 }
 0x29c   : > { %1697 = vmatmul.msk.f32.gmra.mxu3 %vm508_vm0, %v2136_v22 }
 0x2a0   : > { %1769 = vset.pattern.permute.xlu2 %v2324_v50  ;;  %1770 = vset.pattern.permute.xlu1 %v2329_v3 }
 0x2a1   : > { %947 = vperm.xlu0 %1771, %v942_v45  }
 0x2a4   : > { %1698 = vmatmul.msk.f32.gmra.mxu3 %vm508_vm0, %v2146_v24  ;;  %v1066_v24 = vld [vmem:[%s2690_s8 + $0x48] sm:$0xff] }
 0x2a5   : > { %1083 = vmatpush.msra.mxu2 %v1066_v24 }
 0x2a7   : > { %1084 = vmatpush.msra.mxu2 %v1065_v15 }
 0x2a8   : > { %921 = vperm.xlu2 %1769, %v916_v57   ;;  %927 = vperm.xlu1 %1770, %v916_v57  }
 0x2a9   : > { %1085 = vmatpush.msra.mxu2 %v1064_v33 }
 0x2ab   : > { %1086 = vmatpush.msra.mxu2 %v1063_v39 }
 0x2ac   : > { %1699 = vmatmul.msk.f32.gmra.mxu3 %vm508_vm0, %v2156_v26  ;;  %v1062_v26 = vld [vmem:[%s2690_s8 + $0x28] sm:$0xff] }
 0x2ad   : > { %1087 = vmatpush.msra.mxu2 %v1062_v26 }
 0x2af   : > { %1088 = vmatpush.msra.mxu2 %v1061_v44 }
 0x2b0   : > { %934 = vperm.xlu2 %1769, %v929_v52   ;;  %940 = vperm.xlu1 %1770, %v929_v52  }
 0x2b4   : > { %1700 = vmatmul.msk.f32.gmra.mxu3 %vm508_vm0, %v2166_v28 }
 0x2b8   : > { %1772 = vset.pattern.permute.xlu2 %v2329_v3  ;;  %1773 = vset.pattern.permute.xlu1 %v2324_v50 }
 0x2bc   : > { %1701 = vmatmul.msk.f32.gmra.mxu3 %vm508_vm0, %v2176_v30 }
 0x2c0   : > { %953 = vperm.xlu2 %1772, %v942_v45   ;;  %960 = vperm.xlu1 %1773, %v955_v43   ;;  %v1060_v45 = vld [vmem:[%s2690_s8 + $0x18] sm:$0xff] }
 0x2c1   : > { %1089 = vmatpush.msra.mxu2 %v1060_v45 }
 0x2c4   : > { %1702 = vmatmul.msk.f32.gmra.mxu3 %vm508_vm0, %v2183_v31 }
 0x2c8   : > { %966 = vperm.xlu2 %1772, %v955_v43   ;;  %v1059_v43 = vld [vmem:[%s2690_s8 + $0x10] sm:$0xff] }
 0x2c9   : > { %1090 = vmatpush.msra.mxu2 %v1059_v43 }
 0x2cb   : > { %1091 = vmatpush.msra.mxu2 %v1058_v20 }
 0x2cc   : > { %1703 = vmatmul.msk.f32.gmra.mxu3 %vm508_vm0, %v2188_v32 }
 0x2da   : > { %v883_v6 = vpop.permute.xlu2 %882 }
 0x2ea   : > { %v889_v10 = vpop.permute.xlu2 %888 }
 0x2eb   : > { %v971_v46 = vmul.f32 %v889_v10, %v2235_v7 }
 0x2f2   : > { %v876_v11 = vpop.permute.xlu1 %875  ;;  %v902_v22 = vpop.permute.xlu2 %901 }
 0x2f3   : > { %v870_v41 = vpop.permute.xlu0 %869  ;;  %v969_v13 = vmul.f32 %v876_v11, %v2219_v54  ;;  %v973_v54 = vmul.f32 %v902_v22, %v2256_v53  ;;  %v970_v11 = vmul.f32 %v883_v6, %v2228_v0 }
 0x2f4   : > { %v968_v28 = vmul.f32 %v870_v41, %v2211_v47 }
 0x2f5   : > { %v991_v30 = vadd.f32 %v971_v46, %v970_v11 }
 0x302   : > { %v896_v12 = vpop.permute.xlu1 %895  ;;  %v922_v34 = vpop.permute.xlu2 %921 }
 0x303   : > { %v915_v17 = vpop.permute.xlu0 %914  ;;  %v972_v18 = vmul.f32 %v896_v12, %v2245_v37  ;;  %v1057_v37 = vld [vmem:[%s2690_s8] sm:$0xff]  ;;  %v984_v12 = vadd.f32 %v969_v13, %v968_v28 }
 0x304   : > { %v975_v24 = vmul.f32 %v915_v17, %v2201_v40  ;;  %1092 = vmatpush.msra.mxu2 %v1057_v37 }
 0x305   : > { %v998_v7 = vadd.f32 %v973_v54, %v972_v18  ;;  %v985_v15 = vrot.slane %v984_v12, 4 }
 0x306   : > { %1113 = vmatpush.msrb.mxu2 %v2343_v56 }
 0x307   : > { %v999_v40 = vrot.slane %v998_v7, 4 }
 0x308   : > { %1114 = vmatpush.msrb.mxu2 %v2349_v59 }
 0x309   : > { %v1000_v26 = vadd.f32 %v999_v40, %v998_v7 }
 0x30a   : > { %v909_v42 = vpop.permute.xlu1 %908  ;;  %v935_v57 = vpop.permute.xlu2 %934  ;;  %1115 = vmatpush.msrb.mxu2 %v2355_v60 }
 0x30b   : > { %v974_v14 = vmul.f32 %v909_v42, %v2195_v35  ;;  %v976_v35 = vmul.f32 %v922_v34, %v2213_v48  ;;  %v978_v33 = vmul.f32 %v935_v57, %v2230_v1  ;;  %v992_v48 = vrot.slane %v991_v30, 4 }
 0x30c   : > { %1116 = vmatpush.msrb.mxu2 %v2361_v61  ;;  %v986_v1 = vadd.f32 %v985_v15, %v984_v12 }
 0x30d   : > { %v1005_v10 = vadd.f32 %v975_v24, %v974_v14 }
 0x30e   : > { %1117 = vmatpush.msrb.mxu2 %v2367_v63  ;;  %v987_v45 = vrot.slane %v986_v1, 2 }
 0x30f   : > { %v1006_v56 = vrot.slane %v1005_v10, 4 }
 0x310   : > { %1118 = vmatpush.msrb.mxu2 %v2373_v2  ;;  %v988_v63 = vadd.f32 %v987_v45, %v986_v1 }
 0x311   : > { %v1007_v44 = vadd.f32 %v1006_v56, %v1005_v10 }
 0x312   : > { %1119 = vmatpush.msrb.mxu2 %v2379_v4  ;;  %v989_v54 = vrot.slane %v988_v63, 1 }
 0x313   : > { %v948_v0 = vpop.permute.xlu0 %947  ;;  %v1008_v43 = vrot.slane %v1007_v44, 2 }
 0x314   : > { %v980_v42 = vmul.f32 %v948_v0, %v2247_v38  ;;  %1120 = vmatpush.msrb.mxu2 %v2385_v5  ;;  %v990_v7 = vadd.f32 %v989_v54, %v988_v63 }
 0x315   : > { %v1009_v20 = vadd.f32 %v1008_v43, %v1007_v44 }
 0x317   : > { %v1010_v24 = vrot.slane %v1009_v20, 1 }
 0x319   : > { %v1011_v15 = vadd.f32 %v1010_v24, %v1009_v20 }
 0x31a   : > { %v928_v52 = vpop.permute.xlu1 %927  ;;  %v954_v53 = vpop.permute.xlu2 %953 }
 0x31b   : > { %v977_v47 = vmul.f32 %v928_v52, %v2221_v55  ;;  %v981_v39 = vmul.f32 %v954_v53, %v2253_v49  ;;  %v993_v49 = vadd.f32 %v992_v48, %v991_v30  ;;  %v1001_v52 = vrot.slane %v1000_v26, 2 }
 0x31d   : > { %v1012_v22 = vadd.f32 %v977_v47, %v976_v35  ;;  %v994_v38 = vrot.slane %v993_v49, 2  ;;  %v1002_v28 = vadd.f32 %v1001_v52, %v1000_v26 }
 0x31f   : > { %v1013_v59 = vrot.slane %v1012_v22, 4  ;;  %v995_v2 = vadd.f32 %v994_v38, %v993_v49  ;;  %v1003_v11 = vrot.slane %v1002_v28, 1 }
 0x321   : > { %v1014_v60 = vadd.f32 %v1013_v59, %v1012_v22  ;;  %v996_v12 = vrot.slane %v995_v2, 1  ;;  %v1004_v53 = vadd.f32 %v1003_v11, %v1002_v28 }
 0x322   : > { %v941_v55 = vpop.permute.xlu1 %940  ;;  %v967_v18 = vpop.permute.xlu2 %966 }
 0x323   : > { %v979_v6 = vmul.f32 %v941_v55, %v2237_v8  ;;  %v1026_v8 = vadd.f32 %v981_v39, %v980_v42  ;;  %v1015_v61 = vrot.slane %v1014_v60, 2  ;;  %v983_v4 = vmul.f32 %v967_v18, %v2268_v9 }
 0x324   : > { %v997_v55 = vadd.f32 %v996_v12, %v995_v2  ;;  %v2531_v2 = vld [vmem:[%s2693_s11] ss:$0 sm:$0xff] }
 0x325   : > { %v1019_v34 = vadd.f32 %v979_v6, %v978_v33  ;;  %v1027_v31 = vrot.slane %v1026_v8, 4  ;;  %v1016_v46 = vadd.f32 %v1015_v61, %v1014_v60 }
 0x326   : > { %v1048_v9 = vsel %vm823_vm2, %v997_v55, %v990_v7 }
 0x327   : > { %v1020_v41 = vrot.slane %v1019_v34, 4  ;;  %v1028_v17 = vadd.f32 %v1027_v31, %v1026_v8  ;;  %v1017_v35 = vrot.slane %v1016_v46, 1 }
 0x329   : > { %v1021_v57 = vadd.f32 %v1020_v41, %v1019_v34  ;;  %v1029_v32 = vrot.slane %v1028_v17, 2  ;;  %v1018_v0 = vadd.f32 %v1017_v35, %v1016_v46 }
 0x32b   : > { %v1022_v13 = vrot.slane %v1021_v57, 2  ;;  %v1030_v22 = vadd.f32 %v1029_v32, %v1028_v17 }
 0x32d   : > { %v1023_v47 = vadd.f32 %v1022_v13, %v1021_v57  ;;  %v1031_v39 = vrot.slane %v1030_v22, 1 }
 0x32f   : > { %v1024_v30 = vrot.slane %v1023_v47, 1  ;;  %v1032_v1 = vadd.f32 %v1031_v39, %v1030_v22 }
 0x331   : > { %v1025_v6 = vadd.f32 %v1024_v30, %v1023_v47 }
 0x332   : > { %v961_v14 = vpop.permute.xlu1 %960 }
 0x333   : > { %v982_v37 = vmul.f32 %v961_v14, %v2263_v62  ;;  %v1049_v62 = vsel %vm825_vm3, %v1004_v53, %v1048_v9 }
 0x334   : > { %v1050_v56 = vsel %vm827_vm4, %v1011_v15, %v1049_v62 }
 0x335   : > { %v1033_v5 = vadd.f32 %v983_v4, %v982_v37  ;;  %v1051_v34 = vsel %vm829_vm5, %v1018_v0, %v1050_v56 }
 0x336   : > { %v1052_v59 = vsel %vm831_vm6, %v1025_v6, %v1051_v34 }
 0x337   : > { %v1034_v10 = vrot.slane %v1033_v5, 4  ;;  %v1053_v26 = vsel %vm833_vm7, %v1032_v1, %v1052_v59 }
 0x339   : > { %v1035_v33 = vadd.f32 %v1034_v10, %v1033_v5 }
 0x33b   : > { %v1036_v40 = vrot.slane %v1035_v33, 2 }
 0x33d   : > { %v1037_v48 = vadd.f32 %v1036_v40, %v1035_v33 }
 0x33f   : > { %v1038_v42 = vrot.slane %v1037_v48, 1 }
 0x341   : > { %v1039_v41 = vadd.f32 %v1038_v42, %v1037_v48 }
 0x343   : > { %v1054_v8 = vsel %vm835_vm8, %v1039_v41, %v1053_v26 }
 0x344   : > { %v1056_v49 = vadd.f32 %v1054_v8, %v2197_v36  ;;  %v2500_v36 = vpop.f32.mrf.mxu3 }
 0x346   : > { %1093 = vmatmul.f32.vlgmr.msra.gmra.mxu2 %v1056_v49 }
 0x34c   : > { %v2502_v44 = vpop.f32.mrf.mxu3 }
 0x34e   : > { %1688 = vmatmul.msk.f32.vlgmr.msrb.gmra.mxu2 %vm508_vm0, %v2123_v19 }
 0x354   : > { %v2504_v19 = vpop.f32.mrf.mxu3 }
 0x356   : > { %1689 = vmatmul.msk.f32.gmra.mxu2 %vm508_vm0, %v2133_v21 }
 0x35c   : > { %v2506_v60 = vpop.f32.mrf.mxu3 }
 0x35e   : > { %1690 = vmatmul.msk.f32.gmra.mxu2 %vm508_vm0, %v2143_v23  ;;  %v1785_v23 = vld [vmem:[%s2691_s9] ss:$0 sm:$0xff] }
 0x364   : > { %v2508_v21 = vpop.f32.mrf.mxu3 }
 0x366   : > { %1691 = vmatmul.msk.f32.gmra.mxu2 %vm508_vm0, %v2153_v25 }
 0x36c   : > { %v2517_v57 = vpop.f32.mrf.mxu3 }
 0x36e   : > { %1692 = vmatmul.msk.f32.gmra.mxu2 %vm508_vm0, %v2163_v27 }
 0x374   : > { %v2526_v18 = vpop.f32.mrf.mxu3 }
 0x376   : > { %1693 = vmatmul.msk.f32.gmra.mxu2 %vm508_vm0, %v2173_v29 }
 0x37c   : > { %v2547_v15 = vpop.f32.mrf.mxu3 }
 0x384   : > { %v2557_v59 = vpop.f32.mrf.mxu3 }
 0x3c9   : > { %v1094_v25 = vpop.f32.mrf.mxu2 }
 0x3ca   : > { %v2513_v45 = vadd.f32 %v1785_v23, %v1094_v25 }
 0x3cc   : > { %v1174_v27 = vrot.slane %v2513_v45, 4  ;;  %v1173_v29 = vrot.slane %v2513_v45, 3  ;;  %v1175_v38 = vrot.slane %v2513_v45, 5  ;;  %v1176_v54 = vrot.slane %v2513_v45, 6 }
 0x3cd   : > { %v1171_v11 = vrot.slane %v2513_v45, 1  ;;  %v1178_v12 = vperm.slane %v2513_v45, 0  ;;  %v1172_v41 = vrot.slane %v2513_v45, 2  ;;  %v1177_v49 = vrot.slane %v2513_v45, 7 }
 0x3ce   : > { %v1182_v52 = vperm.slane %v1174_v27, 0  ;;  %v1181_v31 = vperm.slane %v1173_v29, 0  ;;  %v1183_v28 = vperm.slane %v1175_v38, 0  ;;  %v1184_v5 = vperm.slane %v1176_v54, 0 }
 0x3cf   : > { %v1179_v30 = vperm.slane %v1171_v11, 0  ;;  %v1180_v8 = vperm.slane %v1172_v41, 0 }
 0x3d0   : > { %v1202_v61 = vadd.f32 %v1182_v52, %v2504_v19  ;;  %v1201_v63 = vadd.f32 %v1181_v31, %v2502_v44  ;;  %v1200_v13 = vadd.f32 %v1181_v31, %v2500_v36  ;;  %v1205_v17 = vadd.f32 %v1183_v28, %v2517_v57  ;;  %v2567_v31 = vpop.f32.mrf.mxu3 }
 0x3d1   : > { %v2520_v43 = vpop.f32.mrf.mxu2  ;;  %v1204_v20 = vadd.f32 %v1183_v28, %v2508_v21  ;;  %v1203_v14 = vadd.f32 %v1182_v52, %v2506_v60  ;;  %v1206_v22 = vadd.f32 %v1184_v5, %v2526_v18  ;;  %v1185_v52 = vperm.slane %v1177_v49, 0 }
 0x3d2   : > { %1823 = vtanh.f32 %v1202_v61  ;;  %v1194_v39 = vadd.f32 %v1178_v12, %v2520_v43  ;;  %v1207_v61 = vadd.f32 %v1184_v5, %v2547_v15 }
 0x3d3   : > { %1825 = vtanh.f32 %v1201_v63  ;;  %v1209_v63 = vadd.f32 %v1185_v52, %v2567_v31  ;;  %v1208_v54 = vadd.f32 %v1185_v52, %v2557_v59 }
 0x3d4   : > { %1827 = vtanh.f32 %v1200_v13 }
 0x3d5   : > { %1829 = vtanh.f32 %v1205_v17 }
 0x3d6   : > { %1831 = vtanh.f32 %v1204_v20 }
 0x3d7   : > { %1833 = vtanh.f32 %v1203_v14 }
 0x3d8   : > { %v1824_v4 = vpop.eup %1823 }
 0x3d9   : > { %v2534_v46 = vpop.f32.mrf.mxu2  ;;  %v1826_v47 = vpop.eup %1825  ;;  %v1238_v37 = vmul.f32 %v1824_v4, %v2531_v2 }
 0x3da   : > { %v1828_v32 = vpop.eup %1827  ;;  %v1237_v24 = vmul.f32 %v1826_v47, %v2531_v2  ;;  %v1195_v7 = vadd.f32 %v1178_v12, %v2534_v46 }
 0x3db   : > { %1262 = vadd.xlane.f32.xlu0 %v1238_v37  ;;  %v1236_v35 = vmul.f32 %v1828_v32, %v2531_v2  ;;  %v1830_v10 = vpop.eup %1829 }
 0x3dc   : > { %1260 = vadd.xlane.f32.xlu2 %v1237_v24  ;;  %v1832_v55 = vpop.eup %1831  ;;  %1835 = vtanh.f32 %v1195_v7  ;;  %v1241_v9 = vmul.f32 %v1830_v10, %v2531_v2 }
 0x3dd   : > { %1258 = vadd.xlane.f32.xlu1 %v1236_v35  ;;  %v1834_v0 = vpop.eup %1833  ;;  %v1240_v6 = vmul.f32 %v1832_v55, %v2531_v2 }
 0x3de   : > { %v1239_v40 = vmul.f32 %v1834_v0, %v2531_v2 }
 0x3e1   : > { %v2544_v53 = vpop.f32.mrf.mxu2 }
 0x3e2   : > { %v1196_v33 = vadd.f32 %v1179_v30, %v2544_v53  ;;  %v1836_v62 = vpop.eup %1835 }
 0x3e3   : > { %1268 = vadd.xlane.f32.xlu0 %v1241_v9  ;;  %v1231_v1 = vmul.f32 %v1836_v62, %v2531_v2 }
 0x3e4   : > { %1837 = vtanh.f32 %v1196_v33  ;;  %1266 = vadd.xlane.f32.xlu2 %v1240_v6 }
 0x3e5   : > { %1839 = vtanh.f32 %v1206_v22  ;;  %1264 = vadd.xlane.f32.xlu1 %v1239_v40 }
 0x3e6   : > { %1841 = vtanh.f32 %v1194_v39  ;;  %v1279_v39 = vstv %s1278_s28  ;;  %s1879_s28 = scalar_lea.hbm %s2695_s13, 16 }
 0x3e7   : > { %p1881_p2 = scmp.lt.s32.totalorder %s1879_s28, %s1875_s21 }
 0x3e9   : > { %v2554_v48 = vpop.f32.mrf.mxu2  ;;  %p1882_p3 = por %p1881_p2, %p1880_p1 }
 0x3ea   : > { %v1838_v56 = vpop.eup %1837  ;;  %v1197_v23 = vadd.f32 %v1179_v30, %v2554_v48 }
 0x3eb   : > { %v1840_v34 = vpop.eup %1839  ;;  %v1232_v42 = vmul.f32 %v1838_v56, %v2531_v2  ;;  %1248 = vadd.xlane.f32.xlu0 %v1231_v1  ;;  %p1883_p4 = pnand %p1882_p3, %p1878_p0 }
 0x3ec   : > { %v1242_v26 = vmul.f32 %v1840_v34, %v2531_v2  ;;  %v1842_v29 = vpop.eup %1841 }
 0x3ed   : > { %1250 = vadd.xlane.f32.xlu2 %v1232_v42  ;;  %v1230_v38 = vmul.f32 %v1842_v29, %v2531_v2 }
 0x3ee   : > { %1270 = vadd.xlane.f32.xlu1 %v1242_v26 }
 0x3f1   : > { %v2564_v25 = vpop.f32.mrf.mxu2 }
 0x3f2   : > { %v1198_v27 = vadd.f32 %v1180_v8, %v2564_v25 }
 0x3f4   : > { %1843 = vtanh.f32 %v1198_v27 }
 0x3f5   : > { %1845 = vtanh.f32 %v1197_v23 }
 0x3f6   : > { %1246 = vadd.xlane.f32.xlu1 %v1230_v38  ;;  %1847 = vtanh.f32 %v1207_v61 }
 0x3f9   : > { %v2572_v13 = vpop.f32.mrf.mxu2 }
 0x3fa   : > { %v1844_v28 = vpop.eup %1843  ;;  %v1199_v17 = vadd.f32 %v1180_v8, %v2572_v13 }
 0x3fb   : > { %v1846_v20 = vpop.eup %1845  ;;  %v1234_v14 = vmul.f32 %v1844_v28, %v2531_v2 }
 0x3fc   : > { %1849 = vtanh.f32 %v1199_v17  ;;  %v1233_v4 = vmul.f32 %v1846_v20, %v2531_v2  ;;  %v1848_v47 = vpop.eup %1847 }
 0x3fd   : > { %1851 = vtanh.f32 %v1209_v63  ;;  %1254 = vadd.xlane.f32.xlu2 %v1234_v14  ;;  %v1243_v12 = vmul.f32 %v1848_v47, %v2531_v2 }
 0x3fe   : > { %1252 = vadd.xlane.f32.xlu1 %v1233_v4  ;;  %1853 = vtanh.f32 %v1208_v54 }
 0x402   : > { %v1850_v37 = vpop.eup %1849 }
 0x403   : > { %v1852_v11 = vpop.eup %1851  ;;  %v1235_v32 = vmul.f32 %v1850_v37, %v2531_v2 }
 0x404   : > { %v1245_v24 = vmul.f32 %v1852_v11, %v2531_v2  ;;  %v1854_v5 = vpop.eup %1853 }
 0x405   : > { %1256 = vadd.xlane.f32.xlu0 %v1235_v32  ;;  %1272 = vadd.xlane.f32.xlu2 %v1243_v12  ;;  %v1244_v35 = vmul.f32 %v1854_v5, %v2531_v2 }
 0x406   : > { %1276 = vadd.xlane.f32.xlu1 %v1245_v24 }
 0x40d   : > { %1274 = vadd.xlane.f32.xlu0 %v1244_v35 }
 0x44e   : > { %v1263_v22 = vpop.xlane.xlu0 %1262 }
 0x44f   : > { %v1261_v30 = vpop.xlane.xlu2 %1260  ;;  %v1288_v27 = vadd.f32 %v1279_v39, %v1263_v22 }
 0x450   : > { %v1259_v7 = vpop.xlane.xlu1 %1258  ;;  %v1287_v41 = vadd.f32 %v1279_v39, %v1261_v30 }
 0x451   : > { %v1286_v2 = vadd.f32 %v1279_v39, %v1259_v7  ;;  %v1324_v32 = vperm.slane %v1288_v27, %v2275_v51 }
 0x452   : > { %v1322_v20 = vperm.slane %v1287_v41, %v2278_v58 }
 0x453   : > { %v1321_v14 = vperm.slane %v1286_v2, %v2275_v51 }
 0x455   : > { %v1323_v22 = vsel %vm800_vm1, %v1322_v20, %v1321_v14 }
 0x456   : > { %v1269_v0 = vpop.xlane.xlu0 %1268 }
 0x457   : > { %v1267_v55 = vpop.xlane.xlu2 %1266  ;;  %v1291_v61 = vadd.f32 %v1279_v39, %v1269_v0 }
 0x458   : > { %v1265_v10 = vpop.xlane.xlu1 %1264  ;;  %v1290_v63 = vadd.f32 %v1279_v39, %v1267_v55 }
 0x459   : > { %v1289_v49 = vadd.f32 %v1279_v39, %v1265_v10  ;;  %v1328_v35 = vperm.slane %v1291_v61, %v2278_v58 }
 0x45a   : > { %v1327_v7 = vperm.slane %v1290_v63, %v2275_v51 }
 0x45b   : > { %v1325_v47 = vperm.slane %v1289_v49, %v2278_v58 }
 0x45e   : > { %v1249_v40 = vpop.xlane.xlu0 %1248 }
 0x45f   : > { %v1281_v26 = vadd.f32 %v1279_v39, %v1249_v40 }
 0x460   : > { %v1251_v9 = vpop.xlane.xlu2 %1250 }
 0x461   : > { %v1271_v33 = vpop.xlane.xlu1 %1270  ;;  %v1282_v34 = vadd.f32 %v1279_v39, %v1251_v9  ;;  %v1313_v54 = vperm.slane %v1281_v26, %v2278_v58  ;;  %v1326_v9 = vsel %vm800_vm1, %v1325_v47, %v1324_v32 }
 0x462   : > { %v1292_v55 = vadd.f32 %v1279_v39, %v1271_v33 }
 0x463   : > { %v1315_v29 = vperm.slane %v1282_v34, %v2275_v51 }
 0x464   : > { %v1330_v41 = vperm.slane %v1292_v55, %v2275_v51 }
 0x469   : > { %v1247_v6 = vpop.xlane.xlu1 %1246 }
 0x46a   : > { %v1280_v42 = vadd.f32 %v1279_v39, %v1247_v6 }
 0x46c   : > { %v1312_v52 = vperm.slane %v1280_v42, %v2275_v51  ;;  %v1329_v42 = vsel %vm800_vm1, %v1328_v35, %v1327_v7 }
 0x46e   : > { %v1314_v12 = vsel %vm800_vm1, %v1313_v54, %v1312_v52 }
 0x470   : > { %v1255_v62 = vpop.xlane.xlu2 %1254 }
 0x471   : > { %v1253_v56 = vpop.xlane.xlu1 %1252  ;;  %v1284_v23 = vadd.f32 %v1279_v39, %v1255_v62 }
 0x472   : > { %v1283_v1 = vadd.f32 %v1279_v39, %v1253_v56 }
 0x473   : > { %v1318_v37 = vperm.slane %v1284_v23, %v2275_v51 }
 0x474   : > { %v1316_v8 = vperm.slane %v1283_v1, %v2278_v58 }
 0x476   : > { %v1317_v4 = vsel %vm800_vm1, %v1316_v8, %v1315_v29 }
 0x477   : > { %v1336_v30 = vsel %vm823_vm2, %v1317_v4, %v1314_v12 }
 0x478   : > { %v1257_v38 = vpop.xlane.xlu0 %1256  ;;  %v1273_v17 = vpop.xlane.xlu2 %1272 }
 0x479   : > { %v1285_v28 = vadd.f32 %v1279_v39, %v1257_v38  ;;  %v1277_v24 = vpop.xlane.xlu1 %1276  ;;  %v1293_v5 = vadd.f32 %v1279_v39, %v1273_v17 }
 0x47a   : > { %v1295_v6 = vadd.f32 %v1279_v39, %v1277_v24 }
 0x47b   : > { %v1319_v11 = vperm.slane %v1285_v28, %v2278_v58  ;;  %v1331_v62 = vperm.slane %v1293_v5, %v2278_v58 }
 0x47c   : > { %v1334_v33 = vperm.slane %v1295_v6, %v2278_v58 }
 0x47d   : > { %v1320_v10 = vsel %vm800_vm1, %v1319_v11, %v1318_v37  ;;  %v1332_v8 = vsel %vm800_vm1, %v1331_v62, %v1330_v41 }
 0x47e   : > { %v1337_v0 = vsel %vm825_vm3, %v1320_v10, %v1336_v30 }
 0x47f   : > { %v1338_v40 = vsel %vm827_vm4, %v1323_v22, %v1337_v0 }
 0x480   : > { %v1275_v56 = vpop.xlane.xlu0 %1274  ;;  %v1339_v34 = vsel %vm829_vm5, %v1326_v9, %v1338_v40 }
 0x481   : > { %v1294_v1 = vadd.f32 %v1279_v39, %v1275_v56  ;;  %v1340_v2 = vsel %vm831_vm6, %v1329_v42, %v1339_v34 }
 0x482   : > { %v1341_v23 = vsel %vm833_vm7, %v1332_v8, %v1340_v2 }
 0x483   : > { %v1333_v26 = vperm.slane %v1294_v1, %v2275_v51 }
 0x485   : > { %v1335_v49 = vsel %vm800_vm1, %v1334_v33, %v1333_v26 }
 0x486   : > { %v1342_v27 = vsel %vm835_vm8, %v1335_v49, %v1341_v23 }
 0x487   : > { %v1344_v29 = vsel %vm494_vm9, -inf, %v1342_v27 }
 0x488   : > { %v1345_v39 = vsel %vm839_vm10, %v1344_v29, -inf }
 0x489   : > { %1346 = vmax.xlane.f32.xlu2 %v1345_v39 }
 0x4fc   : > { %v1347_v52 = vpop.xlane.xlu2 %1346 }
 0x4fd   : > { %v1348_v38 = vsub.f32 %v1344_v29, %v1347_v52 }
 0x4ff   : > { %v1349_v61 = vmul.f32 1.442695, %v1348_v38 }
 0x501   : > { %1855 = vpow2.f32 %v1349_v61 }
 0x507   : > { %v1856_v58 = vpop.eup %1855 }
 0x508   : > { %v1351_v51 = vsel %vm839_vm10, %v1856_v58, 0.0 }
 0x509   : > { %1352 = vadd.xlane.f32.xlu0 %v1351_v51 }
 0x57c   : > { %v1353_v63 = vpop.xlane.xlu0 %1352 }
 0x57d   : > { %1857 = vrcp.f32 %v1353_v63  ;;  %v1365_v14 = vand.u32 2147483648, %v1353_v63  ;;  %v1363_v16 = vand.u32 2147483647, %v1353_v63  ;;  %vm1359_vm0 = vweird.f32 %v1353_v63 }
 0x57f   : > { %v1366_v47 = vor.u32 1.1754944e-38, %v1365_v14  ;;  %vm1364_vm9 = vcmp.eq.f32.partialorder %v1363_v16, 8.507059e+37 }
 0x583   : > { %v1858_v28 = vpop.eup %1857 }
 0x584   : > { %v1355_v17 = vmul.f32 %v1858_v28, %v1353_v63  ;;  %vm1360_vm15 = vweird.f32 %v1858_v28 }
 0x585   : > { %vm1361_vm1 = vmor %vm1359_vm0, %vm1360_vm15 }
 0x586   : > { %v1356_v20 = vsub.f32 1.0, %v1355_v17 }
 0x588   : > { %v1357_v54 = vmul.f32 %v1858_v28, %v1356_v20 }
 0x58a   : > { %v1358_v4 = vadd.f32 %v1858_v28, %v1357_v54 }
 0x58c   : > { %v1362_v37 = vsel %vm1361_vm1, %v1858_v28, %v1358_v4 }
 0x58d   : > { %v1367_v11 = vsel %vm1364_vm9, %v1366_v47, %v1362_v37 }
 0x58e   : > { %v1368_v32 = vmul.f32 %v1856_v58, %v1367_v11 }
 0x590   : > { %v1382_v12 = vperm.slane %v1368_v32, 1  ;;  %v1369_v24 = vperm.slane %v1368_v32, 0  ;;  %v1395_v5 = vperm.slane %v1368_v32, 2  ;;  %v1408_v35 = vperm.slane %v1368_v32, 3 }
 0x591   : > { %v1421_v7 = vperm.slane %v1368_v32, 4  ;;  %v1434_v30 = vperm.slane %v1368_v32, 5  ;;  %v1447_v10 = vperm.slane %v1368_v32, 6  ;;  %v1460_v22 = vperm.slane %v1368_v32, 7 }
 0x592   : > { %1387 = vperm.xlu0 %1771, %v1382_v12   ;;  %1380 = vperm.xlu2 %1772, %v1369_v24  }
 0x593   : > { %1374 = vperm.xlu1 %1773, %v1369_v24  }
 0x59a   : > { %1400 = vperm.xlu0 %1771, %v1395_v5   ;;  %1406 = vperm.xlu2 %1772, %v1395_v5  }
 0x59b   : > { %1774 = vset.pattern.permute.xlu1 %v2329_v3 }
 0x5a2   : > { %1776 = vset.pattern.permute.xlu0 %v2329_v3  ;;  %1777 = vset.pattern.permute.xlu2 %v2324_v50 }
 0x5a3   : > { %1393 = vperm.xlu1 %1774, %v1382_v12  }
 0x5aa   : > { %1419 = vperm.xlu0 %1776, %v1408_v35   ;;  %1426 = vperm.xlu2 %1777, %v1421_v7  }
 0x5ab   : > { %1775 = vset.pattern.permute.xlu1 %v2324_v50 }
 0x5b2   : > { %1779 = vset.pattern.permute.xlu0 %v2324_v50  ;;  %1439 = vperm.xlu2 %1777, %v1434_v30  }
 0x5b3   : > { %1413 = vperm.xlu1 %1775, %v1408_v35  }
 0x5ba   : > { %1452 = vperm.xlu0 %1779, %v1447_v10   ;;  %1780 = vset.pattern.permute.xlu2 %v2329_v3 }
 0x5bb   : > { %1778 = vset.pattern.permute.xlu1 %v2329_v3 }
 0x5c2   : > { %1458 = vperm.xlu2 %1780, %v1447_v10   ;;  %1782 = vset.pattern.permute.xlu0 %v2329_v3 }
 0x5c3   : > { %1432 = vperm.xlu1 %1778, %v1421_v7  }
 0x5ca   : > { %1471 = vperm.xlu2 %1780, %v1460_v22  }
 0x5cb   : > { %1445 = vperm.xlu1 %1778, %v1434_v30  }
 0x5d3   : > { %1781 = vset.pattern.permute.xlu1 %v2324_v50 }
 0x5db   : > { %1465 = vperm.xlu1 %1781, %v1460_v22  }
 0x5ec   : > { %v1381_v55 = vpop.permute.xlu2 %1380 }
 0x5ed   : > { %v1474_v50 = vmul.f32 %v1381_v55, %v2534_v46 }
 0x5f4   : > { %v1407_v6 = vpop.permute.xlu2 %1406 }
 0x604   : > { %v1388_v9 = vpop.permute.xlu0 %1387  ;;  %v1427_v62 = vpop.permute.xlu2 %1426 }
 0x605   : > { %v1375_v0 = vpop.permute.xlu1 %1374  ;;  %v1475_v3 = vmul.f32 %v1388_v9, %v2544_v53  ;;  %v1481_v39 = vmul.f32 %v1427_v62, %v2504_v19 }
 0x606   : > { %v1473_v2 = vmul.f32 %v1375_v0, %v2520_v43 }
 0x608   : > { %v1489_v27 = vadd.f32 %v1474_v50, %v1473_v2 }
 0x60a   : > { %v1490_v58 = vrot.slane %v1489_v27, 4 }
 0x60c   : > { %v1401_v56 = vpop.permute.xlu0 %1400  ;;  %v1440_v33 = vpop.permute.xlu2 %1439  ;;  %v1491_v20 = vadd.f32 %v1490_v58, %v1489_v27 }
 0x60d   : > { %v1477_v49 = vmul.f32 %v1401_v56, %v2564_v25 }
 0x615   : > { %v1394_v40 = vpop.permute.xlu1 %1393 }
 0x616   : > { %v1476_v42 = vmul.f32 %v1394_v40, %v2554_v48  ;;  %v1478_v48 = vmul.f32 %v1407_v6, %v2572_v13 }
 0x618   : > { %v1496_v26 = vadd.f32 %v1476_v42, %v1475_v3  ;;  %v1503_v38 = vadd.f32 %v1478_v48, %v1477_v49 }
 0x61a   : > { %v1497_v53 = vrot.slane %v1496_v26, 4  ;;  %v1504_v13 = vrot.slane %v1503_v38, 4 }
 0x61c   : > { %v1420_v1 = vpop.permute.xlu0 %1419  ;;  %v1459_v51 = vpop.permute.xlu2 %1458  ;;  %v1498_v63 = vadd.f32 %v1497_v53, %v1496_v26  ;;  %v1505_v47 = vadd.f32 %v1504_v13, %v1503_v38 }
 0x61d   : > { %v1480_v29 = vmul.f32 %v1420_v1, %v2502_v44  ;;  %v1486_v19 = vmul.f32 %v1459_v51, %v2547_v15 }
 0x61e   : > { %v1499_v16 = vrot.slane %v1498_v63, 2 }
 0x624   : > { %v1472_v7 = vpop.permute.xlu2 %1471 }
 0x625   : > { %v1414_v34 = vpop.permute.xlu1 %1413  ;;  %v1488_v6 = vmul.f32 %v1472_v7, %v2567_v31 }
 0x626   : > { %v1479_v8 = vmul.f32 %v1414_v34, %v2500_v36  ;;  %v1483_v36 = vmul.f32 %v1440_v33, %v2508_v21  ;;  %v1492_v21 = vrot.slane %v1491_v20, 2 }
 0x628   : > { %v1510_v52 = vadd.f32 %v1480_v29, %v1479_v8  ;;  %v1493_v5 = vadd.f32 %v1492_v21, %v1491_v20 }
 0x62a   : > { %v1511_v44 = vrot.slane %v1510_v52, 4  ;;  %v1494_v9 = vrot.slane %v1493_v5, 1 }
 0x62c   : > { %v1453_v43 = vpop.permute.xlu0 %1452  ;;  %v1512_v4 = vadd.f32 %v1511_v44, %v1510_v52  ;;  %v1495_v2 = vadd.f32 %v1494_v9, %v1493_v5 }
 0x62e   : > { %v1513_v12 = vrot.slane %v1512_v4, 2 }
 0x630   : > { %v1514_v10 = vadd.f32 %v1513_v12, %v1512_v4 }
 0x632   : > { %v1515_v42 = vrot.slane %v1514_v10, 1 }
 0x634   : > { %v1516_v49 = vadd.f32 %v1515_v42, %v1514_v10 }
 0x635   : > { %v1433_v41 = vpop.permute.xlu1 %1432 }
 0x636   : > { %v1482_v23 = vmul.f32 %v1433_v41, %v2506_v60  ;;  %v1485_v60 = vmul.f32 %v1453_v43, %v2526_v18  ;;  %v1506_v18 = vrot.slane %v1505_v47, 2 }
 0x638   : > { %v1517_v61 = vadd.f32 %v1482_v23, %v1481_v39  ;;  %v1531_v54 = vadd.f32 %v1486_v19, %v1485_v60  ;;  %v1507_v22 = vadd.f32 %v1506_v18, %v1505_v47 }
 0x63a   : > { %v1518_v17 = vrot.slane %v1517_v61, 4  ;;  %v1532_v32 = vrot.slane %v1531_v54, 4  ;;  %v1508_v41 = vrot.slane %v1507_v22, 1 }
 0x63c   : > { %v1519_v37 = vadd.f32 %v1518_v17, %v1517_v61  ;;  %v1533_v30 = vadd.f32 %v1532_v32, %v1531_v54  ;;  %v1509_v31 = vadd.f32 %v1508_v41, %v1507_v22 }
 0x63d   : > { %v1446_v46 = vpop.permute.xlu1 %1445 }
 0x63e   : > { %v1484_v25 = vmul.f32 %v1446_v46, %v2517_v57  ;;  %v1500_v57 = vadd.f32 %v1499_v16, %v1498_v63  ;;  %v1520_v24 = vrot.slane %v1519_v37, 2  ;;  %v1534_v56 = vrot.slane %v1533_v30, 2 }
 0x640   : > { %v1524_v28 = vadd.f32 %v1484_v25, %v1483_v36  ;;  %v1501_v15 = vrot.slane %v1500_v57, 1  ;;  %v1521_v55 = vadd.f32 %v1520_v24, %v1519_v37  ;;  %v1535_v26 = vadd.f32 %v1534_v56, %v1533_v30 }
 0x642   : > { %v1525_v14 = vrot.slane %v1524_v28, 4  ;;  %v1502_v34 = vadd.f32 %v1501_v15, %v1500_v57  ;;  %v1522_v3 = vrot.slane %v1521_v55, 1  ;;  %v1536_v39 = vrot.slane %v1535_v26, 1 }
 0x644   : > { %v1526_v11 = vadd.f32 %v1525_v14, %v1524_v28  ;;  %v1553_v8 = vsel %vm823_vm2, %v1502_v34, %v1495_v2  ;;  %v1523_v27 = vadd.f32 %v1522_v3, %v1521_v55  ;;  %v1537_v46 = vadd.f32 %v1536_v39, %v1535_v26 }
 0x645   : > { %v1554_v48 = vsel %vm825_vm3, %v1509_v31, %v1553_v8 }
 0x646   : > { %v1527_v35 = vrot.slane %v1526_v11, 2  ;;  %v1555_v53 = vsel %vm827_vm4, %v1516_v49, %v1554_v48 }
 0x647   : > { %v1556_v43 = vsel %vm829_vm5, %v1523_v27, %v1555_v53 }
 0x648   : > { %v1528_v40 = vadd.f32 %v1527_v35, %v1526_v11 }
 0x64a   : > { %v1529_v33 = vrot.slane %v1528_v40, 1 }
 0x64c   : > { %v1530_v29 = vadd.f32 %v1529_v33, %v1528_v40 }
 0x64d   : > { %v1466_v0 = vpop.permute.xlu1 %1465 }
 0x64e   : > { %v1487_v62 = vmul.f32 %v1466_v0, %v2557_v59  ;;  %v1557_v61 = vsel %vm831_vm6, %v1530_v29, %v1556_v43 }
 0x64f   : > { %v1558_v36 = vsel %vm833_vm7, %v1537_v46, %v1557_v61 }
 0x650   : > { %v1538_v1 = vadd.f32 %v1488_v6, %v1487_v62 }
 0x652   : > { %v1539_v50 = vrot.slane %v1538_v1, 4 }
 0x654   : > { %v1540_v23 = vadd.f32 %v1539_v50, %v1538_v1 }
 0x656   : > { %v1541_v59 = vrot.slane %v1540_v23, 2 }
 0x658   : > { %v1542_v52 = vadd.f32 %v1541_v59, %v1540_v23 }
 0x65a   : > { %v1543_v38 = vrot.slane %v1542_v52, 1 }
 0x65c   : > { %v1544_v58 = vadd.f32 %v1543_v38, %v1542_v52 }
 0x65e   : > { %v1559_v51 = vsel %vm835_vm8, %v1544_v58, %v1558_v36 }
 0x65f   : > { %v1561_v25 = vadd.f32 %v1559_v51, %v2513_v45 }
 0x661   : > { %1562 = vst [vmem:[%s462_s18] sm:$0xff] %v1561_v25 }
 0x662   : > { %1886 = shalt.err (!%p1883_p4)
}
 0x663   : > { %1724 = dma.vmem_to_hbm [thread:$0]  (%p2037_p5), %s1577_s7, 128, %s1579_s22, %s1564_s23  }
 0x664 PF: > { %p1730_p7 = scmp.ge.s32.totalorder %s1921_s15, 2  ;;  %s1590_s19 = sand.u32 1, %s1909_s29  }
 0x665   : > { %s1591_s25 = scalar_lea.sflag [#allocation5], %s1590_s19 }
 0x666   : > { %p1727_p8 = pnand %p1730_p7, %p2041_p6 }
 0x668   : > { %p1728_p9 = pneg %p1727_p8 }
 0x66a   : > { %1904 = dma.done.wait (%p1728_p9), %s1591_s25, 128  }
 0x66b   : > { %1906 = vsyncadd (%p1728_p9), %s1591_s25, 4294967168  ;;  %s2707_s15 = sld [smem:[#allocation8_spill]]  ;;  %s2710_s29 = smov %s1913_s30 }
 0x66c   : > { %s2708_s17 = sld [smem:[#allocation7_spill]] }
 0x66d   : > { %s2709_s14 = sld [smem:[#allocation9_spill]] }
 0x671   : > { %p25_p10 = scmp.ge.s32.totalorder %s2707_s15, 4  }
 0x672   : > { %s2711_s30 = smov %s2708_s17 }
 0x673   :  { %27 = sbr.rel (!%p25_p10) target bundleno = 6 (0x6), region = 113 }
 0x678   :  { %1597 = vsyncpa [#allocation5], 1 }
 0x679   :  { %1599 = vsyncpa [#allocation5 + $0x1], 1 }

</bundles_post_ra>
